<compile_context>
chip_gen: v5e
topology: v5e:2x2
jax: 0.10.0
libtpu: 0.0.40
codegen_flags: <defaults>
</compile_context>

<pallas_src>
import functools

import jax
import jax.numpy as jnp
from jax.experimental import pallas as pl
from jax.experimental.pallas import tpu as pltpu

LN_EPS = 1e-5


def _round_up(x, m):
    return ((x + m - 1) // m) * m


def _pick_block_rows(n, d, f, cap_rows, u_bcast, p_bcast):
    """Largest row tile that fits a ~10 MiB VMEM budget (v5e-safe)."""
    # Double-buffered blocks: unary + pair + out + attn + gate, plus in-kernel
    # f32 intermediates (act_u, act_p, slack) and the (bm, F) gate/logits.
    bytes_per_row = 4 * (
        2 * ((0 if u_bcast else d) + (0 if p_bcast else d) + d + 1 + 1)
        + 3 * d + f
    )
    budget = 10 << 20
    rows = max(8, budget // max(bytes_per_row, 1))
    if rows >= 128:
        rows = (rows // 128) * 128
    else:
        rows = max(8, (rows // 8) * 8)

    bm = min(cap_rows, rows)
    # Don't over-cover small inputs (round to the 8-sublane granule).
    bm = min(bm, _round_up(n, 8))
    # For large inputs keep >= 2 grid steps so both v7x TensorCores get work;
    # at bm >= 1024 the extra ~0.35 us/step is negligible on 1-TC chips, so no
    # per-chip detection is needed.
    if n >= 2048:
        bm = min(bm, _round_up(-(-n // 2), 128))
    return max(8, bm)


def _mpu_kernel(u_ref, p_ref, attn_ref,
                ln_w_u_ref, ln_w_p_ref, ln_b_u_ref, ln_b_p_ref,
                w_u_ref, w_p_ref, b_ref,
                out_ref, gate_ref, *, act_dtype):
    # One row-tile of the batch per grid step; all compute stays in VMEM.
    u = u_ref[...].astype(jnp.float32)            # (bm or 1, D)
    p = p_ref[...].astype(jnp.float32)            # (bm or 1, D)
    attn = attn_ref[...].astype(jnp.float32)      # (bm, 1)

    d = u.shape[1]
    inv_two_d = 1.0 / (2.0 * d)

    # --- LayerNorm over cat([u, p], 1), single stats pass, no concat --------
    # mean = (sum(u) + sum(p)) / 2D ; var = (sum(u^2) + sum(p^2)) / 2D - mean^2
    sum_u = jnp.sum(u, axis=1, keepdims=True)
    sum_p = jnp.sum(p, axis=1, keepdims=True)
    ssq_u = jnp.sum(u * u, axis=1, keepdims=True)
    ssq_p = jnp.sum(p * p, axis=1, keepdims=True)
    mean = (sum_u + sum_p) * inv_two_d            # (bm, 1) via broadcasting
    var = (ssq_u + ssq_p) * inv_two_d - mean * mean
    rstd = jax.lax.rsqrt(jnp.maximum(var, 0.0) + LN_EPS)   # torch default eps

    # Fused normalize + affine + ReLU (no cu/cp intermediates).
    act_u = jnp.maximum((u - mean) * rstd * ln_w_u_ref[...] + ln_b_u_ref[...], 0.0)
    act_p = jnp.maximum((p - mean) * rstd * ln_w_p_ref[...] + ln_b_p_ref[...], 0.0)

    # --- Linear(2D -> F) split across the two halves; accumulate on the MXU --
    logits = jnp.dot(act_u.astype(act_dtype), w_u_ref[...],
                     preferred_element_type=jnp.float32)
    logits = logits + jnp.dot(act_p.astype(act_dtype), w_p_ref[...],
                              preferred_element_type=jnp.float32)
    gate = jax.nn.sigmoid(logits + b_ref[...])    # (bm, F)

    # Single reduction; combine the two per-row scalars before the wide mul.
    gate_col = jnp.mean(gate, axis=1, keepdims=True)        # (bm, 1)
    scale = gate_col * attn                                  # (bm, 1)
    out_ref[...] = (p * scale).astype(out_ref.dtype)
    gate_ref[...] = gate_col.astype(gate_ref.dtype)


@functools.partial(jax.jit, static_argnames=("block_rows",))
def message_passing_unit_v1(unary_term, pair_term, attn_value, params,
                            block_rows=2048):
    """JAX/Pallas equivalent of MessagePassingUnit_v1.forward.

    unary_term: (Nu, D), pair_term: (Np, D), attn_value: (N,).
    Returns (output (N, D), gate (N,)).
    """
    n_u, d = unary_term.shape
    n_p = pair_term.shape[0]
    # expand() branches of the reference; handled via BlockSpec, not by
    # materializing an N x D broadcast in HBM.
    u_bcast = (n_u == 1 and n_p > 1)
    p_bcast = (n_p == 1 and n_u > 1)
    n = max(n_u, n_p)

    f = params["lin_w"].shape[1]
    compute_dtype = (jnp.bfloat16 if pair_term.dtype == jnp.bfloat16
                     else jnp.float32)

    bm = _pick_block_rows(n, d, f, block_rows, u_bcast, p_bcast)
    grid = (pl.cdiv(n, bm),)   # ragged last block handled in-kernel (per-row math)

    attn2d = attn_value.reshape(n, 1).astype(jnp.float32)

    # --- split the LayerNorm / Linear params into their unary/pair halves ---
    two_d = 2 * d
    ln_w = params["ln_w"].reshape(1, two_d).astype(jnp.float32)
    ln_b = params["ln_b"].reshape(1, two_d).astype(jnp.float32)
    ln_w_u, ln_w_p = ln_w[:, :d], ln_w[:, d:]
    ln_b_u, ln_b_p = ln_b[:, :d], ln_b[:, d:]
    w = params["lin_w"].astype(compute_dtype)      # (2D, F) = torch W^T
    w_u, w_p = w[:d, :], w[d:, :]
    bias = params["lin_b"].reshape(1, f).astype(jnp.float32)

    u_spec = (pl.BlockSpec((1, d), lambda i: (0, 0)) if u_bcast
              else pl.BlockSpec((bm, d), lambda i: (i, 0)))
    p_spec = (pl.BlockSpec((1, d), lambda i: (0, 0)) if p_bcast
              else pl.BlockSpec((bm, d), lambda i: (i, 0)))

    read_u = d if u_bcast else n * d
    read_p = d if p_bcast else n * d
    cost = pl.CostEstimate(
        flops=int(n * (4 * d * f + 14 * d + 3 * f + 10)),
        transcendentals=int(n * (f + 1)),
        bytes_accessed=int(4 * (read_u + read_p + n
                                + 2 * d * f + 4 * d + f
                                + n * d + n)),
    )

    kernel = functools.partial(_mpu_kernel, act_dtype=compute_dtype)

    out, gate2d = pl.pallas_call(
        kernel,
        out_shape=(
            jax.ShapeDtypeStruct((n, d), pair_term.dtype),
            jax.ShapeDtypeStruct((n, 1), jnp.float32),
        ),
        grid_spec=pltpu.PrefetchScalarGridSpec(
            num_scalar_prefetch=0,
            grid=grid,
            in_specs=[
                u_spec,                                    # unary rows (or 1 row)
                p_spec,                                    # pair rows (or 1 row)
                pl.BlockSpec((bm, 1), lambda i: (i, 0)),   # attn
                pl.BlockSpec((1, d), lambda i: (0, 0)),    # ln weight (u half)
                pl.BlockSpec((1, d), lambda i: (0, 0)),    # ln weight (p half)
                pl.BlockSpec((1, d), lambda i: (0, 0)),    # ln bias   (u half)
                pl.BlockSpec((1, d), lambda i: (0, 0)),    # ln bias   (p half)
                pl.BlockSpec((d, f), lambda i: (0, 0)),    # W^T top half
                pl.BlockSpec((d, f), lambda i: (0, 0)),    # W^T bottom half
                pl.BlockSpec((1, f), lambda i: (0, 0)),    # linear bias
            ],
            out_specs=[
                pl.BlockSpec((bm, d), lambda i: (i, 0)),   # output rows (lane-dense)
                pl.BlockSpec((bm, 1), lambda i: (i, 0)),   # gate column (tiny)
            ],
        ),
        compiler_params=pltpu.CompilerParams(
            dimension_semantics=("parallel",),
            vmem_limit_bytes=32 << 20),
        cost_estimate=cost,
    )(unary_term, pair_term, attn2d,
      ln_w_u, ln_w_p, ln_b_u, ln_b_p, w_u, w_p, bias)

    return out, gate2d[:, 0]


def init_params(key, input_dim, filter_dim=64):
    """Deterministic synthetic parameters matching the module's __init__ shapes."""
    two_d = 2 * input_dim
    k1, k2 = jax.random.split(key)
    return {
        # nn.LayerNorm(2*input_dim): weight=1, bias=0 at init
        "ln_w": jnp.ones((1, two_d), jnp.float32),
        "ln_b": jnp.zeros((1, two_d), jnp.float32),
        # nn.Linear(2*input_dim, filter_dim): stored as (2D, F) = W^T
        "lin_w": (jax.random.normal(k1, (two_d, filter_dim), jnp.float32)
                  * (1.0 / jnp.sqrt(two_d))),
        "lin_b": (jax.random.normal(k2, (1, filter_dim), jnp.float32) * 0.01),
        # TODO(synk): gate_weight / aux_gate_weight are module parameters but
        # are never used in forward(); kept only for shape parity.
        "gate_weight": jnp.array([0.5], jnp.float32),
        "aux_gate_weight": jnp.array([0.5], jnp.float32),
    }


def _reference(unary, pair, attn, params):
    """Pure-JAX reference for a correctness check."""
    if unary.shape[0] == 1 and pair.shape[0] > 1:
        unary = jnp.broadcast_to(unary, (pair.shape[0], unary.shape[1]))
    if unary.shape[0] > 1 and pair.shape[0] == 1:
        pair = jnp.broadcast_to(pair, (unary.shape[0], pair.shape[1]))
    feats = jnp.concatenate([unary, pair], axis=1)
    mu = feats.mean(1, keepdims=True)
    var = ((feats - mu) ** 2).mean(1, keepdims=True)
    normed = (feats - mu) / jnp.sqrt(var + LN_EPS)
    normed = normed * params["ln_w"] + params["ln_b"]
    gate = jax.nn.sigmoid(jnp.maximum(normed, 0.0) @ params["lin_w"]
                          + params["lin_b"])
    gate = gate.mean(1)
    out = pair * gate[:, None] * attn[:, None]
    return out, gate


if __name__ == "__main__":
    INPUT_DIM = 128     # lane-aligned feature width
    FILTER_DIM = 64
    N = 300             # deliberately NOT a multiple of the row tile / 128

    key = jax.random.PRNGKey(0)
    k_u, k_p, k_a, k_par = jax.random.split(key, 4)

    unary = jax.random.normal(k_u, (N, INPUT_DIM), jnp.float32)
    pair = jax.random.normal(k_p, (N, INPUT_DIM), jnp.float32)
    attn = jax.random.uniform(k_a, (N,), jnp.float32)
    params = init_params(k_par, INPUT_DIM, FILTER_DIM)

    out, gate = message_passing_unit_v1(unary, pair, attn, params)
    jax.block_until_ready((out, gate))

    ref_out, ref_gate = _reference(unary, pair, attn, params)
    assert out.shape == (N, INPUT_DIM) and gate.shape == (N,)
    assert jnp.allclose(out, ref_out, atol=1e-4, rtol=1e-4)
    assert jnp.allclose(gate, ref_gate, atol=1e-4, rtol=1e-4)

    # Exercise the expand() broadcasting branch (1-row unary vs N-row pair),
    # which is now handled by a (1, D) BlockSpec instead of broadcast_to.
    out_b, gate_b = message_passing_unit_v1(unary[:1], pair, attn, params)
    jax.block_until_ready((out_b, gate_b))
    ref_out_b, ref_gate_b = _reference(unary[:1], pair, attn, params)
    assert jnp.allclose(out_b, ref_out_b, atol=1e-4, rtol=1e-4)
    assert jnp.allclose(gate_b, ref_gate_b, atol=1e-4, rtol=1e-4)

    print("KERNEL_OK")
</pallas_src>

<mosaic_0001>
module attributes {stable_mosaic.version = 11 : i64} {
  func.func @_mpu_kernel(%arg0: i32, %arg1: memref<304x128xf32, #tpu.memory_space<vmem>>, %arg2: memref<304x128xf32, #tpu.memory_space<vmem>>, %arg3: memref<304x1xf32, #tpu.memory_space<vmem>>, %arg4: memref<1x128xf32, #tpu.memory_space<vmem>>, %arg5: memref<1x128xf32, #tpu.memory_space<vmem>>, %arg6: memref<1x128xf32, #tpu.memory_space<vmem>>, %arg7: memref<1x128xf32, #tpu.memory_space<vmem>>, %arg8: memref<128x64xf32, #tpu.memory_space<vmem>>, %arg9: memref<128x64xf32, #tpu.memory_space<vmem>>, %arg10: memref<1x64xf32, #tpu.memory_space<vmem>>, %arg11: memref<304x128xf32, #tpu.memory_space<vmem>>, %arg12: memref<304x1xf32, #tpu.memory_space<vmem>>) attributes {dimension_semantics = [#tpu.dimension_semantics<parallel>], iteration_bounds = array<i64: 1>, scalar_prefetch = 0 : i64, scratch_operands = 0 : i64, tpu.core_type = #tpu.core_type<tc>, window_params = [{transform_indices = @transform_0, window_bounds = array<i64: 304, 128>}, {transform_indices = @transform_1, window_bounds = array<i64: 304, 128>}, {transform_indices = @transform_2, window_bounds = array<i64: 304, 1>}, {pipeline_mode = #tpu.pipeline_mode<synchronous>, transform_indices = @transform_3, window_bounds = array<i64: 1, 128>}, {pipeline_mode = #tpu.pipeline_mode<synchronous>, transform_indices = @transform_4, window_bounds = array<i64: 1, 128>}, {pipeline_mode = #tpu.pipeline_mode<synchronous>, transform_indices = @transform_5, window_bounds = array<i64: 1, 128>}, {pipeline_mode = #tpu.pipeline_mode<synchronous>, transform_indices = @transform_6, window_bounds = array<i64: 1, 128>}, {pipeline_mode = #tpu.pipeline_mode<synchronous>, transform_indices = @transform_7, window_bounds = array<i64: 128, 64>}, {pipeline_mode = #tpu.pipeline_mode<synchronous>, transform_indices = @transform_8, window_bounds = array<i64: 128, 64>}, {pipeline_mode = #tpu.pipeline_mode<synchronous>, transform_indices = @transform_9, window_bounds = array<i64: 1, 64>}, {transform_indices = @transform_10, window_bounds = array<i64: 304, 128>}, {transform_indices = @transform_11, window_bounds = array<i64: 304, 1>}]} {
    %c0 = arith.constant 0 : index
    %c0_0 = arith.constant 0 : index
    %0 = vector.load %arg1[%c0, %c0_0] : memref<304x128xf32, #tpu.memory_space<vmem>>, vector<304x128xf32>
    %c0_1 = arith.constant 0 : index
    %c0_2 = arith.constant 0 : index
    %1 = vector.load %arg2[%c0_1, %c0_2] : memref<304x128xf32, #tpu.memory_space<vmem>>, vector<304x128xf32>
    %c0_3 = arith.constant 0 : index
    %c0_4 = arith.constant 0 : index
    %2 = vector.load %arg3[%c0_3, %c0_4] : memref<304x1xf32, #tpu.memory_space<vmem>>, vector<304x1xf32>
    %cst = arith.constant dense<0.000000e+00> : vector<304xf32>
    %3 = vector.multi_reduction <add>, %0, %cst [1] : vector<304x128xf32> to vector<304xf32>
    %4 = vector.shape_cast %3 : vector<304xf32> to vector<304x1xf32>
    %cst_5 = arith.constant dense<0.000000e+00> : vector<304xf32>
    %5 = vector.multi_reduction <add>, %1, %cst_5 [1] : vector<304x128xf32> to vector<304xf32>
    %6 = vector.shape_cast %5 : vector<304xf32> to vector<304x1xf32>
    %7 = arith.mulf %0, %0 : vector<304x128xf32>
    %cst_6 = arith.constant dense<0.000000e+00> : vector<304xf32>
    %8 = vector.multi_reduction <add>, %7, %cst_6 [1] : vector<304x128xf32> to vector<304xf32>
    %9 = vector.shape_cast %8 : vector<304xf32> to vector<304x1xf32>
    %10 = arith.mulf %1, %1 : vector<304x128xf32>
    %cst_7 = arith.constant dense<0.000000e+00> : vector<304xf32>
    %11 = vector.multi_reduction <add>, %10, %cst_7 [1] : vector<304x128xf32> to vector<304xf32>
    %12 = vector.shape_cast %11 : vector<304xf32> to vector<304x1xf32>
    %13 = arith.addf %4, %6 : vector<304x1xf32>
    %cst_8 = arith.constant 3.906250e-03 : f32
    %14 = vector.broadcast %cst_8 : f32 to vector<304x1xf32>
    %15 = arith.mulf %13, %14 : vector<304x1xf32>
    %16 = arith.addf %9, %12 : vector<304x1xf32>
    %cst_9 = arith.constant 3.906250e-03 : f32
    %17 = vector.broadcast %cst_9 : f32 to vector<304x1xf32>
    %18 = arith.mulf %16, %17 : vector<304x1xf32>
    %19 = arith.mulf %15, %15 : vector<304x1xf32>
    %20 = arith.subf %18, %19 : vector<304x1xf32>
    %cst_10 = arith.constant 0.000000e+00 : f32
    %21 = vector.broadcast %cst_10 : f32 to vector<304x1xf32>
    %22 = arith.maximumf %20, %21 : vector<304x1xf32>
    %cst_11 = arith.constant 9.99999974E-6 : f32
    %23 = vector.broadcast %cst_11 : f32 to vector<304x1xf32>
    %24 = arith.addf %22, %23 : vector<304x1xf32>
    %25 = math.rsqrt %24 : vector<304x1xf32>
    %26 = vector.broadcast %15 : vector<304x1xf32> to vector<304x128xf32>
    %27 = arith.subf %0, %26 : vector<304x128xf32>
    %28 = vector.broadcast %25 : vector<304x1xf32> to vector<304x128xf32>
    %29 = arith.mulf %27, %28 : vector<304x128xf32>
    %c0_12 = arith.constant 0 : index
    %c0_13 = arith.constant 0 : index
    %30 = vector.load %arg4[%c0_12, %c0_13] : memref<1x128xf32, #tpu.memory_space<vmem>>, vector<1x128xf32>
    %31 = vector.broadcast %30 : vector<1x128xf32> to vector<304x128xf32>
    %32 = arith.mulf %29, %31 : vector<304x128xf32>
    %c0_14 = arith.constant 0 : index
    %c0_15 = arith.constant 0 : index
    %33 = vector.load %arg6[%c0_14, %c0_15] : memref<1x128xf32, #tpu.memory_space<vmem>>, vector<1x128xf32>
    %34 = vector.broadcast %33 : vector<1x128xf32> to vector<304x128xf32>
    %35 = arith.addf %32, %34 : vector<304x128xf32>
    %cst_16 = arith.constant 0.000000e+00 : f32
    %36 = vector.broadcast %cst_16 : f32 to vector<304x128xf32>
    %37 = arith.maximumf %35, %36 : vector<304x128xf32>
    %38 = vector.broadcast %15 : vector<304x1xf32> to vector<304x128xf32>
    %39 = arith.subf %1, %38 : vector<304x128xf32>
    %40 = vector.broadcast %25 : vector<304x1xf32> to vector<304x128xf32>
    %41 = arith.mulf %39, %40 : vector<304x128xf32>
    %c0_17 = arith.constant 0 : index
    %c0_18 = arith.constant 0 : index
    %42 = vector.load %arg5[%c0_17, %c0_18] : memref<1x128xf32, #tpu.memory_space<vmem>>, vector<1x128xf32>
    %43 = vector.broadcast %42 : vector<1x128xf32> to vector<304x128xf32>
    %44 = arith.mulf %41, %43 : vector<304x128xf32>
    %c0_19 = arith.constant 0 : index
    %c0_20 = arith.constant 0 : index
    %45 = vector.load %arg7[%c0_19, %c0_20] : memref<1x128xf32, #tpu.memory_space<vmem>>, vector<1x128xf32>
    %46 = vector.broadcast %45 : vector<1x128xf32> to vector<304x128xf32>
    %47 = arith.addf %44, %46 : vector<304x128xf32>
    %cst_21 = arith.constant 0.000000e+00 : f32
    %48 = vector.broadcast %cst_21 : f32 to vector<304x128xf32>
    %49 = arith.maximumf %47, %48 : vector<304x128xf32>
    %c0_22 = arith.constant 0 : index
    %c0_23 = arith.constant 0 : index
    %50 = vector.load %arg8[%c0_22, %c0_23] : memref<128x64xf32, #tpu.memory_space<vmem>>, vector<128x64xf32>
    %cst_24 = arith.constant dense<0.000000e+00> : vector<304x64xf32>
    %51 = tpu.matmul %37, %50, %cst_24 {dimension_numbers = #tpu.dot_dimension_numbers<[1], [0], [0], [1], [0, 0, 1, 1], [], []>} : vector<304x128xf32>, vector<128x64xf32>, vector<304x64xf32> -> vector<304x64xf32>
    %c0_25 = arith.constant 0 : index
    %c0_26 = arith.constant 0 : index
    %52 = vector.load %arg9[%c0_25, %c0_26] : memref<128x64xf32, #tpu.memory_space<vmem>>, vector<128x64xf32>
    %cst_27 = arith.constant dense<0.000000e+00> : vector<304x64xf32>
    %53 = tpu.matmul %49, %52, %cst_27 {dimension_numbers = #tpu.dot_dimension_numbers<[1], [0], [0], [1], [0, 0, 1, 1], [], []>} : vector<304x128xf32>, vector<128x64xf32>, vector<304x64xf32> -> vector<304x64xf32>
    %54 = arith.addf %51, %53 : vector<304x64xf32>
    %c0_28 = arith.constant 0 : index
    %c0_29 = arith.constant 0 : index
    %55 = vector.load %arg10[%c0_28, %c0_29] : memref<1x64xf32, #tpu.memory_space<vmem>>, vector<1x64xf32>
    %56 = vector.broadcast %55 : vector<1x64xf32> to vector<304x64xf32>
    %57 = arith.addf %54, %56 : vector<304x64xf32>
    %58 = arith.negf %57 : vector<304x64xf32>
    %59 = math.exp %58 : vector<304x64xf32>
    %cst_30 = arith.constant 1.000000e+00 : f32
    %60 = vector.broadcast %cst_30 : f32 to vector<304x64xf32>
    %61 = arith.addf %60, %59 : vector<304x64xf32>
    %62 = arith.divf %60, %61 : vector<304x64xf32>
    %cst_31 = arith.constant dense<0.000000e+00> : vector<304xf32>
    %63 = vector.multi_reduction <add>, %62, %cst_31 [1] : vector<304x64xf32> to vector<304xf32>
    %64 = vector.shape_cast %63 : vector<304xf32> to vector<304x1xf32>
    %cst_32 = arith.constant 6.400000e+01 : f32
    %65 = vector.broadcast %cst_32 : f32 to vector<304x1xf32>
    %66 = arith.divf %64, %65 : vector<304x1xf32>
    %67 = arith.mulf %66, %2 : vector<304x1xf32>
    %68 = vector.broadcast %67 : vector<304x1xf32> to vector<304x128xf32>
    %69 = arith.mulf %1, %68 : vector<304x128xf32>
    %c0_33 = arith.constant 0 : index
    %c0_34 = arith.constant 0 : index
    %70 = vector.load %arg11[%c0_33, %c0_34] : memref<304x128xf32, #tpu.memory_space<vmem>>, vector<304x128xf32>
    tpu.vector_store %arg11[%c0_33, %c0_34], %69 {strides = array<i32>} : memref<304x128xf32, #tpu.memory_space<vmem>>, vector<304x128xf32>,
    %c0_35 = arith.constant 0 : index
    %c0_36 = arith.constant 0 : index
    %71 = vector.load %arg12[%c0_35, %c0_36] : memref<304x1xf32, #tpu.memory_space<vmem>>, vector<304x1xf32>
    tpu.vector_store %arg12[%c0_35, %c0_36], %66 {strides = array<i32>} : memref<304x1xf32, #tpu.memory_space<vmem>>, vector<304x1xf32>,
    return
  }
  func.func @transform_0(%arg0: i32) -> (i32, i32) {
    %c0_i32 = arith.constant 0 : i32
    %c0_i32_0 = arith.constant 0 : i32
    return %arg0, %c0_i32 : i32, i32
  }
  func.func @transform_1(%arg0: i32) -> (i32, i32) {
    %c0_i32 = arith.constant 0 : i32
    %c0_i32_0 = arith.constant 0 : i32
    return %arg0, %c0_i32 : i32, i32
  }
  func.func @transform_2(%arg0: i32) -> (i32, i32) {
    %c0_i32 = arith.constant 0 : i32
    %c0_i32_0 = arith.constant 0 : i32
    return %arg0, %c0_i32 : i32, i32
  }
  func.func @transform_3(%arg0: i32) -> (i32, i32) {
    %c0_i32 = arith.constant 0 : i32
    %c0_i32_0 = arith.constant 0 : i32
    %c0_i32_1 = arith.constant 0 : i32
    return %c0_i32, %c0_i32_0 : i32, i32
  }
  func.func @transform_4(%arg0: i32) -> (i32, i32) {
    %c0_i32 = arith.constant 0 : i32
    %c0_i32_0 = arith.constant 0 : i32
    %c0_i32_1 = arith.constant 0 : i32
    return %c0_i32, %c0_i32_0 : i32, i32
  }
  func.func @transform_5(%arg0: i32) -> (i32, i32) {
    %c0_i32 = arith.constant 0 : i32
    %c0_i32_0 = arith.constant 0 : i32
    %c0_i32_1 = arith.constant 0 : i32
    return %c0_i32, %c0_i32_0 : i32, i32
  }
  func.func @transform_6(%arg0: i32) -> (i32, i32) {
    %c0_i32 = arith.constant 0 : i32
    %c0_i32_0 = arith.constant 0 : i32
    %c0_i32_1 = arith.constant 0 : i32
    return %c0_i32, %c0_i32_0 : i32, i32
  }
  func.func @transform_7(%arg0: i32) -> (i32, i32) {
    %c0_i32 = arith.constant 0 : i32
    %c0_i32_0 = arith.constant 0 : i32
    %c0_i32_1 = arith.constant 0 : i32
    return %c0_i32, %c0_i32_0 : i32, i32
  }
  func.func @transform_8(%arg0: i32) -> (i32, i32) {
    %c0_i32 = arith.constant 0 : i32
    %c0_i32_0 = arith.constant 0 : i32
    %c0_i32_1 = arith.constant 0 : i32
    return %c0_i32, %c0_i32_0 : i32, i32
  }
  func.func @transform_9(%arg0: i32) -> (i32, i32) {
    %c0_i32 = arith.constant 0 : i32
    %c0_i32_0 = arith.constant 0 : i32
    %c0_i32_1 = arith.constant 0 : i32
    return %c0_i32, %c0_i32_0 : i32, i32
  }
  func.func @transform_10(%arg0: i32) -> (i32, i32) {
    %c0_i32 = arith.constant 0 : i32
    %c0_i32_0 = arith.constant 0 : i32
    return %arg0, %c0_i32 : i32, i32
  }
  func.func @transform_11(%arg0: i32) -> (i32, i32) {
    %c0_i32 = arith.constant 0 : i32
    %c0_i32_0 = arith.constant 0 : i32
    return %arg0, %c0_i32 : i32, i32
  }
}

</mosaic_0001>

<bundles_post_ra>
// kernel: message_passing_unit_v1.1
= control target key start
LH: loop header
LB: loop body
LE: loop exit
PB: predicated region body
PF: predicated region fallthrough
CT: control target
= control target key end

     0   :  { %s7726_s0 = inlined_call_operand.vmem [shape: f32[300,128], index: 0, kind: input, shape index: {}]   ;;  %s7727_s1 = inlined_call_operand.vmem [shape: f32[300,128], index: 1, kind: input, shape index: {}]   ;;  %s7728_s2 = inlined_call_operand.vmem [shape: f32[300,1], index: 2, kind: input, shape index: {}]   ;;  %s7729_s3 = inlined_call_operand.vmem [shape: f32[1,128], index: 3, kind: input, shape index: {}]   ;;  %s7730_s4 = inlined_call_operand.vmem [shape: f32[1,128], index: 4, kind: input, shape index: {}]   ;;  %s7731_s5 = inlined_call_operand.vmem [shape: f32[1,128], index: 5, kind: input, shape index: {}]   ;;  %s7732_s6 = inlined_call_operand.vmem [shape: f32[1,128], index: 6, kind: input, shape index: {}]   ;;  %s7733_s7 = inlined_call_operand.vmem [shape: f32[128,64], index: 7, kind: input, shape index: {}]   ;;  %s7734_s8 = inlined_call_operand.vmem [shape: f32[128,64], index: 8, kind: input, shape index: {}]   ;;  %s7735_s9 = inlined_call_operand.vmem [shape: f32[1,64], index: 9, kind: input, shape index: {}]   ;;  %s7736_s10 = inlined_call_operand.hbm [shape: f32[300,128], index: 10, kind: output, shape index: {0}]   ;;  %s7737_s11 = inlined_call_operand.vmem [shape: f32[300,1], index: 11, kind: output, shape index: {1}]  }
   0x1   :  { %v3691_v0 = vld [vmem:[%s7726_s0 + $0x20] sm:$0xff]  ;;  %v3696_v1 = vld [vmem:[%s7726_s0 + $0x10] sm:$0xff]  ;;  %v3709_v3 = vld [vmem:[%s7726_s0 + $0x28] sm:$0xff] }
   0x2   :  { %7922 = vst [vmem:[#allocation5_spill] sm:$0xff] %v3691_v0  ;;  %v3701_v2 = vld [vmem:[%s7726_s0] sm:$0xff]  ;;  %160 = vadd.xlane.f32.xlu2 %v3691_v0  ;;  %156 = vadd.xlane.f32.xlu1 %v3696_v1  ;;  %v3714_v4 = vld [vmem:[%s7726_s0 + $0x18] sm:$0xff]  ;;  %v3719_v5 = vld [vmem:[%s7726_s0 + $0x8] sm:$0xff] }
   0x3   :  { %7923 = vst [vmem:[#allocation6_spill] sm:$0xff] %v3696_v1  ;;  %152 = vadd.xlane.f32.xlu0 %v3701_v2 }
   0x4   :  { %7924 = vst [vmem:[#allocation7_spill] sm:$0xff] %v3701_v2 }
   0x5   :  { %7925 = vst [vmem:[#allocation8_spill] sm:$0xff] %v3709_v3 }
   0x6   :  { %7926 = vst [vmem:[#allocation9_spill] sm:$0xff] %v3714_v4 }
   0x7   :  { %7927 = vst [vmem:[#allocation10_spill] sm:$0xff] %v3719_v5 }
   0x8   :  { %17 = vsyncpa [#allocation3], 0  ;;  %v3727_v6 = vld [vmem:[%s7726_s0 + $0x40] sm:$0xff]  ;;  %v3732_v7 = vld [vmem:[%s7726_s0 + $0x38] sm:$0xff]  ;;  %s3625_s29 = smov [#allocation2]   ;;  %s3179_s14 = sshll.u32 %s7736_s10, 4  ;;  %s3180_s14 = int_to_ptr.hbm [resolvable:$true] %s3179_s14 }
   0x9   :  { %7928 = vst [vmem:[#allocation11_spill] sm:$0xff] %v3727_v6  ;;  %v3737_v8 = vld [vmem:[%s7726_s0 + $0x30] sm:$0xff]  ;;  %v3745_v9 = vld [vmem:[%s7726_s0 + $0x58] sm:$0xff]  ;;  %v3755_v11 = vld [vmem:[%s7726_s0 + $0x48] sm:$0xff]  ;;  %s3177_s30 = sshll.u32 %s3625_s29, 4  ;;  %s3626_s17 = smov 128   ;;  %s3178_s30 = int_to_ptr.vmem [resolvable:$true] %s3177_s30 }
   0xa   :  { %162 = vadd.xlane.f32.xlu2 %v3709_v3  ;;  %158 = vadd.xlane.f32.xlu1 %v3714_v4  ;;  %7929 = vst [vmem:[#allocation12_spill] sm:$0xff] %v3732_v7  ;;  %v3750_v10 = vld [vmem:[%s7726_s0 + $0x50] sm:$0xff]  ;;  %v3768_v13 = vld [vmem:[%s7726_s0 + $0x68] sm:$0xff]  ;;  %v3773_v14 = vld [vmem:[%s7726_s0 + $0x60] sm:$0xff]  ;;  %s3627_s18 = smov 8  }
   0xb   :  { %154 = vadd.xlane.f32.xlu0 %v3719_v5  ;;  %7930 = vst [vmem:[#allocation13_spill] sm:$0xff] %v3737_v8  ;;  %v3763_v12 = vld [vmem:[%s7726_s0 + $0x70] sm:$0xff]  ;;  %v3781_v15 = vld [vmem:[%s7726_s0 + $0x88] sm:$0xff]  ;;  %v3786_v16 = vld [vmem:[%s7726_s0 + $0x80] sm:$0xff] }
   0xc   :  { %7931 = vst [vmem:[#allocation14_spill] sm:$0xff] %v3755_v11  ;;  %v3791_v17 = vld [vmem:[%s7726_s0 + $0x78] sm:$0xff]  ;;  %v3799_v18 = vld [vmem:[%s7726_s0 + $0xa0] sm:$0xff]  ;;  %v3809_v20 = vld [vmem:[%s7726_s0 + $0x90] sm:$0xff] }
   0xd   :  { %7932 = vst [vmem:[#allocation15_spill] sm:$0xff] %v3773_v14  ;;  %v3804_v19 = vld [vmem:[%s7726_s0 + $0x98] sm:$0xff]  ;;  %v3822_v22 = vld [vmem:[%s7726_s0 + $0xb0] sm:$0xff]  ;;  %v3827_v23 = vld [vmem:[%s7726_s0 + $0xa8] sm:$0xff] }
   0xe   :  { %v3817_v21 = vld [vmem:[%s7726_s0 + $0xb8] sm:$0xff]  ;;  %v3835_v24 = vld [vmem:[%s7726_s0 + $0xd0] sm:$0xff]  ;;  %v3840_v25 = vld [vmem:[%s7726_s0 + $0xc8] sm:$0xff] }
   0xf   :  { %v3845_v26 = vld [vmem:[%s7726_s0 + $0xc0] sm:$0xff]  ;;  %v3853_v27 = vld [vmem:[%s7726_s0 + $0xe8] sm:$0xff]  ;;  %v3863_v29 = vld [vmem:[%s7726_s0 + $0xd8] sm:$0xff] }
  0x10   :  { %v3858_v28 = vld [vmem:[%s7726_s0 + $0xe0] sm:$0xff]  ;;  %v3876_v31 = vld [vmem:[%s7726_s0 + $0xf8] sm:$0xff]  ;;  %v3881_v32 = vld [vmem:[%s7726_s0 + $0xf0] sm:$0xff] }
  0x11   :  { %v3871_v30 = vld [vmem:[%s7726_s0 + $0x100] sm:$0xff]  ;;  %v3889_v33 = vld [vmem:[%s7726_s0 + $0x118] sm:$0xff]  ;;  %v3894_v34 = vld [vmem:[%s7726_s0 + $0x110] sm:$0xff] }
  0x12   :  { %168 = vadd.xlane.f32.xlu2 %v3727_v6  ;;  %166 = vadd.xlane.f32.xlu1 %v3732_v7  ;;  %v3899_v35 = vld [vmem:[%s7726_s0 + $0x108] sm:$0xff]  ;;  %v3907_v36 = vld [vmem:[%s7727_s1] sm:$0xff]  ;;  %v3925_v39 = vld [vmem:[%s7727_s1 + $0x18] sm:$0xff] }
  0x13   :  { %164 = vadd.xlane.f32.xlu0 %v3737_v8  ;;  %v3912_v37 = vld [vmem:[%s7726_s0 + $0x128] sm:$0xff]  ;;  %v3917_v38 = vld [vmem:[%s7726_s0 + $0x120] sm:$0xff]  ;;  %7933 = vst [vmem:[#allocation16_spill] sm:$0xff] %v3925_v39  ;;  %v3930_v40 = vld [vmem:[%s7727_s1 + $0x10] sm:$0xff] }
  0x14   :  { %7934 = vst [vmem:[#allocation17_spill] sm:$0xff] %v3930_v40  ;;  %v3935_v41 = vld [vmem:[%s7727_s1 + $0x8] sm:$0xff]  ;;  %v3943_v42 = vld [vmem:[%s7727_s1 + $0x30] sm:$0xff]  ;;  %v3953_v44 = vld [vmem:[%s7727_s1 + $0x20] sm:$0xff] }
  0x15   :  { %7935 = vst [vmem:[#allocation18_spill] sm:$0xff] %v3943_v42  ;;  %v3948_v43 = vld [vmem:[%s7727_s1 + $0x28] sm:$0xff]  ;;  %v3972_v49 = vld [vmem:[%s7727_s1 + $0x40] sm:$0xff]  ;;  %v3977_v50 = vld [vmem:[%s7727_s1 + $0x38] sm:$0xff] }
  0x16   :  { %7936 = vst [vmem:[#allocation19_spill] sm:$0xff] %v3948_v43  ;;  %v3967_v48 = vld [vmem:[%s7727_s1 + $0x48] sm:$0xff]  ;;  %v3991_v54 = vld [vmem:[%s7727_s1 + $0x60] sm:$0xff]  ;;  %v3996_v55 = vld [vmem:[%s7727_s1 + $0x58] sm:$0xff] }
  0x17   :  { %7937 = vst [vmem:[#allocation20_spill] sm:$0xff] %v3953_v44  ;;  %v4001_v56 = vld [vmem:[%s7727_s1 + $0x50] sm:$0xff]  ;;  %v4015_v60 = vld [vmem:[%s7727_s1 + $0x78] sm:$0xff]  ;;  %v4025_v62 = vld [vmem:[%s7727_s1 + $0x68] sm:$0xff] }
  0x18   :  { %7941 = vst [vmem:[#allocation24_spill] sm:$0xff] %v3967_v48  ;;  %v4020_v61 = vld [vmem:[%s7727_s1 + $0x70] sm:$0xff] }
  0x19   :  { %7942 = vst [vmem:[#allocation25_spill] sm:$0xff] %v3972_v49 }
  0x1a   :  { %174 = vadd.xlane.f32.xlu2 %v3745_v9  ;;  %172 = vadd.xlane.f32.xlu1 %v3750_v10  ;;  %7943 = vst [vmem:[#allocation26_spill] sm:$0xff] %v3977_v50 }
  0x1b   :  { %170 = vadd.xlane.f32.xlu0 %v3755_v11  ;;  %7947 = vst [vmem:[#allocation30_spill] sm:$0xff] %v3991_v54 }
  0x1c   :  { %7948 = vst [vmem:[#allocation31_spill] sm:$0xff] %v3996_v55 }
  0x1d   :  { %7949 = vst [vmem:[#allocation32_spill] sm:$0xff] %v4001_v56 }
  0x1e   :  { %7953 = vst [vmem:[#allocation36_spill] sm:$0xff] %v4015_v60 }
  0x1f   :  { %7954 = vst [vmem:[#allocation37_spill] sm:$0xff] %v4020_v61 }
  0x20   :  { %7955 = vst [vmem:[#allocation38_spill] sm:$0xff] %v4025_v62 }
  0x22   :  { %180 = vadd.xlane.f32.xlu2 %v3763_v12  ;;  %178 = vadd.xlane.f32.xlu1 %v3768_v13 }
  0x23   :  { %176 = vadd.xlane.f32.xlu0 %v3773_v14 }
  0x2a   :  { %186 = vadd.xlane.f32.xlu2 %v3781_v15  ;;  %184 = vadd.xlane.f32.xlu1 %v3786_v16 }
  0x2b   :  { %182 = vadd.xlane.f32.xlu0 %v3791_v17 }
  0x32   :  { %192 = vadd.xlane.f32.xlu2 %v3799_v18  ;;  %190 = vadd.xlane.f32.xlu1 %v3804_v19 }
  0x33   :  { %188 = vadd.xlane.f32.xlu0 %v3809_v20 }
  0x3a   :  { %198 = vadd.xlane.f32.xlu2 %v3817_v21  ;;  %196 = vadd.xlane.f32.xlu1 %v3822_v22 }
  0x3b   :  { %194 = vadd.xlane.f32.xlu0 %v3827_v23 }
  0x42   :  { %204 = vadd.xlane.f32.xlu2 %v3835_v24  ;;  %202 = vadd.xlane.f32.xlu1 %v3840_v25 }
  0x43   :  { %200 = vadd.xlane.f32.xlu0 %v3845_v26 }
  0x4a   :  { %210 = vadd.xlane.f32.xlu2 %v3853_v27  ;;  %208 = vadd.xlane.f32.xlu1 %v3858_v28 }
  0x4b   :  { %206 = vadd.xlane.f32.xlu0 %v3863_v29 }
  0x52   :  { %216 = vadd.xlane.f32.xlu2 %v3871_v30  ;;  %214 = vadd.xlane.f32.xlu1 %v3876_v31 }
  0x53   :  { %212 = vadd.xlane.f32.xlu0 %v3881_v32 }
  0x5a   :  { %222 = vadd.xlane.f32.xlu2 %v3889_v33  ;;  %220 = vadd.xlane.f32.xlu1 %v3894_v34 }
  0x5b   :  { %218 = vadd.xlane.f32.xlu0 %v3899_v35 }
  0x62   :  { %228 = vadd.xlane.f32.xlu2 %v3907_v36  ;;  %226 = vadd.xlane.f32.xlu1 %v3912_v37 }
  0x63   :  { %224 = vadd.xlane.f32.xlu0 %v3917_v38 }
  0x6a   :  { %234 = vadd.xlane.f32.xlu2 %v3925_v39  ;;  %232 = vadd.xlane.f32.xlu1 %v3930_v40 }
  0x6b   :  { %230 = vadd.xlane.f32.xlu0 %v3935_v41 }
  0x72   :  { %240 = vadd.xlane.f32.xlu2 %v3943_v42  ;;  %238 = vadd.xlane.f32.xlu1 %v3948_v43 }
  0x73   :  { %236 = vadd.xlane.f32.xlu0 %v3953_v44 }
  0x75   :  { %v3958_v45 = vpop.xlane.xlu2 %160  ;;  %v3960_v46 = vpop.xlane.xlu1 %156 }
  0x76   :  { %7938 = vst [vmem:[#allocation21_spill] sm:$0xff] %v3958_v45  ;;  %v3962_v47 = vpop.xlane.xlu0 %152  ;;  %v4039_v45 = vld [vmem:[%s7727_s1 + $0x90] sm:$0xff] }
  0x77   :  { %7939 = vst [vmem:[#allocation22_spill] sm:$0xff] %v3960_v46  ;;  %v4068_v46 = vld [vmem:[%s7727_s1 + $0xa0] sm:$0xff] }
  0x78   :  { %7940 = vst [vmem:[#allocation23_spill] sm:$0xff] %v3962_v47  ;;  %v4087_v47 = vld [vmem:[%s7727_s1 + $0xc0] sm:$0xff] }
  0x79   :  { %7959 = vst [vmem:[#allocation42_spill] sm:$0xff] %v4039_v45 }
  0x7a   :  { %246 = vadd.xlane.f32.xlu2 %v3967_v48  ;;  %244 = vadd.xlane.f32.xlu1 %v3972_v49  ;;  %7966 = vst [vmem:[#allocation49_spill] sm:$0xff] %v4068_v46 }
  0x7b   :  { %242 = vadd.xlane.f32.xlu0 %v3977_v50  ;;  %7971 = vst [vmem:[#allocation54_spill] sm:$0xff] %v4087_v47 }
  0x7d   :  { %v3982_v51 = vpop.xlane.xlu2 %162  ;;  %v3984_v52 = vpop.xlane.xlu1 %158 }
  0x7e   :  { %7944 = vst [vmem:[#allocation27_spill] sm:$0xff] %v3982_v51  ;;  %v3986_v53 = vpop.xlane.xlu0 %154  ;;  %v4044_v51 = vld [vmem:[%s7727_s1 + $0x88] sm:$0xff] }
  0x7f   :  { %7945 = vst [vmem:[#allocation28_spill] sm:$0xff] %v3984_v52  ;;  %v4073_v52 = vld [vmem:[%s7727_s1 + $0x98] sm:$0xff] }
  0x80   :  { %7946 = vst [vmem:[#allocation29_spill] sm:$0xff] %v3986_v53  ;;  %v4063_v53 = vld [vmem:[%s7727_s1 + $0xa8] sm:$0xff] }
  0x81   :  { %7960 = vst [vmem:[#allocation43_spill] sm:$0xff] %v4044_v51 }
  0x82   :  { %252 = vadd.xlane.f32.xlu2 %v3991_v54  ;;  %250 = vadd.xlane.f32.xlu1 %v3996_v55  ;;  %7965 = vst [vmem:[#allocation48_spill] sm:$0xff] %v4063_v53  ;;  %v4135_v54 = vld [vmem:[%s7727_s1 + $0xf0] sm:$0xff]  ;;  %v4164_v55 = vld [vmem:[%s7727_s1 + $0x100] sm:$0xff] }
  0x83   :  { %248 = vadd.xlane.f32.xlu0 %v4001_v56  ;;  %7967 = vst [vmem:[#allocation50_spill] sm:$0xff] %v4073_v52  ;;  %v4159_v56 = vld [vmem:[%s7727_s1 + $0x108] sm:$0xff] }
  0x84   :  { %7980 = vst [vmem:[#allocation63_spill] sm:$0xff] %v4135_v54 }
  0x85   :  { %v4006_v57 = vpop.xlane.xlu2 %168  ;;  %v4008_v58 = vpop.xlane.xlu1 %166  ;;  %7986 = vst [vmem:[#allocation69_spill] sm:$0xff] %v4159_v56 }
  0x86   :  { %7950 = vst [vmem:[#allocation33_spill] sm:$0xff] %v4006_v57  ;;  %v4010_v59 = vpop.xlane.xlu0 %164 }
  0x87   :  { %7951 = vst [vmem:[#allocation34_spill] sm:$0xff] %v4008_v58 }
  0x88   :  { %7952 = vst [vmem:[#allocation35_spill] sm:$0xff] %v4010_v59  ;;  %v4049_v59 = vld [vmem:[%s7727_s1 + $0x80] sm:$0xff] }
  0x89   :  { %7961 = vst [vmem:[#allocation44_spill] sm:$0xff] %v4049_v59 }
  0x8a   :  { %258 = vadd.xlane.f32.xlu2 %v4015_v60  ;;  %256 = vadd.xlane.f32.xlu1 %v4020_v61  ;;  %v4116_v61 = vld [vmem:[%s7727_s1 + $0xd0] sm:$0xff]  ;;  %v4121_v60 = vld [vmem:[%s7727_s1 + $0xc8] sm:$0xff]  ;;  %7987 = vst [vmem:[#allocation70_spill] sm:$0xff] %v4164_v55 }
  0x8b   :  { %254 = vadd.xlane.f32.xlu0 %v4025_v62  ;;  %v4140_v62 = vld [vmem:[%s7727_s1 + $0xe8] sm:$0xff] }
  0x8c   :  { %7981 = vst [vmem:[#allocation64_spill] sm:$0xff] %v4140_v62 }
  0x8d   :  { %v4030_v63 = vpop.xlane.xlu2 %174  ;;  %v4032_v58 = vpop.xlane.xlu1 %172 }
  0x8e   :  { %7956 = vst [vmem:[#allocation39_spill] sm:$0xff] %v4030_v63  ;;  %v4034_v57 = vpop.xlane.xlu0 %170 }
  0x8f   :  { %7957 = vst [vmem:[#allocation40_spill] sm:$0xff] %v4032_v58 }
  0x90   :  { %7958 = vst [vmem:[#allocation41_spill] sm:$0xff] %v4034_v57 }
  0x92   :  { %264 = vadd.xlane.f32.xlu2 %v4039_v45  ;;  %262 = vadd.xlane.f32.xlu1 %v4044_v51  ;;  %v4092_v45 = vld [vmem:[%s7727_s1 + $0xb8] sm:$0xff] }
  0x93   :  { %260 = vadd.xlane.f32.xlu0 %v4049_v59  ;;  %7972 = vst [vmem:[#allocation55_spill] sm:$0xff] %v4092_v45  ;;  %v4097_v59 = vld [vmem:[%s7727_s1 + $0xb0] sm:$0xff]  ;;  %v4111_v51 = vld [vmem:[%s7727_s1 + $0xd8] sm:$0xff] }
  0x94   :  { %7976 = vst [vmem:[#allocation59_spill] sm:$0xff] %v4111_v51 }
  0x95   :  { %v4054_v58 = vpop.xlane.xlu2 %180  ;;  %v4056_v63 = vpop.xlane.xlu1 %178 }
  0x96   :  { %7962 = vst [vmem:[#allocation45_spill] sm:$0xff] %v4054_v58  ;;  %v4058_v57 = vpop.xlane.xlu0 %176 }
  0x97   :  { %7963 = vst [vmem:[#allocation46_spill] sm:$0xff] %v4056_v63 }
  0x98   :  { %7964 = vst [vmem:[#allocation47_spill] sm:$0xff] %v4058_v57 }
  0x9a   :  { %270 = vadd.xlane.f32.xlu2 %v4063_v53  ;;  %268 = vadd.xlane.f32.xlu1 %v4068_v46 }
  0x9b   :  { %266 = vadd.xlane.f32.xlu0 %v4073_v52 }
  0x9d   :  { %v4078_v63 = vpop.xlane.xlu2 %186  ;;  %v4080_v58 = vpop.xlane.xlu1 %184 }
  0x9e   :  { %7968 = vst [vmem:[#allocation51_spill] sm:$0xff] %v4078_v63  ;;  %v4082_v57 = vpop.xlane.xlu0 %182 }
  0x9f   :  { %7969 = vst [vmem:[#allocation52_spill] sm:$0xff] %v4080_v58 }
  0xa0   :  { %7970 = vst [vmem:[#allocation53_spill] sm:$0xff] %v4082_v57 }
  0xa2   :  { %276 = vadd.xlane.f32.xlu2 %v4087_v47  ;;  %274 = vadd.xlane.f32.xlu1 %v4092_v45 }
  0xa3   :  { %272 = vadd.xlane.f32.xlu0 %v4097_v59 }
  0xa5   :  { %v4102_v58 = vpop.xlane.xlu2 %192  ;;  %v4104_v63 = vpop.xlane.xlu1 %190 }
  0xa6   :  { %7973 = vst [vmem:[#allocation56_spill] sm:$0xff] %v4102_v58  ;;  %v4106_v57 = vpop.xlane.xlu0 %188 }
  0xa7   :  { %7974 = vst [vmem:[#allocation57_spill] sm:$0xff] %v4104_v63 }
  0xa8   :  { %7975 = vst [vmem:[#allocation58_spill] sm:$0xff] %v4106_v57 }
  0xaa   :  { %282 = vadd.xlane.f32.xlu2 %v4111_v51  ;;  %280 = vadd.xlane.f32.xlu1 %v4116_v61  ;;  %v4145_v51 = vld [vmem:[%s7727_s1 + $0xe0] sm:$0xff] }
  0xab   :  { %278 = vadd.xlane.f32.xlu0 %v4121_v60  ;;  %7982 = vst [vmem:[#allocation65_spill] sm:$0xff] %v4145_v51 }
  0xad   :  { %v4126_v58 = vpop.xlane.xlu2 %198  ;;  %v4128_v57 = vpop.xlane.xlu1 %196 }
  0xae   :  { %7977 = vst [vmem:[#allocation60_spill] sm:$0xff] %v4126_v58  ;;  %v4130_v63 = vpop.xlane.xlu0 %194 }
  0xaf   :  { %7978 = vst [vmem:[#allocation61_spill] sm:$0xff] %v4128_v57 }
  0xb0   :  { %7979 = vst [vmem:[#allocation62_spill] sm:$0xff] %v4130_v63 }
  0xb2   :  { %288 = vadd.xlane.f32.xlu2 %v4135_v54  ;;  %286 = vadd.xlane.f32.xlu1 %v4140_v62  ;;  %v4169_v54 = vld [vmem:[%s7727_s1 + $0xf8] sm:$0xff]  ;;  %v4183_v62 = vld [vmem:[%s7727_s1 + $0x120] sm:$0xff] }
  0xb3   :  { %284 = vadd.xlane.f32.xlu0 %v4145_v51  ;;  %7988 = vst [vmem:[#allocation71_spill] sm:$0xff] %v4169_v54  ;;  %v4188_v51 = vld [vmem:[%s7727_s1 + $0x118] sm:$0xff] }
  0xb4   :  { %7992 = vst [vmem:[#allocation75_spill] sm:$0xff] %v4183_v62 }
  0xb5   :  { %v4150_v57 = vpop.xlane.xlu2 %204  ;;  %v4152_v58 = vpop.xlane.xlu1 %202 }
  0xb6   :  { %7983 = vst [vmem:[#allocation66_spill] sm:$0xff] %v4150_v57  ;;  %v4154_v63 = vpop.xlane.xlu0 %200 }
  0xb7   :  { %7984 = vst [vmem:[#allocation67_spill] sm:$0xff] %v4152_v58 }
  0xb8   :  { %7985 = vst [vmem:[#allocation68_spill] sm:$0xff] %v4154_v63 }
  0xba   :  { %294 = vadd.xlane.f32.xlu2 %v4159_v56  ;;  %292 = vadd.xlane.f32.xlu1 %v4164_v55  ;;  %v4193_v56 = vld [vmem:[%s7727_s1 + $0x110] sm:$0xff]  ;;  %v304_v55 = vmul.f32 %v3701_v2, %v3701_v2  ;;  %v307_v2 = vmul.f32 %v3714_v4, %v3714_v4 }
  0xbb   :  { %290 = vadd.xlane.f32.xlu0 %v4169_v54  ;;  %7993 = vst [vmem:[#allocation76_spill] sm:$0xff] %v4193_v56  ;;  %v305_v54 = vmul.f32 %v3719_v5, %v3719_v5  ;;  %v308_v5 = vmul.f32 %v3691_v0, %v3691_v0  ;;  %v309_v0 = vmul.f32 %v3709_v3, %v3709_v3 }
  0xbc   :  { %v317_v3 = vmul.f32 %v3768_v13, %v3768_v13  ;;  %v318_v13 = vmul.f32 %v3763_v12, %v3763_v12  ;;  %v322_v12 = vmul.f32 %v3809_v20, %v3809_v20 }
  0xbd   :  { %v4174_v58 = vpop.xlane.xlu2 %210  ;;  %v4176_v57 = vpop.xlane.xlu1 %208 }
  0xbe   :  { %7989 = vst [vmem:[#allocation72_spill] sm:$0xff] %v4174_v58  ;;  %v4178_v63 = vpop.xlane.xlu0 %206 }
  0xbf   :  { %7990 = vst [vmem:[#allocation73_spill] sm:$0xff] %v4176_v57 }
  0xc0   :  { %7991 = vst [vmem:[#allocation74_spill] sm:$0xff] %v4178_v63 }
  0xc2   :  { %300 = vadd.xlane.f32.xlu2 %v4183_v62  ;;  %298 = vadd.xlane.f32.xlu1 %v4188_v51  ;;  %v4211_v62 = vld [vmem:[%s7727_s1 + $0x128] sm:$0xff] }
  0xc3   :  { %296 = vadd.xlane.f32.xlu0 %v4193_v56  ;;  %v306_v56 = vmul.f32 %v3696_v1, %v3696_v1 }
  0xc5   :  { %v4198_v57 = vpop.xlane.xlu2 %216  ;;  %v4200_v58 = vpop.xlane.xlu1 %214 }
  0xc6   :  { %7994 = vst [vmem:[#allocation77_spill] sm:$0xff] %v4198_v57  ;;  %v4202_v63 = vpop.xlane.xlu0 %212 }
  0xc7   :  { %7995 = vst [vmem:[#allocation78_spill] sm:$0xff] %v4200_v58 }
  0xc8   :  { %7996 = vst [vmem:[#allocation79_spill] sm:$0xff] %v4202_v63 }
  0xca   :  { %344 = vadd.xlane.f32.xlu2 %v305_v54  ;;  %342 = vadd.xlane.f32.xlu1 %v304_v55 }
  0xcb   :  { %302 = vadd.xlane.f32.xlu0 %v4211_v62 }
  0xcd   :  { %v4214_v57 = vpop.xlane.xlu2 %222  ;;  %v4216_v58 = vpop.xlane.xlu1 %220 }
  0xce   :  { %7997 = vst [vmem:[#allocation80_spill] sm:$0xff] %v4214_v57  ;;  %v4218_v63 = vpop.xlane.xlu0 %218 }
  0xcf   :  { %7998 = vst [vmem:[#allocation81_spill] sm:$0xff] %v4216_v58  ;;  %v311_v58 = vmul.f32 %v3732_v7, %v3732_v7  ;;  %v313_v7 = vmul.f32 %v3755_v11, %v3755_v11  ;;  %v320_v11 = vmul.f32 %v3786_v16, %v3786_v16  ;;  %v321_v16 = vmul.f32 %v3781_v15, %v3781_v15 }
  0xd0   :  { %7999 = vst [vmem:[#allocation82_spill] sm:$0xff] %v4218_v63  ;;  %v310_v63 = vmul.f32 %v3737_v8, %v3737_v8  ;;  %v325_v15 = vmul.f32 %v3827_v23, %v3827_v23 }
  0xd2   :  { %350 = vadd.xlane.f32.xlu2 %v308_v5  ;;  %348 = vadd.xlane.f32.xlu1 %v307_v2 }
  0xd3   :  { %346 = vadd.xlane.f32.xlu0 %v306_v56 }
  0xd5   :  { %v4226_v54 = vpop.xlane.xlu2 %228  ;;  %v4228_v55 = vpop.xlane.xlu1 %226 }
  0xd6   :  { %8000 = vst [vmem:[#allocation83_spill] sm:$0xff] %v4228_v55  ;;  %v4230_v57 = vpop.xlane.xlu0 %224  ;;  %v314_v55 = vmul.f32 %v3750_v10, %v3750_v10  ;;  %v315_v10 = vmul.f32 %v3745_v9, %v3745_v9  ;;  %v319_v9 = vmul.f32 %v3791_v17, %v3791_v17 }
  0xd7   :  { %8001 = vst [vmem:[#allocation84_spill] sm:$0xff] %v4230_v57  ;;  %v312_v57 = vmul.f32 %v3727_v6, %v3727_v6  ;;  %v316_v6 = vmul.f32 %v3773_v14, %v3773_v14  ;;  %v323_v14 = vmul.f32 %v3804_v19, %v3804_v19  ;;  %v324_v19 = vmul.f32 %v3799_v18, %v3799_v18 }
  0xd8   :  { %v328_v18 = vmul.f32 %v3845_v26, %v3845_v26 }
  0xda   :  { %356 = vadd.xlane.f32.xlu2 %v311_v58  ;;  %354 = vadd.xlane.f32.xlu1 %v310_v63 }
  0xdb   :  { %352 = vadd.xlane.f32.xlu0 %v309_v0 }
  0xdd   :  { %v4238_v2 = vpop.xlane.xlu2 %234  ;;  %v4240_v5 = vpop.xlane.xlu1 %232 }
  0xde   :  { %v4242_v56 = vpop.xlane.xlu0 %230 }
  0xe2   :  { %362 = vadd.xlane.f32.xlu2 %v314_v55  ;;  %360 = vadd.xlane.f32.xlu1 %v313_v7 }
  0xe3   :  { %358 = vadd.xlane.f32.xlu0 %v312_v57 }
  0xe5   :  { %v4250_v58 = vpop.xlane.xlu2 %240  ;;  %v4252_v0 = vpop.xlane.xlu1 %238 }
  0xe6   :  { %v4254_v63 = vpop.xlane.xlu0 %236 }
  0xea   :  { %368 = vadd.xlane.f32.xlu2 %v317_v3  ;;  %366 = vadd.xlane.f32.xlu1 %v316_v6 }
  0xeb   :  { %364 = vadd.xlane.f32.xlu0 %v315_v10 }
  0xed   :  { %v4262_v57 = vpop.xlane.xlu2 %246  ;;  %v4264_v7 = vpop.xlane.xlu1 %244 }
  0xee   :  { %v4266_v55 = vpop.xlane.xlu0 %242 }
  0xf2   :  { %374 = vadd.xlane.f32.xlu2 %v320_v11  ;;  %372 = vadd.xlane.f32.xlu1 %v319_v9  ;;  %v326_v9 = vmul.f32 %v3822_v22, %v3822_v22  ;;  %v327_v22 = vmul.f32 %v3817_v21, %v3817_v21  ;;  %v331_v21 = vmul.f32 %v3863_v29, %v3863_v29 }
  0xf3   :  { %370 = vadd.xlane.f32.xlu0 %v318_v13 }
  0xf5   :  { %v4274_v3 = vpop.xlane.xlu2 %252  ;;  %v4276_v6 = vpop.xlane.xlu1 %250 }
  0xf6   :  { %v4278_v10 = vpop.xlane.xlu0 %248 }
  0xfa   :  { %380 = vadd.xlane.f32.xlu2 %v323_v14  ;;  %378 = vadd.xlane.f32.xlu1 %v322_v12  ;;  %v329_v12 = vmul.f32 %v3840_v25, %v3840_v25  ;;  %v330_v25 = vmul.f32 %v3835_v24, %v3835_v24  ;;  %v334_v24 = vmul.f32 %v3881_v32, %v3881_v32 }
  0xfb   :  { %376 = vadd.xlane.f32.xlu0 %v321_v16 }
  0xfd   :  { %v4286_v11 = vpop.xlane.xlu2 %258  ;;  %v4288_v17 = vpop.xlane.xlu1 %256 }
  0xfe   :  { %v4290_v13 = vpop.xlane.xlu0 %254 }
 0x102   :  { %386 = vadd.xlane.f32.xlu2 %v326_v9  ;;  %384 = vadd.xlane.f32.xlu1 %v325_v15  ;;  %v332_v15 = vmul.f32 %v3858_v28, %v3858_v28  ;;  %v333_v28 = vmul.f32 %v3853_v27, %v3853_v27  ;;  %v337_v27 = vmul.f32 %v3899_v35, %v3899_v35 }
 0x103   :  { %382 = vadd.xlane.f32.xlu0 %v324_v19 }
 0x105   :  { %v4298_v14 = vpop.xlane.xlu2 %264  ;;  %v4300_v20 = vpop.xlane.xlu1 %262 }
 0x106   :  { %v4302_v16 = vpop.xlane.xlu0 %260 }
 0x10a   :  { %392 = vadd.xlane.f32.xlu2 %v329_v12  ;;  %390 = vadd.xlane.f32.xlu1 %v328_v18  ;;  %v335_v18 = vmul.f32 %v3876_v31, %v3876_v31  ;;  %v336_v31 = vmul.f32 %v3871_v30, %v3871_v30  ;;  %v437_v30 = vmul.f32 %v4073_v52, %v4073_v52 }
 0x10b   :  { %388 = vadd.xlane.f32.xlu0 %v327_v22 }
 0x10d   :  { %v4310_v23 = vpop.xlane.xlu2 %270  ;;  %v4312_v9 = vpop.xlane.xlu1 %268 }
 0x10e   :  { %v4314_v19 = vpop.xlane.xlu0 %266 }
 0x112   :  { %398 = vadd.xlane.f32.xlu2 %v332_v15  ;;  %396 = vadd.xlane.f32.xlu1 %v331_v21  ;;  %v338_v21 = vmul.f32 %v3894_v34, %v3894_v34  ;;  %v339_v34 = vmul.f32 %v3889_v33, %v3889_v33  ;;  %v438_v33 = vmul.f32 %v4068_v46, %v4068_v46  ;;  %v8059_v46 = vld [vmem:[#allocation76_spill] sm:$0xff] }
 0x113   :  { %394 = vadd.xlane.f32.xlu0 %v330_v25 }
 0x115   :  { %v4322_v26 = vpop.xlane.xlu2 %276  ;;  %v4324_v12 = vpop.xlane.xlu1 %274 }
 0x116   :  { %v4326_v22 = vpop.xlane.xlu0 %272 }
 0x11a   :  { %404 = vadd.xlane.f32.xlu2 %v335_v18  ;;  %402 = vadd.xlane.f32.xlu1 %v334_v24  ;;  %v340_v24 = vmul.f32 %v3917_v38, %v3917_v38  ;;  %v418_v38 = vmul.f32 %v3907_v36, %v3907_v36 }
 0x11b   :  { %400 = vadd.xlane.f32.xlu0 %v333_v28 }
 0x11d   :  { %v4334_v29 = vpop.xlane.xlu2 %282  ;;  %v4336_v15 = vpop.xlane.xlu1 %280 }
 0x11e   :  { %8002 = vst [vmem:[#allocation85_spill] sm:$0xff] %v4334_v29  ;;  %v4338_v25 = vpop.xlane.xlu0 %278  ;;  %v8053_v29 = vld [vmem:[#allocation42_spill] sm:$0xff] }
 0x11f   :  { %8003 = vst [vmem:[#allocation86_spill] sm:$0xff] %v4336_v15  ;;  %v8047_v15 = vld [vmem:[#allocation44_spill] sm:$0xff] }
 0x120   :  { %8004 = vst [vmem:[#allocation87_spill] sm:$0xff] %v4338_v25  ;;  %v434_v52 = vmul.f32 %v8047_v15, %v8047_v15 }
 0x122   :  { %410 = vadd.xlane.f32.xlu2 %v338_v21  ;;  %408 = vadd.xlane.f32.xlu1 %v337_v27  ;;  %v341_v27 = vmul.f32 %v3912_v37, %v3912_v37  ;;  %v419_v37 = vmul.f32 %v3935_v41, %v3935_v41 }
 0x123   :  { %406 = vadd.xlane.f32.xlu0 %v336_v31 }
 0x125   :  { %v4346_v32 = vpop.xlane.xlu2 %288  ;;  %v4348_v18 = vpop.xlane.xlu1 %286 }
 0x126   :  { %8005 = vst [vmem:[#allocation88_spill] sm:$0xff] %v4346_v32  ;;  %v4350_v28 = vpop.xlane.xlu0 %284  ;;  %v8036_v32 = vld [vmem:[#allocation65_spill] sm:$0xff] }
 0x127   :  { %8006 = vst [vmem:[#allocation89_spill] sm:$0xff] %v4348_v18 }
 0x128   :  { %8007 = vst [vmem:[#allocation90_spill] sm:$0xff] %v4350_v28 }
 0x12a   :  { %414 = vadd.xlane.f32.xlu2 %v340_v24  ;;  %494 = vadd.xlane.f32.xlu1 %v437_v30 }
 0x12b   :  { %412 = vadd.xlane.f32.xlu0 %v339_v34 }
 0x12d   :  { %v4358_v35 = vpop.xlane.xlu2 %294  ;;  %v4360_v21 = vpop.xlane.xlu1 %292 }
 0x12e   :  { %8008 = vst [vmem:[#allocation91_spill] sm:$0xff] %v4358_v35  ;;  %v4362_v31 = vpop.xlane.xlu0 %290  ;;  %v441_v35 = vmul.f32 %v4092_v45, %v4092_v45  ;;  %v8041_v45 = vld [vmem:[#allocation64_spill] sm:$0xff] }
 0x12f   :  { %8009 = vst [vmem:[#allocation92_spill] sm:$0xff] %v4360_v21  ;;  %v439_v21 = vmul.f32 %v4063_v53, %v4063_v53  ;;  %v452_v53 = vmul.f32 %v8059_v46, %v8059_v46  ;;  %v8063_v46 = vld [vmem:[#allocation29_spill] sm:$0xff] }
 0x130   :  { %8010 = vst [vmem:[#allocation93_spill] sm:$0xff] %v4362_v31  ;;  %v420_v31 = vmul.f32 %v3930_v40, %v3930_v40 }
 0x132   :  { %416 = vadd.xlane.f32.xlu2 %v341_v27  ;;  %496 = vadd.xlane.f32.xlu1 %v438_v33 }
 0x133   :  { %456 = vadd.xlane.f32.xlu0 %v418_v38 }
 0x135   :  { %v4370_v24 = vpop.xlane.xlu2 %300  ;;  %v4372_v34 = vpop.xlane.xlu1 %298 }
 0x136   :  { %8011 = vst [vmem:[#allocation94_spill] sm:$0xff] %v4370_v24  ;;  %v4374_v30 = vpop.xlane.xlu0 %296  ;;  %v421_v24 = vmul.f32 %v3925_v39, %v3925_v39 }
 0x137   :  { %8012 = vst [vmem:[#allocation95_spill] sm:$0xff] %v4372_v34  ;;  %v440_v34 = vmul.f32 %v4097_v59, %v4097_v59  ;;  %v423_v59 = vmul.f32 %v3948_v43, %v3948_v43  ;;  %v8159_v43 = vld [vmem:[#allocation72_spill] sm:$0xff] }
 0x138   :  { %8013 = vst [vmem:[#allocation96_spill] sm:$0xff] %v4374_v30  ;;  %v422_v30 = vmul.f32 %v3953_v44, %v3953_v44  ;;  %v5016_v44 = vld [vmem:[%s7727_s1 + $0xd8] sm:$0xff] }
 0x13a   :  { %460 = vadd.xlane.f32.xlu2 %v420_v31  ;;  %498 = vadd.xlane.f32.xlu1 %v439_v21 }
 0x13b   :  { %458 = vadd.xlane.f32.xlu0 %v419_v37 }
 0x13d   :  { %v4382_v27 = vpop.xlane.xlu2 %344  ;;  %v4384_v38 = vpop.xlane.xlu1 %342 }
 0x13e   :  { %8014 = vst [vmem:[#allocation97_spill] sm:$0xff] %v4382_v27  ;;  %v4386_v33 = vpop.xlane.xlu0 %302  ;;  %v446_v27 = vmul.f32 %v8036_v32, %v8036_v32 }
 0x13f   :  { %8015 = vst [vmem:[#allocation98_spill] sm:$0xff] %v4386_v33  ;;  %v442_v33 = vmul.f32 %v4087_v47, %v4087_v47  ;;  %v447_v47 = vmul.f32 %v8041_v45, %v8041_v45 }
 0x142   :  { %464 = vadd.xlane.f32.xlu2 %v422_v30  ;;  %462 = vadd.xlane.f32.xlu1 %v421_v24 }
 0x143   :  { %500 = vadd.xlane.f32.xlu0 %v440_v34 }
 0x145   :  { %v4394_v31 = vpop.xlane.xlu2 %350  ;;  %v4396_v21 = vpop.xlane.xlu1 %348 }
 0x146   :  { %8016 = vst [vmem:[#allocation99_spill] sm:$0xff] %v4394_v31  ;;  %v4398_v37 = vpop.xlane.xlu0 %346  ;;  %v424_v31 = vmul.f32 %v3943_v42, %v3943_v42  ;;  %v8088_v42 = vld [vmem:[#allocation39_spill] sm:$0xff] }
 0x147   :  { %8017 = vst [vmem:[#allocation100_spill] sm:$0xff] %v4396_v21  ;;  %v443_v21 = vmul.f32 %v4121_v60, %v4121_v60  ;;  %v426_v60 = vmul.f32 %v3972_v49, %v3972_v49  ;;  %v1632_v49 = vld [vmem:[%s7734_s8 + $0x20] sm:$0xff] }
 0x148   :  { %8018 = vst [vmem:[#allocation101_spill] sm:$0xff] %v4398_v37  ;;  %v425_v37 = vmul.f32 %v3977_v50, %v3977_v50 }
 0x14a   :  { %504 = vadd.xlane.f32.xlu2 %v442_v33  ;;  %466 = vadd.xlane.f32.xlu1 %v423_v59 }
 0x14b   :  { %502 = vadd.xlane.f32.xlu0 %v441_v35 }
 0x14d   :  { %v4406_v34 = vpop.xlane.xlu2 %356  ;;  %v4408_v24 = vpop.xlane.xlu1 %354 }
 0x14e   :  { %8019 = vst [vmem:[#allocation102_spill] sm:$0xff] %v4406_v34  ;;  %v4410_v30 = vpop.xlane.xlu0 %352  ;;  %v444_v34 = vmul.f32 %v4116_v61, %v4116_v61 }
 0x14f   :  { %8020 = vst [vmem:[#allocation103_spill] sm:$0xff] %v4408_v24  ;;  %v427_v24 = vmul.f32 %v3967_v48, %v3967_v48  ;;  %v1633_v48 = vld [vmem:[%s7734_s8 + $0x28] sm:$0xff] }
 0x150   :  { %8021 = vst [vmem:[#allocation104_spill] sm:$0xff] %v4410_v30  ;;  %v8030_v30 = vld [vmem:[#allocation59_spill] sm:$0xff] }
 0x151   :  { %v445_v28 = vmul.f32 %v8030_v30, %v8030_v30 }
 0x152   :  { %506 = vadd.xlane.f32.xlu2 %v443_v21  ;;  %470 = vadd.xlane.f32.xlu1 %v425_v37 }
 0x153   :  { %468 = vadd.xlane.f32.xlu0 %v424_v31 }
 0x155   :  { %v4418_v35 = vpop.xlane.xlu2 %362  ;;  %v4422_v59 = vpop.xlane.xlu1 %360 }
 0x156   :  { %8022 = vst [vmem:[#allocation105_spill] sm:$0xff] %v4418_v35  ;;  %v4420_v33 = vpop.xlane.xlu0 %358  ;;  %v8028_v35 = vld [vmem:[#allocation31_spill] sm:$0xff] }
 0x157   :  { %8023 = vst [vmem:[#allocation106_spill] sm:$0xff] %v4420_v33  ;;  %v8029_v33 = vld [vmem:[#allocation32_spill] sm:$0xff] }
 0x158   :  { %8024 = vst [vmem:[#allocation107_spill] sm:$0xff] %v4422_v59  ;;  %v429_v59 = vmul.f32 %v8028_v35, %v8028_v35  ;;  %v428_v61 = vmul.f32 %v8029_v33, %v8029_v33 }
 0x15a   :  { %508 = vadd.xlane.f32.xlu2 %v444_v34  ;;  %474 = vadd.xlane.f32.xlu1 %v427_v24 }
 0x15b   :  { %472 = vadd.xlane.f32.xlu0 %v426_v60 }
 0x15d   :  { %v4430_v31 = vpop.xlane.xlu2 %368  ;;  %v4434_v37 = vpop.xlane.xlu1 %366 }
 0x15e   :  { %8025 = vst [vmem:[#allocation108_spill] sm:$0xff] %v4430_v31  ;;  %v4432_v21 = vpop.xlane.xlu0 %364  ;;  %v8034_v31 = vld [vmem:[#allocation38_spill] sm:$0xff] }
 0x15f   :  { %8026 = vst [vmem:[#allocation109_spill] sm:$0xff] %v4432_v21  ;;  %v8035_v21 = vld [vmem:[#allocation30_spill] sm:$0xff] }
 0x160   :  { %8027 = vst [vmem:[#allocation110_spill] sm:$0xff] %v4434_v37  ;;  %v431_v37 = vmul.f32 %v8034_v31, %v8034_v31  ;;  %v430_v18 = vmul.f32 %v8035_v21, %v8035_v21 }
 0x162   :  { %478 = vadd.xlane.f32.xlu2 %v429_v59  ;;  %510 = vadd.xlane.f32.xlu1 %v445_v28 }
 0x163   :  { %476 = vadd.xlane.f32.xlu0 %v428_v61  ;;  %v8039_v61 = vld [vmem:[#allocation36_spill] sm:$0xff] }
 0x165   :  { %v4442_v34 = vpop.xlane.xlu2 %374  ;;  %v4446_v60 = vpop.xlane.xlu1 %372 }
 0x166   :  { %8031 = vst [vmem:[#allocation59_spill] sm:$0xff] %v4442_v34  ;;  %v4444_v24 = vpop.xlane.xlu0 %370  ;;  %v433_v34 = vmul.f32 %v8039_v61, %v8039_v61 }
 0x167   :  { %8032 = vst [vmem:[#allocation111_spill] sm:$0xff] %v4444_v24  ;;  %v8040_v24 = vld [vmem:[#allocation37_spill] sm:$0xff] }
 0x168   :  { %8033 = vst [vmem:[#allocation112_spill] sm:$0xff] %v4446_v60  ;;  %v432_v60 = vmul.f32 %v8040_v24, %v8040_v24  ;;  %v8138_v24 = vld [vmem:[#allocation85_spill] sm:$0xff] }
 0x16a   :  { %482 = vadd.xlane.f32.xlu2 %v431_v37  ;;  %512 = vadd.xlane.f32.xlu1 %v446_v27  ;;  %v8045_v37 = vld [vmem:[#allocation43_spill] sm:$0xff] }
 0x16b   :  { %480 = vadd.xlane.f32.xlu0 %v430_v18 }
 0x16d   :  { %v4454_v30 = vpop.xlane.xlu2 %380  ;;  %v4458_v59 = vpop.xlane.xlu1 %378 }
 0x16e   :  { %v4456_v28 = vpop.xlane.xlu0 %376  ;;  %8038 = vst [vmem:[#allocation113_spill] sm:$0xff] %v4458_v59  ;;  %v435_v59 = vmul.f32 %v8045_v37, %v8045_v37 }
 0x16f   :  { %8037 = vst [vmem:[#allocation65_spill] sm:$0xff] %v4456_v28  ;;  %v8046_v28 = vld [vmem:[#allocation63_spill] sm:$0xff] }
 0x170   :  { %v448_v25 = vmul.f32 %v8046_v28, %v8046_v28  ;;  %v436_v28 = vmul.f32 %v8053_v29, %v8053_v29 }
 0x172   :  { %486 = vadd.xlane.f32.xlu2 %v433_v34  ;;  %514 = vadd.xlane.f32.xlu1 %v447_v47 }
 0x173   :  { %484 = vadd.xlane.f32.xlu0 %v432_v60  ;;  %v8051_v60 = vld [vmem:[#allocation70_spill] sm:$0xff] }
 0x175   :  { %v4466_v32 = vpop.xlane.xlu2 %386  ;;  %v4470_v27 = vpop.xlane.xlu1 %384 }
 0x176   :  { %8042 = vst [vmem:[#allocation64_spill] sm:$0xff] %v4466_v32  ;;  %v4468_v18 = vpop.xlane.xlu0 %382  ;;  %v450_v32 = vmul.f32 %v8051_v60, %v8051_v60  ;;  %v8055_v60 = vld [vmem:[#allocation23_spill] sm:$0xff] }
 0x177   :  { %8043 = vst [vmem:[#allocation114_spill] sm:$0xff] %v4468_v18 }
 0x178   :  { %8044 = vst [vmem:[#allocation115_spill] sm:$0xff] %v4470_v27  ;;  %v8052_v27 = vld [vmem:[#allocation71_spill] sm:$0xff] }
 0x179   :  { %v449_v37 = vmul.f32 %v8052_v27, %v8052_v27  ;;  %v1642_v27 = vld [vmem:[%s7734_s8 + $0x70] sm:$0xff] }
 0x17a   :  { %490 = vadd.xlane.f32.xlu2 %v435_v59  ;;  %488 = vadd.xlane.f32.xlu1 %v434_v52  ;;  %v1643_v52 = vld [vmem:[%s7734_s8 + $0x78] sm:$0xff] }
 0x17b   :  { %516 = vadd.xlane.f32.xlu0 %v448_v25  ;;  %v1627_v25 = vld [vmem:[%s7733_s7 + $0x78] sm:$0xff]  ;;  %3233 = vmatpush.msra.mxu2 %v1643_v52 }
 0x17c   :  { %3249 = vmatpush.msra.mxu3 %v1627_v25  ;;  %1644 = vmatpush.msra.mxu0 %v1643_v52  ;;  %v8060_v52 = vld [vmem:[#allocation28_spill] sm:$0xff] }
 0x17d   :  { %v4478_v45 = vpop.xlane.xlu2 %392  ;;  %v4482_v34 = vpop.xlane.xlu1 %390  ;;  %1775 = vmatpush.msra.mxu1 %v1627_v25  ;;  %3234 = vmatpush.msra.mxu2 %v1642_v27  ;;  %v1641_v25 = vld [vmem:[%s7734_s8 + $0x68] sm:$0xff] }
 0x17e   :  { %8048 = vst [vmem:[#allocation43_spill] sm:$0xff] %v4478_v45  ;;  %v4480_v47 = vpop.xlane.xlu0 %388  ;;  %1645 = vmatpush.msra.mxu0 %v1642_v27  ;;  %v533_v27 = vadd.f32 %v4242_v56, %v8063_v46 }
 0x17f   :  { %8049 = vst [vmem:[#allocation63_spill] sm:$0xff] %v4480_v47  ;;  %v8058_v47 = vld [vmem:[#allocation69_spill] sm:$0xff]  ;;  %3235 = vmatpush.msra.mxu2 %v1641_v25 }
 0x180   :  { %8050 = vst [vmem:[#allocation116_spill] sm:$0xff] %v4482_v34  ;;  %v451_v34 = vmul.f32 %v8058_v47, %v8058_v47  ;;  %1646 = vmatpush.msra.mxu0 %v1641_v25  ;;  %v1623_v25 = vld [vmem:[%s7733_s7 + $0x58] sm:$0xff] }
 0x182   :  { %520 = vadd.xlane.f32.xlu2 %v450_v32  ;;  %492 = vadd.xlane.f32.xlu1 %v436_v28  ;;  %v1626_v32 = vld [vmem:[%s7733_s7 + $0x70] sm:$0xff] }
 0x183   :  { %518 = vadd.xlane.f32.xlu0 %v449_v37  ;;  %v532_v37 = vadd.f32 %v4226_v54, %v8055_v60  ;;  %3250 = vmatpush.msra.mxu3 %v1626_v32  ;;  %v535_v54 = vadd.f32 %v4238_v2, %v8060_v52  ;;  %v8061_v60 = vld [vmem:[#allocation22_spill] sm:$0xff]  ;;  %v1640_v2 = vld [vmem:[%s7734_s8 + $0x60] sm:$0xff] }
 0x184   :  { %1776 = vmatpush.msra.mxu1 %v1626_v32  ;;  %v1624_v32 = vld [vmem:[%s7733_s7 + $0x60] sm:$0xff]  ;;  %3236 = vmatpush.msra.mxu2 %v1640_v2 }
 0x185   :  { %v4496_v59 = vpop.xlane.xlu2 %398  ;;  %v4508_v45 = vpop.xlane.xlu1 %396  ;;  %v4526_v47 = vmul.f32 0.00390625, %v532_v37  ;;  %v8064_v52 = vld [vmem:[#allocation35_spill] sm:$0xff]  ;;  %v4538_v37 = vmul.f32 0.00390625, %v535_v54  ;;  %1647 = vmatpush.msra.mxu0 %v1640_v2  ;;  %v8074_v2 = vld [vmem:[#allocation41_spill] sm:$0xff] }
 0x186   :  { %8054 = vst [vmem:[#allocation70_spill] sm:$0xff] %v4496_v59  ;;  %v4506_v28 = vpop.xlane.xlu0 %394  ;;  %v453_v59 = vmul.f32 %v4188_v51, %v4188_v51  ;;  %v1625_v51 = vld [vmem:[%s7733_s7 + $0x68] sm:$0xff]  ;;  %v8075_v54 = vld [vmem:[#allocation75_spill] sm:$0xff] }
 0x187   :  { %8056 = vst [vmem:[#allocation71_spill] sm:$0xff] %v4506_v28  ;;  %3251 = vmatpush.msra.mxu3 %v1625_v51  ;;  %1777 = vmatpush.msra.mxu1 %v1625_v51  ;;  %v1622_v51 = vld [vmem:[%s7733_s7 + $0x50] sm:$0xff] }
 0x188   :  { %8057 = vst [vmem:[#allocation23_spill] sm:$0xff] %v4508_v45  ;;  %v534_v45 = vadd.f32 %v4240_v5, %v8061_v60  ;;  %v538_v5 = vadd.f32 %v4250_v58, %v8064_v52  ;;  %v8066_v60 = vld [vmem:[#allocation27_spill] sm:$0xff]  ;;  %v8068_v58 = vld [vmem:[#allocation21_spill] sm:$0xff]  ;;  %v454_v52 = vmul.f32 %v8075_v54, %v8075_v54  ;;  %v8079_v54 = vld [vmem:[#allocation34_spill] sm:$0xff] }
 0x189   :  { %8062 = vst [vmem:[#allocation69_spill] sm:$0xff] %v4526_v47  ;;  %v537_v56 = vadd.f32 %v4252_v0, %v8066_v60  ;;  %3252 = vmatpush.msra.mxu3 %v1624_v32  ;;  %v4558_v60 = vmul.f32 0.00390625, %v533_v27  ;;  %1778 = vmatpush.msra.mxu1 %v1624_v32  ;;  %v4628_v32 = vmul.f32 %v4538_v37, %v4538_v37 }
 0x18a   :  { %526 = vadd.xlane.f32.xlu2 %v453_v59  ;;  %524 = vadd.xlane.f32.xlu1 %v452_v53  ;;  %8065 = vst [vmem:[#allocation76_spill] sm:$0xff] %v4538_v37  ;;  %v1639_v59 = vld [vmem:[%s7734_s8 + $0x58] sm:$0xff]  ;;  %v4548_v46 = vmul.f32 0.00390625, %v534_v45  ;;  %v536_v53 = vadd.f32 %v4254_v63, %v8068_v58  ;;  %v4566_v45 = vmul.f32 %v4526_v47, %v4526_v47  ;;  %v1638_v63 = vld [vmem:[%s7734_s8 + $0x50] sm:$0xff]  ;;  %v4574_v27 = vmul.f32 0.00390625, %v538_v5  ;;  %v8089_v37 = vld [vmem:[#allocation40_spill] sm:$0xff] }
 0x18b   :  { %522 = vadd.xlane.f32.xlu0 %v451_v34  ;;  %3237 = vmatpush.msra.mxu2 %v1639_v59  ;;  %v541_v58 = vadd.f32 %v4262_v57, %v8074_v2  ;;  %v4586_v0 = vmul.f32 0.00390625, %v537_v56  ;;  %v8077_v5 = vld [vmem:[#allocation33_spill] sm:$0xff]  ;;  %v1637_v57 = vld [vmem:[%s7734_s8 + $0x48] sm:$0xff]  ;;  %v8080_v2 = vld [vmem:[#allocation10_spill] sm:$0xff]  ;;  %v542_v39 = vadd.f32 %v4278_v10, %v8089_v37 }
 0x18c   :  { %8067 = vst [vmem:[#allocation28_spill] sm:$0xff] %v4548_v46  ;;  %3253 = vmatpush.msra.mxu3 %v1623_v25  ;;  %1648 = vmatpush.msra.mxu0 %v1639_v59  ;;  %v540_v47 = vadd.f32 %v4264_v7, %v8077_v5  ;;  %v4600_v59 = vmul.f32 0.00390625, %v536_v53  ;;  %v539_v7 = vadd.f32 %v4266_v55, %v8079_v54  ;;  %v1636_v53 = vld [vmem:[%s7734_s8 + $0x40] sm:$0xff] }
 0x18d   :  { %v4552_v34 = vpop.xlane.xlu2 %404  ;;  %v4562_v18 = vpop.xlane.xlu1 %402  ;;  %8073 = vst [vmem:[#allocation27_spill] sm:$0xff] %v4574_v27  ;;  %3238 = vmatpush.msra.mxu2 %v1638_v63  ;;  %1779 = vmatpush.msra.mxu1 %v1623_v25  ;;  %v1620_v55 = vld [vmem:[%s7733_s7 + $0x40] sm:$0xff]  ;;  %v4624_v54 = vmul.f32 %v4558_v60, %v4558_v60  ;;  %v1619_v25 = vld [vmem:[%s7733_s7 + $0x38] sm:$0xff]  ;;  %v543_v5 = vadd.f32 %v4276_v6, %v8088_v42 }
 0x18e   :  { %8069 = vst [vmem:[#allocation22_spill] sm:$0xff] %v4552_v34  ;;  %v4560_v28 = vpop.xlane.xlu0 %400  ;;  %v455_v34 = vmul.f32 %v4211_v62, %v4211_v62  ;;  %3254 = vmatpush.msra.mxu3 %v1622_v51  ;;  %v1621_v62 = vld [vmem:[%s7733_s7 + $0x48] sm:$0xff]  ;;  %1649 = vmatpush.msra.mxu0 %v1638_v63  ;;  %v4620_v63 = vmul.f32 0.00390625, %v541_v58  ;;  %v4634_v4 = vmul.f32 0.00390625, %v540_v47  ;;  %v8084_v58 = vld [vmem:[#allocation47_spill] sm:$0xff]  ;;  %v4670_v42 = vmul.f32 %v4600_v59, %v4600_v59  ;;  %v8103_v6 = vld [vmem:[#allocation58_spill] sm:$0xff] }
 0x18f   :  { %8071 = vst [vmem:[#allocation29_spill] sm:$0xff] %v4560_v28  ;;  %v4610_v28 = vmul.f32 %v4548_v46, %v4548_v46  ;;  %3239 = vmatpush.msra.mxu2 %v1637_v57  ;;  %1780 = vmatpush.msra.mxu1 %v1622_v51  ;;  %v1618_v51 = vld [vmem:[%s7733_s7 + $0x30] sm:$0xff]  ;;  %v4676_v37 = vmul.f32 %v4586_v0, %v4586_v0  ;;  %v4696_v47 = vmul.f32 0.00390625, %v543_v5  ;;  %v5253_v46 = vld [vmem:[%s7731_s5] ss:$0 sm:$0xff] }
 0x190   :  { %8072 = vst [vmem:[#allocation35_spill] sm:$0xff] %v4562_v18  ;;  %3255 = vmatpush.msra.mxu3 %v1621_v62  ;;  %1650 = vmatpush.msra.mxu0 %v1637_v57  ;;  %v4680_v57 = vmul.f32 %v4574_v27, %v4574_v27  ;;  %v8096_v27 = vld [vmem:[#allocation57_spill] sm:$0xff]  ;;  %v550_v8 = vadd.f32 %v4298_v14, %v8103_v6  ;;  %v8106_v6 = vld [vmem:[#allocation52_spill] sm:$0xff] }
 0x191   :  { %8076 = vst [vmem:[#allocation21_spill] sm:$0xff] %v4586_v0  ;;  %3240 = vmatpush.msra.mxu2 %v1636_v53  ;;  %1781 = vmatpush.msra.mxu1 %v1621_v62 }
 0x192   :  { %8078 = vst [vmem:[#allocation41_spill] sm:$0xff] %v4600_v59  ;;  %530 = vadd.xlane.f32.xlu1 %v455_v34  ;;  %3256 = vmatpush.msra.mxu3 %v1620_v55  ;;  %v1635_v34 = vld [vmem:[%s7734_s8 + $0x38] sm:$0xff]  ;;  %v4777_v35 = vmul.f32 0.00390625, %v550_v8  ;;  %v4791_v8 = vmul.f32 %v4696_v47, %v4696_v47 }
 0x193   :  { %8081 = vst [vmem:[#allocation75_spill] sm:$0xff] %v4620_v63  ;;  %528 = vadd.xlane.f32.xlu0 %v454_v52  ;;  %v544_v52 = vadd.f32 %v4274_v3, %v8084_v58  ;;  %v4650_v3 = vmul.f32 0.00390625, %v539_v7  ;;  %3241 = vmatpush.msra.mxu2 %v1635_v34  ;;  %v1634_v7 = vld [vmem:[%s7734_s8 + $0x30] sm:$0xff] }
 0x194   :  { %8083 = vst [vmem:[#allocation33_spill] sm:$0xff] %v4634_v4  ;;  %3257 = vmatpush.msra.mxu3 %v1619_v25  ;;  %1651 = vmatpush.msra.mxu0 %v1636_v53  ;;  %v1617_v53 = vld [vmem:[%s7733_s7 + $0x28] sm:$0xff] }
 0x195   :  { %8086 = vst [vmem:[#allocation34_spill] sm:$0xff] %v4650_v3  ;;  %v4652_v58 = vpop.xlane.xlu2 %410  ;;  %v4660_v56 = vpop.xlane.xlu1 %408  ;;  %v4688_v10 = vmul.f32 0.00390625, %v544_v52  ;;  %3242 = vmatpush.msra.mxu2 %v1634_v7  ;;  %1782 = vmatpush.msra.mxu1 %v1620_v55 }
 0x196   :  { %8087 = vst [vmem:[#allocation10_spill] sm:$0xff] %v4652_v58  ;;  %v4658_v1 = vpop.xlane.xlu0 %406  ;;  %3258 = vmatpush.msra.mxu3 %v1618_v51  ;;  %1652 = vmatpush.msra.mxu0 %v1635_v34  ;;  %v4698_v58 = vmul.f32 0.00390625, %v542_v39  ;;  %v8101_v39 = vld [vmem:[#allocation46_spill] sm:$0xff]  ;;  %v548_v34 = vadd.f32 %v4302_v16, %v8106_v6 }
 0x197   :  { %8090 = vst [vmem:[#allocation47_spill] sm:$0xff] %v4658_v1  ;;  %v551_v1 = vadd.f32 %v4314_v19, %v8096_v27  ;;  %v4710_v19 = vmul.f32 %v4650_v3, %v4650_v3  ;;  %v8100_v27 = vld [vmem:[#allocation45_spill] sm:$0xff]  ;;  %v545_v55 = vadd.f32 %v4290_v13, %v8101_v39  ;;  %3243 = vmatpush.msra.mxu2 %v1633_v48  ;;  %v8105_v39 = vld [vmem:[#allocation51_spill] sm:$0xff] }
 0x198   :  { %8091 = vst [vmem:[#allocation39_spill] sm:$0xff] %v4660_v56  ;;  %v8099_v56 = vld [vmem:[#allocation53_spill] sm:$0xff]  ;;  %v546_v5 = vadd.f32 %v4288_v17, %v8100_v27  ;;  %3259 = vmatpush.msra.mxu3 %v1617_v53  ;;  %v1616_v17 = vld [vmem:[%s7733_s7 + $0x20] sm:$0xff]  ;;  %1783 = vmatpush.msra.mxu1 %v1619_v25  ;;  %v4732_v13 = vmul.f32 %v4620_v63, %v4620_v63  ;;  %v4747_v25 = vld [vmem:[%s7726_s0 + $0x58] sm:$0xff] }
 0x199   :  { %8094 = vst [vmem:[#allocation40_spill] sm:$0xff] %v4688_v10  ;;  %v547_v52 = vadd.f32 %v4286_v11, %v8099_v56  ;;  %v4718_v11 = vmul.f32 %v4634_v4, %v4634_v4  ;;  %1653 = vmatpush.msra.mxu0 %v1634_v7  ;;  %v549_v14 = vadd.f32 %v4300_v20, %v8105_v39  ;;  %v4740_v56 = vmul.f32 0.00390625, %v551_v1  ;;  %v4756_v1 = vld [vmem:[%s7726_s0 + $0x50] sm:$0xff]  ;;  %v1631_v7 = vld [vmem:[%s7734_s8 + $0x18] sm:$0xff] }
 0x19a   :  { %8097 = vst [vmem:[#allocation57_spill] sm:$0xff] %v4696_v47  ;;  %3244 = vmatpush.msra.mxu2 %v1632_v49  ;;  %3260 = vmatpush.msra.mxu3 %v1616_v17  ;;  %v1615_v20 = vld [vmem:[%s7733_s7 + $0x18] sm:$0xff] }
 0x19b   :  { %8098 = vst [vmem:[#allocation117_spill] sm:$0xff] %v4698_v58  ;;  %v4760_v39 = vmul.f32 0.00390625, %v547_v52  ;;  %1784 = vmatpush.msra.mxu1 %v1618_v51  ;;  %1654 = vmatpush.msra.mxu0 %v1633_v48  ;;  %v4774_v52 = vmul.f32 0.00390625, %v545_v55  ;;  %v1630_v48 = vld [vmem:[%s7734_s8 + $0x10] sm:$0xff]  ;;  %v4802_v55 = vld [vmem:[%s7726_s0 + $0x78] sm:$0xff] }
 0x19c   :  { %8104 = vst [vmem:[#allocation53_spill] sm:$0xff] %v4732_v13  ;;  %3245 = vmatpush.msra.mxu2 %v1631_v7  ;;  %3261 = vmatpush.msra.mxu3 %v1615_v20  ;;  %v8140_v47 = vld [vmem:[#allocation66_spill] sm:$0xff] }
 0x19d   :  { %v4742_v4 = vpop.xlane.xlu2 %414  ;;  %8108 = vst [vmem:[#allocation46_spill] sm:$0xff] %v4747_v25  ;;  %v495_v27 = vpop.xlane.xlu1 %494  ;;  %v4772_v25 = vmul.f32 0.00390625, %v546_v5  ;;  %v1614_v5 = vld [vmem:[%s7733_s7 + $0x10] sm:$0xff]  ;;  %1785 = vmatpush.msra.mxu1 %v1617_v53  ;;  %1655 = vmatpush.msra.mxu0 %v1632_v49  ;;  %v8126_v53 = vld [vmem:[#allocation68_spill] sm:$0xff] }
 0x19e   :  { %8107 = vst [vmem:[#allocation45_spill] sm:$0xff] %v4742_v4  ;;  %v4762_v6 = vpop.xlane.xlu0 %412  ;;  %v627_v16 = vadd.f32 %v495_v27, %v4454_v30  ;;  %v8116_v4 = vld [vmem:[#allocation56_spill] sm:$0xff]  ;;  %v4793_v30 = vmul.f32 0.00390625, %v549_v14  ;;  %3246 = vmatpush.msra.mxu2 %v1630_v48  ;;  %3262 = vmatpush.msra.mxu3 %v1614_v5  ;;  %v4815_v27 = vld [vmem:[%s7726_s0 + $0x70] sm:$0xff] }
 0x19f   :  { %8109 = vst [vmem:[#allocation58_spill] sm:$0xff] %v4756_v1  ;;  %v8115_v1 = vld [vmem:[#allocation62_spill] sm:$0xff]  ;;  %v552_v51 = vadd.f32 %v4312_v9, %v8116_v4  ;;  %v703_v4 = vmul.f32 %v4740_v56, %v4740_v56  ;;  %1786 = vmatpush.msra.mxu1 %v1616_v17  ;;  %1656 = vmatpush.msra.mxu0 %v1631_v7  ;;  %v4824_v17 = vld [vmem:[%s7726_s0 + $0x68] sm:$0xff] }
 0x1a0   :  { %8110 = vst [vmem:[#allocation51_spill] sm:$0xff] %v4760_v39  ;;  %v553_v63 = vadd.f32 %v4310_v23, %v8115_v1  ;;  %v4795_v23 = vmul.f32 0.00390625, %v548_v34  ;;  %v665_v9 = vmul.f32 0.00390625, %v627_v16  ;;  %v4810_v34 = vmul.f32 %v4698_v58, %v4698_v58  ;;  %v1629_v1 = vld [vmem:[%s7734_s8 + $0x8] sm:$0xff]  ;;  %v8141_v58 = vld [vmem:[#allocation86_spill] sm:$0xff] }
 0x1a1   :  { %8111 = vst [vmem:[#allocation52_spill] sm:$0xff] %v4762_v6  ;;  %v4834_v14 = vmul.f32 0.00390625, %v552_v51  ;;  %1787 = vmatpush.msra.mxu1 %v1615_v20  ;;  %1657 = vmatpush.msra.mxu0 %v1630_v48  ;;  %v4852_v51 = vld [vmem:[%s7726_s0 + $0x80] sm:$0xff]  ;;  %v556_v20 = vadd.f32 %v4322_v26, %v8126_v53  ;;  %v4872_v53 = vmul.f32 %v4688_v10, %v4688_v10 }
 0x1a2   :  { %8112 = vst [vmem:[#allocation118_spill] sm:$0xff] %v4772_v25  ;;  %v741_v16 = vsub.f32 %v665_v9, %v703_v4  ;;  %v4832_v21 = vmul.f32 0.00390625, %v553_v63  ;;  %v4845_v4 = vld [vmem:[%s7726_s0 + $0x88] sm:$0xff]  ;;  %3247 = vmatpush.msra.mxu2 %v1629_v1  ;;  %v1628_v9 = vld [vmem:[%s7734_s8] sm:$0xff]  ;;  %v558_v33 = vadd.f32 %v8141_v58, %v8140_v47  ;;  %v4940_v47 = vmul.f32 %v4760_v39, %v4760_v39 }
 0x1a3   :  { %8113 = vst [vmem:[#allocation119_spill] sm:$0xff] %v4774_v52  ;;  %v8128_v63 = vld [vmem:[#allocation60_spill] sm:$0xff]  ;;  %v1612_v26 = vld [vmem:[%s7733_s7] sm:$0xff]  ;;  %1788 = vmatpush.msra.mxu1 %v1614_v5  ;;  %1658 = vmatpush.msra.mxu0 %v1629_v1  ;;  %v8139_v1 = vld [vmem:[#allocation50_spill] sm:$0xff]  ;;  %v4944_v58 = vmul.f32 %v4772_v25, %v4772_v25 }
 0x1a4   :  { %8114 = vst [vmem:[#allocation120_spill] sm:$0xff] %v4777_v35  ;;  %v779_v48 = vmax.f32 %v741_v16, 0.0  ;;  %v555_v29 = vadd.f32 %v4324_v12, %v8128_v63  ;;  %v8130_v16 = vld [vmem:[#allocation61_spill] sm:$0xff]  ;;  %3248 = vmatpush.msra.mxu2 %v1628_v9  ;;  %v4883_v5 = vld [vmem:[%s7726_s0 + $0xa8] sm:$0xff]  ;;  %v4976_v6 = vmul.f32 0.00390625, %v558_v33 }
 0x1a5   :  { %8117 = vst [vmem:[#allocation62_spill] sm:$0xff] %v4791_v8  ;;  %v4858_v7 = vpop.xlane.xlu2 %416  ;;  %v497_v61 = vpop.xlane.xlu1 %496  ;;  %v554_v49 = vadd.f32 %v4326_v22, %v8130_v16  ;;  %v704_v22 = vmul.f32 %v4834_v14, %v4834_v14  ;;  %1659 = vmatpush.msra.mxu0 %v1628_v9  ;;  %v8134_v16 = vld [vmem:[#allocation49_spill] sm:$0xff]  ;;  %v4923_v9 = vmul.f32 %v4832_v21, %v4832_v21 }
 0x1a6   :  { %8118 = vst [vmem:[#allocation56_spill] sm:$0xff] %v4793_v30  ;;  %v4876_v12 = vadd.f32 1e-05, %v779_v48 }
 0x1a7   :  { %8119 = vst [vmem:[#allocation121_spill] sm:$0xff] %v4795_v23 }
 0x1a8   :  { %8120 = vst [vmem:[#allocation122_spill] sm:$0xff] %v4802_v55  ;;  %v1613_v55 = vld [vmem:[%s7733_s7 + $0x8] sm:$0xff]  ;;  %3278 = vrsqrt.f32 %v4876_v12  ;;  %vm1032_vm1 = vweird.f32 %v4876_v12 }
 0x1a9   :  { %8121 = vst [vmem:[#allocation123_spill] sm:$0xff] %v4810_v34  ;;  %3263 = vmatpush.msra.mxu3 %v1613_v55  ;;  %1789 = vmatpush.msra.mxu1 %v1613_v55  ;;  %v4906_v55 = vld [vmem:[%s7726_s0 + $0x98] sm:$0xff]  ;;  %v8206_v34 = vsub.f32 %v8139_v1, %v4740_v56 }
 0x1aa   :  { %8122 = vst [vmem:[#allocation124_spill] sm:$0xff] %v4815_v27  ;;  %v8132_v27 = vld [vmem:[#allocation48_spill] sm:$0xff] }
 0x1ab   :  { %8123 = vst [vmem:[#allocation125_spill] sm:$0xff] %v4824_v17  ;;  %3264 = vmatpush.msra.mxu3 %v1612_v26  ;;  %1790 = vmatpush.msra.mxu1 %v1612_v26  ;;  %v8145_v26 = vld [vmem:[#allocation87_spill] sm:$0xff] }
 0x1ac   :  { %8124 = vst [vmem:[#allocation126_spill] sm:$0xff] %v4845_v4  ;;  %v457_v4 = vpop.xlane.xlu0 %456 }
 0x1ad   :  { %8125 = vst [vmem:[#allocation127_spill] sm:$0xff] %v4852_v51  ;;  %v608_v63 = vadd.f32 %v457_v4, %v4384_v38  ;;  %v8131_v51 = vld [vmem:[#allocation114_spill] sm:$0xff]  ;;  %v4891_v38 = vmul.f32 0.00390625, %v556_v20  ;;  %v4912_v20 = vmul.f32 0.00390625, %v554_v49  ;;  %v8144_v49 = vld [vmem:[#allocation67_spill] sm:$0xff]  ;;  %v461_v39 = vpop.xlane.xlu2 %460  ;;  %v499_v59 = vpop.xlane.xlu1 %498 }
 0x1ae   :  { %8127 = vst [vmem:[#allocation68_spill] sm:$0xff] %v4858_v7  ;;  %v628_v15 = vadd.f32 %v497_v61, %v8131_v51  ;;  %v4897_v51 = vld [vmem:[%s7726_s0 + $0xa0] sm:$0xff]  ;;  %v4957_v7 = vpop.eup %3278 }
 0x1af   :  { %8129 = vst [vmem:[#allocation60_spill] sm:$0xff] %v4872_v53  ;;  %v646_v61 = vmul.f32 0.00390625, %v608_v63  ;;  %v8137_v63 = vld [vmem:[#allocation74_spill] sm:$0xff]  ;;  %v1027_v0 = vmul.f32 %v4957_v7, %v4876_v12  ;;  %v5023_v53 = vld [vmem:[%s7726_s0 + $0xd0] sm:$0xff]  ;;  %vm1033_vm0 = vweird.f32 %v4957_v7  ;;  %v5159_v12 = vld [vmem:[%s7727_s1 + $0x108] sm:$0xff] }
 0x1b0   :  { %8133 = vst [vmem:[#allocation61_spill] sm:$0xff] %v4891_v38  ;;  %v666_v4 = vmul.f32 0.00390625, %v628_v15  ;;  %v4910_v15 = vmul.f32 0.00390625, %v555_v29  ;;  %v559_v17 = vadd.f32 %v8138_v24, %v8137_v63  ;;  %v4927_v29 = vmul.f32 %v4774_v52, %v4774_v52  ;;  %v4932_v24 = vld [vmem:[%s7726_s0 + $0xc0] sm:$0xff]  ;;  %v4951_v63 = vld [vmem:[%s7726_s0 + $0xb8] sm:$0xff]  ;;  %vm1034_vm2 = vmor %vm1032_vm1, %vm1033_vm0 }
 0x1b1   :  { %8136 = vst [vmem:[#allocation48_spill] sm:$0xff] %v4912_v20  ;;  %v722_v48 = vsub.f32 %v646_v61, %v4566_v45  ;;  %v8153_v45 = vld [vmem:[#allocation97_spill] sm:$0xff]  ;;  %v1028_v33 = vmul.f32 %v4957_v7, %v1027_v0 }
 0x1b2   :  { %8135 = vst [vmem:[#allocation114_spill] sm:$0xff] %v4910_v15  ;;  %v742_v31 = vsub.f32 %v666_v4, %v704_v22  ;;  %v557_v22 = vadd.f32 %v8145_v26, %v8144_v49  ;;  %v4962_v4 = vld [vmem:[%s7726_s0 + $0xb0] sm:$0xff]  ;;  %v4966_v62 = vmul.f32 0.00390625, %v559_v17  ;;  %v4982_v17 = vmul.f32 %v4912_v20, %v4912_v20  ;;  %v5196_v20 = vld [vmem:[%s7730_s4] ss:$0 sm:$0xff] }
 0x1b3   :  { %8142 = vst [vmem:[#allocation49_spill] sm:$0xff] %v4927_v29  ;;  %v760_v10 = vmax.f32 %v722_v48, 0.0  ;;  %v4972_v48 = vld [vmem:[%s7727_s1 + $0xb0] sm:$0xff]  ;;  %v4992_v26 = vmul.f32 %v4891_v38, %v4891_v38 }
 0x1b4   :  { %8143 = vst [vmem:[#allocation74_spill] sm:$0xff] %v4932_v24  ;;  %v459_v52 = vpop.xlane.xlu0 %458  ;;  %v780_v3 = vmax.f32 %v742_v31, 0.0  ;;  %v4984_v31 = vmul.f32 0.00390625, %v557_v22  ;;  %v8160_v24 = vld [vmem:[#allocation89_spill] sm:$0xff]  ;;  %v4999_v22 = vmul.f32 %v4910_v15, %v4910_v15 }
 0x1b5   :  { %8146 = vst [vmem:[#allocation85_spill] sm:$0xff] %v4940_v47  ;;  %v609_v50 = vadd.f32 %v459_v52, %v8153_v45  ;;  %v8157_v52 = vld [vmem:[#allocation79_spill] sm:$0xff]  ;;  %v8158_v45 = vld [vmem:[#allocation88_spill] sm:$0xff]  ;;  %v561_v61 = vadd.f32 %v8160_v24, %v8159_v43  ;;  %v8162_v24 = vld [vmem:[#allocation73_spill] sm:$0xff]  ;;  %v465_v49 = vpop.xlane.xlu2 %464 }
 0x1b6   :  { %8147 = vst [vmem:[#allocation50_spill] sm:$0xff] %v4944_v58  ;;  %v562_v25 = vadd.f32 %v8158_v45, %v8157_v52  ;;  %v4995_v58 = vadd.f32 1e-05, %v760_v10  ;;  %v5004_v52 = vld [vmem:[%s7726_s0 + $0xd8] sm:$0xff]  ;;  %v5010_v0 = vadd.f32 1e-05, %v780_v3 }
 0x1b7   :  { %8149 = vst [vmem:[#allocation66_spill] sm:$0xff] %v4951_v63  ;;  %v647_v18 = vmul.f32 0.00390625, %v609_v50  ;;  %v8163_v45 = vld [vmem:[#allocation90_spill] sm:$0xff]  ;;  %v8164_v10 = vld [vmem:[#allocation101_spill] sm:$0xff] }
 0x1b8   :  { %8151 = vst [vmem:[#allocation86_spill] sm:$0xff] %v4962_v4  ;;  %v560_v38 = vadd.f32 %v8163_v45, %v8162_v24  ;;  %v610_v50 = vadd.f32 %v461_v39, %v8164_v10  ;;  %v5030_v3 = vld [vmem:[%s7727_s1 + $0xd0] sm:$0xff]  ;;  %v1029_v45 = vmul.f32 0.5, %v1028_v33  ;;  %v5037_v10 = vld [vmem:[%s7726_s0 + $0xc8] sm:$0xff]  ;;  %v5041_v47 = vmul.f32 0.00390625, %v562_v25  ;;  %v8173_v39 = vld [vmem:[#allocation82_spill] sm:$0xff] }
 0x1b9   :  { %8152 = vst [vmem:[#allocation67_spill] sm:$0xff] %v4966_v62  ;;  %v5043_v24 = vmul.f32 0.00390625, %v561_v61  ;;  %3280 = vrsqrt.f32 %v4995_v58  ;;  %v723_v25 = vsub.f32 %v647_v18, %v4624_v54  ;;  %v5064_v33 = vmul.f32 %v4984_v31, %v4984_v31  ;;  %v5077_v54 = vld [vmem:[%s7726_s0 + $0xf0] sm:$0xff] }
 0x1ba   :  { %8154 = vst [vmem:[#allocation87_spill] sm:$0xff] %v4972_v48  ;;  %v5057_v43 = vmul.f32 0.00390625, %v560_v38  ;;  %v1030_v61 = vsub.f32 1.5, %v1029_v45  ;;  %3282 = vrsqrt.f32 %v5010_v0  ;;  %v5072_v18 = vmul.f32 %v4966_v62, %v4966_v62  ;;  %v5091_v45 = vld [vmem:[%s7726_s0 + $0xe8] sm:$0xff] }
 0x1bb   :  { %8155 = vst [vmem:[#allocation97_spill] sm:$0xff] %v4976_v6  ;;  %v5098_v38 = vld [vmem:[%s7727_s1 + $0xe8] sm:$0xff]  ;;  %vm842_vm5 = vweird.f32 %v4995_v58  ;;  %vm1042_vm6 = vweird.f32 %v5010_v0 }
 0x1bc   :  { %8156 = vst [vmem:[#allocation128_spill] sm:$0xff] %v4984_v31  ;;  %v761_v31 = vmax.f32 %v723_v25, 0.0  ;;  %v1031_v29 = vmul.f32 %v4957_v7, %v1030_v61  ;;  %v5121_v25 = vld [vmem:[%s7727_s1 + $0xe0] sm:$0xff] }
 0x1bd   :  { %8161 = vst [vmem:[#allocation79_spill] sm:$0xff] %v5004_v52  ;;  %v8171_v52 = vld [vmem:[#allocation115_spill] sm:$0xff] }
 0x1be   :  { %8165 = vst [vmem:[#allocation88_spill] sm:$0xff] %v5016_v44  ;;  %v629_v44 = vadd.f32 %v499_v59, %v8171_v52  ;;  %v648_v59 = vmul.f32 0.00390625, %v610_v50  ;;  %v8176_v52 = vld [vmem:[#allocation77_spill] sm:$0xff] }
 0x1bf   :  { %8166 = vst [vmem:[#allocation72_spill] sm:$0xff] %v5023_v53  ;;  %v5049_v53 = vld [vmem:[%s7727_s1 + $0xc8] sm:$0xff]  ;;  %v5084_v50 = vld [vmem:[%s7727_s1 + $0xf0] sm:$0xff] }
 0x1c0   :  { %8167 = vst [vmem:[#allocation89_spill] sm:$0xff] %v5030_v3  ;;  %v8174_v3 = vld [vmem:[#allocation91_spill] sm:$0xff] }
 0x1c1   :  { %8168 = vst [vmem:[#allocation73_spill] sm:$0xff] %v5037_v10  ;;  %v565_v63 = vadd.f32 %v8174_v3, %v8173_v39  ;;  %v8177_v10 = vld [vmem:[#allocation92_spill] sm:$0xff]  ;;  %v5068_v3 = vmul.f32 %v4976_v6, %v4976_v6  ;;  %v8184_v39 = vld [vmem:[#allocation78_spill] sm:$0xff] }
 0x1c2   :  { %8169 = vst [vmem:[#allocation90_spill] sm:$0xff] %v5041_v47  ;;  %v564_v15 = vadd.f32 %v8177_v10, %v8176_v52  ;;  %v667_v52 = vmul.f32 0.00390625, %v629_v44  ;;  %v5109_v10 = vld [vmem:[%s7726_s0 + $0xe0] sm:$0xff]  ;;  %v8192_v44 = vld [vmem:[#allocation94_spill] sm:$0xff] }
 0x1c3   :  { %8170 = vst [vmem:[#allocation101_spill] sm:$0xff] %v5043_v24  ;;  %v5102_v62 = vmul.f32 0.00390625, %v565_v63  ;;  %v5116_v63 = vpop.eup %3280 }
 0x1c4   :  { %8172 = vst [vmem:[#allocation115_spill] sm:$0xff] %v5049_v53  ;;  %v501_v53 = vpop.xlane.xlu0 %500  ;;  %v5135_v61 = vpop.eup %3282  ;;  %vm843_vm3 = vweird.f32 %v5116_v63 }
 0x1c5   :  { %8175 = vst [vmem:[#allocation82_spill] sm:$0xff] %v5057_v43  ;;  %vm1043_vm4 = vweird.f32 %v5135_v61  ;;  %vm844_vm7 = vmor %vm842_vm5, %vm843_vm3 }
 0x1c6   :  { %8178 = vst [vmem:[#allocation91_spill] sm:$0xff] %v5072_v18  ;;  %vm1044_vm8 = vmor %vm1042_vm6, %vm1043_vm4 }
 0x1c7   :  { %8179 = vst [vmem:[#allocation77_spill] sm:$0xff] %v5077_v54  ;;  %v5129_v54 = vmul.f32 %v4793_v30, %v4793_v30  ;;  %v5145_v30 = vld [vmem:[%s7726_s0 + $0x108] sm:$0xff] }
 0x1c8   :  { %8180 = vst [vmem:[#allocation92_spill] sm:$0xff] %v5084_v50  ;;  %v8185_v50 = vld [vmem:[#allocation93_spill] sm:$0xff] }
 0x1c9   :  { %8181 = vst [vmem:[#allocation129_spill] sm:$0xff] %v5091_v45  ;;  %v563_v6 = vadd.f32 %v8185_v50, %v8184_v39  ;;  %v724_v45 = vsub.f32 %v648_v59, %v4610_v28  ;;  %v5125_v39 = vmul.f32 0.00390625, %v564_v15  ;;  %v5133_v28 = vmul.f32 %v4795_v23, %v4795_v23  ;;  %v8191_v59 = vld [vmem:[#allocation84_spill] sm:$0xff]  ;;  %v8193_v50 = vld [vmem:[#allocation99_spill] sm:$0xff]  ;;  %v8201_v23 = vld [vmem:[#allocation81_spill] sm:$0xff] }
 0x1ca   :  { %8182 = vst [vmem:[#allocation130_spill] sm:$0xff] %v5098_v38  ;;  %v568_v38 = vadd.f32 %v8192_v44, %v8191_v59  ;;  %v612_v15 = vadd.f32 %v465_v49, %v8193_v50  ;;  %v8198_v49 = vld [vmem:[#allocation80_spill] sm:$0xff]  ;;  %v463_v59 = vpop.xlane.xlu1 %462 }
 0x1cb   :  { %8183 = vst [vmem:[#allocation131_spill] sm:$0xff] %v5102_v62 }
 0x1cc   :  { %8186 = vst [vmem:[#allocation78_spill] sm:$0xff] %v5109_v10  ;;  %v743_v10 = vsub.f32 %v667_v52, %v4923_v9  ;;  %v8199_v52 = vld [vmem:[#allocation95_spill] sm:$0xff]  ;;  %v837_v9 = vmul.f32 %v5116_v63, %v4995_v58 }
 0x1cd   :  { %8187 = vst [vmem:[#allocation93_spill] sm:$0xff] %v5121_v25  ;;  %v5149_v25 = vmul.f32 0.00390625, %v563_v6  ;;  %v567_v50 = vadd.f32 %v8199_v52, %v8198_v49  ;;  %v762_v6 = vmax.f32 %v724_v45, 0.0  ;;  %v1037_v45 = vmul.f32 %v5135_v61, %v5010_v0 }
 0x1ce   :  { %8188 = vst [vmem:[#allocation132_spill] sm:$0xff] %v5125_v39  ;;  %v5186_v49 = vmul.f32 0.00390625, %v568_v38  ;;  %v781_v52 = vmax.f32 %v743_v10, 0.0  ;;  %v5201_v38 = vld [vmem:[%s7726_s0 + $0xf8] sm:$0xff]  ;;  %v5223_v10 = vld [vmem:[%s7732_s6] ss:$0 sm:$0xff] }
 0x1cf   :  { %8189 = vst [vmem:[#allocation133_spill] sm:$0xff] %v5129_v54  ;;  %v8196_v54 = vld [vmem:[#allocation64_spill] sm:$0xff]  ;;  %v5212_v1 = vmul.f32 0.00390625, %v567_v50  ;;  %v5232_v50 = vmul.f32 %v4777_v35, %v4777_v35 }
 0x1d0   :  { %8190 = vst [vmem:[#allocation134_spill] sm:$0xff] %v5133_v28  ;;  %v5151_v28 = vadd.f32 1e-05, %v761_v31  ;;  %v630_v44 = vadd.f32 %v501_v53, %v8196_v54  ;;  %v1035_v31 = vsel %vm1034_vm2, %v4957_v7, %v1031_v29  ;;  %v5169_v53 = vld [vmem:[%s7726_s0 + $0x100] sm:$0xff]  ;;  %v650_v54 = vmul.f32 0.00390625, %v612_v15  ;;  %v5208_v15 = vld [vmem:[%s7727_s1 + $0xf8] sm:$0xff] }
 0x1d1   :  { %8194 = vst [vmem:[#allocation84_spill] sm:$0xff] %v5145_v30  ;;  %v8202_v30 = vld [vmem:[#allocation96_spill] sm:$0xff]  ;;  %v5182_v7 = vld [vmem:[%s7727_s1 + $0x100] sm:$0xff]  ;;  %v1471_v4 = vmul.f32 %v8206_v34, %v1035_v31  ;;  %v1038_v29 = vmul.f32 %v5135_v61, %v1037_v45 }
 0x1d2   :  { %8195 = vst [vmem:[#allocation94_spill] sm:$0xff] %v5149_v25  ;;  %v566_v18 = vadd.f32 %v8202_v30, %v8201_v23  ;;  %3284 = vrsqrt.f32 %v5151_v28  ;;  %v668_v30 = vmul.f32 0.00390625, %v630_v44  ;;  %v8205_v23 = vld [vmem:[#allocation100_spill] sm:$0xff]  ;;  %v5214_v44 = vadd.f32 1e-05, %v762_v6 }
 0x1d3   :  { %8197 = vst [vmem:[#allocation99_spill] sm:$0xff] %v5159_v12  ;;  %v611_v12 = vadd.f32 %v463_v59, %v8205_v23  ;;  %v838_v23 = vmul.f32 %v5116_v63, %v837_v9  ;;  %v5228_v34 = vld [vmem:[%s7729_s3] ss:$0 sm:$0xff]  ;;  %v5241_v6 = vadd.f32 1e-05, %v781_v52  ;;  %v726_v45 = vsub.f32 %v650_v54, %v4670_v42 }
 0x1d4   :  { %8200 = vst [vmem:[#allocation64_spill] sm:$0xff] %v5169_v53  ;;  %v505_v53 = vpop.xlane.xlu2 %504  ;;  %v5216_v59 = vmul.f32 0.00390625, %v566_v18  ;;  %v5237_v18 = vld [vmem:[%s7726_s0 + $0x120] sm:$0xff]  ;;  %v744_v48 = vsub.f32 %v668_v30, %v4982_v17  ;;  %v1513_v35 = vmul.f32 %v5196_v20, %v1471_v4  ;;  %v5265_v4 = vld [vmem:[%s7726_s0 + $0x118] sm:$0xff]  ;;  %3286 = vrsqrt.f32 %v5214_v44 }
 0x1d5   :  { %8203 = vst [vmem:[#allocation80_spill] sm:$0xff] %v5182_v7  ;;  %v503_v7 = vpop.xlane.xlu0 %502  ;;  %v649_v8 = vmul.f32 0.00390625, %v611_v12  ;;  %v5258_v42 = vld [vmem:[%s7727_s1 + $0x120] sm:$0xff]  ;;  %v1039_v54 = vmul.f32 0.5, %v1038_v29  ;;  %3288 = vrsqrt.f32 %v5241_v6  ;;  %v764_v9 = vmax.f32 %v726_v45, 0.0  ;;  %v467_v29 = vpop.xlane.xlu1 %466 }
 0x1d6   :  { %8204 = vst [vmem:[#allocation95_spill] sm:$0xff] %v5186_v49  ;;  %v1555_v52 = vadd.f32 %v5223_v10, %v1513_v35  ;;  %vm852_vm9 = vweird.f32 %v5151_v28  ;;  %vm1052_vm12 = vweird.f32 %v5241_v6  ;;  %vm862_vm15 = vweird.f32 %v5214_v44 }
 0x1d7   :  { %8207 = vst [vmem:[#allocation81_spill] sm:$0xff] %v5201_v38  ;;  %v8213_v38 = vld [vmem:[#allocation116_spill] sm:$0xff] }
 0x1d8   :  { %8208 = vst [vmem:[#allocation96_spill] sm:$0xff] %v5208_v15  ;;  %v632_v15 = vadd.f32 %v505_v53, %v8213_v38  ;;  %v839_v53 = vmul.f32 0.5, %v838_v23  ;;  %v5278_v38 = vld [vmem:[%s7727_s1 + $0x118] sm:$0xff]  ;;  %v725_v23 = vsub.f32 %v649_v8, %v4628_v32  ;;  %v1593_v17 = vmax.f32 %v1555_v52, 0.0  ;;  %v5299_v32 = vld [vmem:[%s7727_s1 + $0x110] sm:$0xff] }
 0x1d9   :  { %8209 = vst [vmem:[#allocation100_spill] sm:$0xff] %v5212_v1  ;;  %v1040_v52 = vsub.f32 1.5, %v1039_v54  ;;  %v5351_v8 = vmul.f32 %v5041_v47, %v5041_v47  ;;  %v8234_v47 = vld [vmem:[#allocation102_spill] sm:$0xff] }
 0x1da   :  { %8210 = vst [vmem:[#allocation135_spill] sm:$0xff] %v5216_v59  ;;  %v840_v45 = vsub.f32 1.5, %v839_v53  ;;  %1717 = vmatmul.f32.vlgmr.msra.gmra.mxu2 %v1593_v17  ;;  %v763_v40 = vmax.f32 %v725_v23, 0.0  ;;  %v5318_v17 = vmul.f32 %v5043_v24, %v5043_v24 }
 0x1db   :  { %8211 = vst [vmem:[#allocation136_spill] sm:$0xff] %v5232_v50  ;;  %v8214_v50 = vsub.f32 %v4906_v55, %v4740_v56  ;;  %v8217_v55 = vld [vmem:[#allocation63_spill] sm:$0xff] }
 0x1dc   :  { %8212 = vst [vmem:[#allocation137_spill] sm:$0xff] %v5237_v18  ;;  %v631_v12 = vadd.f32 %v503_v7, %v8217_v55  ;;  %v670_v7 = vmul.f32 0.00390625, %v632_v15  ;;  %v782_v55 = vmax.f32 %v744_v48, 0.0  ;;  %v8221_v18 = vld [vmem:[#allocation98_spill] sm:$0xff] }
 0x1dd   :  { %v1273_v13 = vmul.f32 %v8214_v50, %v1035_v31  ;;  %8215 = vst [vmem:[#allocation116_spill] sm:$0xff] %v5258_v42  ;;  %v5271_v31 = vpop.eup %3284  ;;  %v8220_v50 = vld [vmem:[#allocation83_spill] sm:$0xff] }
 0x1de   :  { %8216 = vst [vmem:[#allocation138_spill] sm:$0xff] %v5265_v4  ;;  %v569_v42 = vadd.f32 %v8221_v18, %v8220_v50  ;;  %v847_v48 = vmul.f32 %v5271_v31, %v5151_v28  ;;  %v669_v15 = vmul.f32 0.00390625, %v631_v12  ;;  %v5303_v56 = vpop.eup %3286  ;;  %v5305_v4 = vadd.f32 1e-05, %v764_v9  ;;  %v8223_v50 = vld [vmem:[#allocation104_spill] sm:$0xff] }
 0x1df   :  { %v1315_v30 = vmul.f32 %v5228_v34, %v1273_v13  ;;  %8218 = vst [vmem:[#allocation63_spill] sm:$0xff] %v5278_v38  ;;  %v5288_v13 = vld [vmem:[%s7726_s0 + $0x110] sm:$0xff]  ;;  %v746_v18 = vsub.f32 %v670_v7, %v4992_v26  ;;  %v613_v12 = vadd.f32 %v467_v29, %v8223_v50  ;;  %v5311_v38 = vmul.f32 %v5057_v43, %v5057_v43  ;;  %v5320_v9 = vpop.eup %3288  ;;  %v8227_v50 = vld [vmem:[#allocation43_spill] sm:$0xff] }
 0x1e0   :  { %8219 = vst [vmem:[#allocation139_spill] sm:$0xff] %v5288_v13  ;;  %v5313_v13 = vadd.f32 1e-05, %v782_v55  ;;  %v5322_v53 = vmul.f32 0.00390625, %v569_v42  ;;  %v848_v26 = vmul.f32 %v5271_v31, %v847_v48  ;;  %v745_v54 = vsub.f32 %v669_v15, %v4999_v22 }
 0x1e1   :  { %v1357_v35 = vadd.f32 %v5253_v46, %v1315_v30  ;;  %8222 = vst [vmem:[#allocation83_spill] sm:$0xff] %v5299_v32  ;;  %v841_v7 = vmul.f32 %v5116_v63, %v840_v45  ;;  %v1041_v55 = vmul.f32 %v5135_v61, %v1040_v52  ;;  %v857_v23 = vmul.f32 %v5303_v56, %v5214_v44  ;;  %v8225_v45 = vld [vmem:[#allocation69_spill] sm:$0xff]  ;;  %v8249_v44 = vld [vmem:[#allocation6_spill] sm:$0xff] }
 0x1e2   :  { %8224 = vst [vmem:[#allocation98_spill] sm:$0xff] %v5322_v53  ;;  %3290 = vrsqrt.f32 %v5305_v4  ;;  %v784_v42 = vmax.f32 %v746_v18, 0.0  ;;  %v651_v29 = vmul.f32 0.00390625, %v613_v12  ;;  %v1047_v58 = vmul.f32 %v5320_v9, %v5241_v6 }
 0x1e3   :  { %v1395_v30 = vmax.f32 %v1357_v35, 0.0  ;;  %v507_v35 = vpop.xlane.xlu2 %506  ;;  %3292 = vrsqrt.f32 %v5313_v13  ;;  %v5339_v22 = vadd.f32 1e-05, %v763_v40  ;;  %v845_v0 = vsel %vm844_vm7, %v5116_v63, %v841_v7 }
 0x1e4   :  { %v849_v48 = vmul.f32 0.5, %v848_v26  ;;  %v783_v15 = vmax.f32 %v745_v54, 0.0  ;;  %v8226_v52 = vsub.f32 %v3907_v36, %v8225_v45  ;;  %v1045_v18 = vsel %vm1044_vm8, %v5135_v61, %v1041_v55  ;;  %v469_v54 = vpop.xlane.xlu0 %468 }
 0x1e5   :  { %1848 = vmatmul.f32.vlgmr.msra.gmra.mxu3 %v1395_v30  ;;  %v633_v12 = vadd.f32 %v507_v35, %v8227_v50  ;;  %v5355_v40 = vmul.f32 %v5125_v39, %v5125_v39  ;;  %v5359_v63 = vmul.f32 %v5149_v25, %v5149_v25  ;;  %v5361_v26 = vadd.f32 1e-05, %v784_v42  ;;  %v8229_v50 = vld [vmem:[#allocation7_spill] sm:$0xff]  ;;  %v471_v39 = vpop.xlane.xlu1 %470 }
 0x1e6   :  { %v1452_v30 = vmul.f32 %v8226_v52, %v845_v0  ;;  %v727_v36 = vsub.f32 %v651_v29, %v4676_v37  ;;  %v5367_v7 = vmul.f32 %v5102_v62, %v5102_v62  ;;  %v1048_v55 = vmul.f32 %v5320_v9, %v1047_v58  ;;  %v8232_v25 = vld [vmem:[#allocation103_spill] sm:$0xff] }
 0x1e7   :  { %v8228_v35 = vsub.f32 %v8134_v16, %v4834_v14  ;;  %v8230_v32 = vsub.f32 %v8229_v50, %v8225_v45  ;;  %v5378_v37 = vmul.f32 %v5212_v1, %v5212_v1  ;;  %v850_v62 = vsub.f32 1.5, %v849_v48 }
 0x1e8   :  { %v1494_v61 = vmul.f32 %v5196_v20, %v1452_v30  ;;  %v5380_v29 = vpop.eup %3290  ;;  %v858_v30 = vmul.f32 %v5303_v56, %v857_v23  ;;  %3294 = vrsqrt.f32 %v5339_v22  ;;  %v5384_v58 = vadd.f32 1e-05, %v783_v15 }
 0x1e9   :  { %v1472_v52 = vmul.f32 %v8228_v35, %v1045_v18  ;;  %v1254_v42 = vmul.f32 %v8230_v32, %v845_v0  ;;  %8231 = vst [vmem:[#allocation104_spill] sm:$0xff] %v5378_v37  ;;  %v5386_v16 = vpop.eup %3292  ;;  %v671_v35 = vmul.f32 0.00390625, %v633_v12  ;;  %v614_v45 = vadd.f32 %v469_v54, %v8232_v25 }
 0x1ea   :  { %v1536_v32 = vadd.f32 %v5223_v10, %v1494_v61  ;;  %3296 = vrsqrt.f32 %v5361_v26  ;;  %v765_v50 = vmax.f32 %v727_v36, 0.0  ;;  %v8233_v48 = vsub.f32 %v4897_v51, %v4834_v14 }
 0x1eb   :  { %v1514_v0 = vmul.f32 %v5196_v20, %v1472_v52  ;;  %v1296_v23 = vmul.f32 %v5228_v34, %v1254_v42  ;;  %v1049_v1 = vmul.f32 0.5, %v1048_v55  ;;  %v615_v24 = vadd.f32 %v471_v39, %v8234_v47 }
 0x1ec   :  { %v1274_v15 = vmul.f32 %v8233_v48, %v1045_v18  ;;  %v1574_v43 = vmax.f32 %v1536_v32, 0.0  ;;  %v877_v25 = vmul.f32 %v5380_v29, %v5305_v4  ;;  %3298 = vrsqrt.f32 %v5384_v58 }
 0x1ed   :  { %v1556_v12 = vadd.f32 %v5223_v10, %v1514_v0  ;;  %v1338_v54 = vadd.f32 %v5253_v46, %v1296_v23  ;;  %v1057_v61 = vmul.f32 %v5386_v16, %v5313_v13  ;;  %v747_v14 = vsub.f32 %v671_v35, %v5064_v33 }
 0x1ee   :  { %v1316_v36 = vmul.f32 %v5228_v34, %v1274_v15  ;;  %v652_v51 = vmul.f32 0.00390625, %v614_v45  ;;  %1660 = vmatmul.f32.vlgmr.msra.gmra.mxu0 %v1574_v43  ;;  %v5406_v39 = vpop.eup %3294  ;;  %v5408_v18 = vadd.f32 1e-05, %v765_v50  ;;  %v851_v42 = vmul.f32 %v5271_v31, %v850_v62 }
 0x1ef   :  { %v1594_v47 = vmax.f32 %v1556_v12, 0.0  ;;  %v1376_v55 = vmax.f32 %v1338_v54, 0.0  ;;  %v1050_v32 = vsub.f32 1.5, %v1049_v1  ;;  %v653_v0 = vmul.f32 0.00390625, %v615_v24  ;;  %v509_v1 = vpop.xlane.xlu2 %508 }
 0x1f0   :  { %v1358_v52 = vadd.f32 %v5253_v46, %v1316_v36  ;;  %v5415_v33 = vmul.f32 %v5216_v59, %v5216_v59  ;;  %v5417_v43 = vpop.eup %3296  ;;  %v5419_v35 = vmul.f32 0.5, %v858_v30  ;;  %v878_v45 = vmul.f32 %v5380_v29, %v877_v25  ;;  %v8281_v59 = vld [vmem:[#allocation111_spill] sm:$0xff] }
 0x1f1   :  { %1720 = vmatmul.f32.gmra.mxu2 %v1594_v47  ;;  %1791 = vmatmul.f32.vlgmr.msra.gmra.mxu1 %v1376_v55  ;;  %vm853_vm10 = vweird.f32 %v5271_v31  ;;  %v785_v62 = vmax.f32 %v747_v14, 0.0  ;;  %v728_v28 = vsub.f32 %v652_v51, %v4680_v57  ;;  %v5426_v24 = vmul.f32 %v5186_v49, %v5186_v49  ;;  %v473_v14 = vpop.xlane.xlu0 %472 }
 0x1f2   :  { %v1396_v50 = vmax.f32 %v1358_v52, 0.0  ;;  %vm854_vm11 = vmor %vm852_vm9, %vm853_vm10  ;;  %v5430_v23 = vmul.f32 %v5322_v53, %v5322_v53  ;;  %v5432_v30 = vpop.eup %3298  ;;  %v1058_v48 = vmul.f32 %v5386_v16, %v1057_v61  ;;  %v867_v15 = vmul.f32 %v5406_v39, %v5339_v22 }
 0x1f3   :  { %8235 = vst [vmem:[#allocation69_spill] sm:$0xff] %v5426_v24  ;;  %3300 = vrsqrt.f32 %v5408_v18  ;;  %v855_v57 = vsel %vm854_vm11, %v5271_v31, %v851_v42  ;;  %v1077_v12 = vmul.f32 %v5417_v43, %v5361_v26  ;;  %v729_v25 = vsub.f32 %v653_v0, %v4710_v19  ;;  %v8282_v24 = vld [vmem:[#allocation29_spill] sm:$0xff] }
 0x1f4   :  { %8236 = vst [vmem:[#allocation43_spill] sm:$0xff] %v5430_v23  ;;  %1851 = vmatmul.f32.gmra.mxu3 %v1396_v50  ;;  %v1051_v54 = vmul.f32 %v5320_v9, %v1050_v32  ;;  %v860_v36 = vsub.f32 1.5, %v5419_v35  ;;  %v5445_v61 = vmul.f32 0.5, %v878_v45  ;;  %v8237_v51 = vsub.f32 %v3935_v41, %v4558_v60  ;;  %v8239_v35 = vld [vmem:[#allocation71_spill] sm:$0xff] }
 0x1f5   :  { %vm1053_vm13 = vweird.f32 %v5320_v9  ;;  %v1067_v31 = vmul.f32 %v5432_v30, %v5384_v58  ;;  %v5453_v55 = vadd.f32 1e-05, %v785_v62  ;;  %v766_v52 = vmax.f32 %v728_v28, 0.0  ;;  %v475_v62 = vpop.xlane.xlu1 %474 }
 0x1f6   :  { %v1453_v47 = vmul.f32 %v8237_v51, %v855_v57  ;;  %v8238_v19 = vsub.f32 %v8080_v2, %v4558_v60  ;;  %v1059_v32 = vmul.f32 0.5, %v1058_v48  ;;  %v868_v0 = vmul.f32 %v5406_v39, %v867_v15  ;;  %vm1054_vm14 = vmor %vm1052_vm12, %vm1053_vm13  ;;  %v8240_v2 = vld [vmem:[#allocation106_spill] sm:$0xff] }
 0x1f7   :  { %v634_v45 = vadd.f32 %v509_v1, %v8239_v35  ;;  %v1078_v50 = vmul.f32 %v5417_v43, %v1077_v12  ;;  %v767_v51 = vmax.f32 %v729_v25, 0.0  ;;  %v1055_v28 = vsel %vm1054_vm14, %v5320_v9, %v1051_v54 }
 0x1f8   :  { %v1255_v42 = vmul.f32 %v8238_v19, %v855_v57  ;;  %v1495_v41 = vmul.f32 %v5196_v20, %v1453_v47  ;;  %v616_v48 = vadd.f32 %v473_v14, %v8240_v2  ;;  %v8241_v6 = vsub.f32 %v8132_v27, %v4832_v21 }
 0x1f9   :  { %v5466_v60 = vpop.eup %3300  ;;  %v8242_v57 = vsub.f32 %v4883_v5, %v4832_v21  ;;  %v1068_v9 = vmul.f32 %v5432_v30, %v1067_v31  ;;  %3302 = vrsqrt.f32 %v5453_v55  ;;  %v5479_v25 = vadd.f32 1e-05, %v766_v52  ;;  %v479_v31 = vpop.xlane.xlu2 %478 }
 0x1fa   :  { %v1297_v53 = vmul.f32 %v5228_v34, %v1255_v42  ;;  %v1537_v1 = vadd.f32 %v5223_v10, %v1495_v41  ;;  %v1473_v15 = vmul.f32 %v8241_v6, %v1055_v28  ;;  %v1060_v47 = vsub.f32 1.5, %v1059_v32 }
 0x1fb   :  { %v1275_v12 = vmul.f32 %v8242_v57, %v1055_v28  ;;  %v5484_v27 = vmul.f32 0.5, %v868_v0  ;;  %v887_v21 = vmul.f32 %v5466_v60, %v5408_v18  ;;  %v672_v5 = vmul.f32 0.00390625, %v634_v45  ;;  %v8243_v28 = vld [vmem:[#allocation107_spill] sm:$0xff]  ;;  %v477_v57 = vpop.xlane.xlu0 %476 }
 0x1fc   :  { %v1339_v54 = vadd.f32 %v5253_v46, %v1297_v53  ;;  %v1575_v14 = vmax.f32 %v1537_v1, 0.0  ;;  %v1515_v19 = vmul.f32 %v5196_v20, %v1473_v15  ;;  %v654_v41 = vmul.f32 0.00390625, %v616_v48  ;;  %v8244_v15 = vld [vmem:[#allocation109_spill] sm:$0xff] }
 0x1fd   :  { %v1317_v42 = vmul.f32 %v5228_v34, %v1275_v12  ;;  %v617_v52 = vadd.f32 %v475_v62, %v8243_v28  ;;  %v5491_v2 = vmul.f32 0.5, %v1078_v50  ;;  %v5493_v1 = vmul.f32 0.5, %v1068_v9  ;;  %v511_v28 = vpop.xlane.xlu1 %510  ;;  %v8260_v50 = vld [vmem:[#allocation108_spill] sm:$0xff] }
 0x1fe   :  { %v1377_v35 = vmax.f32 %v1339_v54, 0.0  ;;  %1663 = vmatmul.f32.gmra.mxu0 %v1575_v14  ;;  %v1557_v53 = vadd.f32 %v5223_v10, %v1515_v19  ;;  %3304 = vrsqrt.f32 %v5479_v25  ;;  %v5496_v0 = vadd.f32 1e-05, %v767_v51  ;;  %v8252_v54 = vld [vmem:[#allocation23_spill] sm:$0xff] }
 0x1ff   :  { %v1359_v32 = vadd.f32 %v5253_v46, %v1317_v42  ;;  %v619_v48 = vadd.f32 %v479_v31, %v8244_v15  ;;  %v861_v62 = vmul.f32 %v5303_v56, %v860_v36  ;;  %v5500_v12 = vpop.eup %3302  ;;  %vm1062_vm0 = vweird.f32 %v5313_v13  ;;  %v8251_v36 = vld [vmem:[#allocation53_spill] sm:$0xff] }
 0x200   :  { %1794 = vmatmul.f32.gmra.mxu1 %v1377_v35  ;;  %v1595_v45 = vmax.f32 %v1557_v53, 0.0  ;;  %v748_v9 = vsub.f32 %v672_v5, %v5068_v3  ;;  %v888_v51 = vmul.f32 %v5466_v60, %v887_v21  ;;  %v730_v14 = vsub.f32 %v654_v41, %v4718_v11  ;;  %v8245_v35 = vld [vmem:[#allocation105_spill] sm:$0xff] }
 0x201   :  { %v1397_v6 = vmax.f32 %v1359_v32, 0.0  ;;  %v655_v19 = vmul.f32 0.00390625, %v617_v52  ;;  %vm863_vm1 = vweird.f32 %v5303_v56  ;;  %v618_v31 = vadd.f32 %v477_v57, %v8245_v35  ;;  %v8246_v53 = vld [vmem:[#allocation17_spill] sm:$0xff]  ;;  %v8247_v32 = vld [vmem:[#allocation28_spill] sm:$0xff] }
 0x202   :  { %1723 = vmatmul.f32.gmra.mxu2 %v1595_v45  ;;  %vm864_vm2 = vmor %vm862_vm15, %vm863_vm1  ;;  %v1061_v3 = vmul.f32 %v5386_v16, %v1060_v47  ;;  %v1087_v11 = vmul.f32 %v5500_v12, %v5453_v55  ;;  %3306 = vrsqrt.f32 %v5496_v0  ;;  %v657_v21 = vmul.f32 0.00390625, %v619_v48 }
 0x203   :  { %1854 = vmatmul.f32.gmra.mxu3 %v1397_v6  ;;  %v865_v5 = vsel %vm864_vm2, %v5303_v56, %v861_v62  ;;  %v786_v52 = vmax.f32 %v748_v9, 0.0  ;;  %v8248_v45 = vsub.f32 %v8246_v53, %v8247_v32  ;;  %vm1063_vm3 = vweird.f32 %v5386_v16 }
 0x204   :  { %v5519_v41 = vpop.eup %3304  ;;  %v8250_v47 = vsub.f32 %v8249_v44, %v8247_v32  ;;  %v5528_v57 = vmul.f32 0.5, %v888_v51  ;;  %v768_v35 = vmax.f32 %v730_v14, 0.0  ;;  %v731_v48 = vsub.f32 %v655_v19, %v8251_v36  ;;  %vm1064_vm4 = vmor %vm1062_vm0, %vm1063_vm3  ;;  %v8254_v32 = vld [vmem:[#allocation87_spill] sm:$0xff]  ;;  %v8255_v19 = vld [vmem:[#allocation48_spill] sm:$0xff] }
 0x205   :  { %v1454_v6 = vmul.f32 %v8248_v45, %v865_v5  ;;  %v635_v56 = vadd.f32 %v511_v28, %v8252_v54  ;;  %v656_v62 = vmul.f32 0.00390625, %v618_v31  ;;  %v1065_v53 = vsel %vm1064_vm4, %v5386_v16, %v1061_v3  ;;  %v8257_v28 = vld [vmem:[#allocation86_spill] sm:$0xff] }
 0x206   :  { %v1256_v15 = vmul.f32 %v8250_v47, %v865_v5  ;;  %vm872_vm5 = vweird.f32 %v5339_v22  ;;  %v1088_v51 = vmul.f32 %v5500_v12, %v1087_v11  ;;  %v8253_v5 = vld [vmem:[#allocation62_spill] sm:$0xff]  ;;  %v8256_v36 = vsub.f32 %v8254_v32, %v8255_v19  ;;  %v483_v11 = vpop.xlane.xlu2 %482  ;;  %v8259_v32 = vld [vmem:[#allocation123_spill] sm:$0xff] }
 0x207   :  { %v1496_v9 = vmul.f32 %v5196_v20, %v1454_v6  ;;  %v733_v14 = vsub.f32 %v657_v21, %v8253_v5  ;;  %v8258_v13 = vsub.f32 %v8257_v28, %v8255_v19  ;;  %v897_v6 = vmul.f32 %v5519_v41, %v5479_v25 }
 0x208   :  { %v1298_v45 = vmul.f32 %v5228_v34, %v1256_v15  ;;  %v1474_v54 = vmul.f32 %v8256_v36, %v1065_v53  ;;  %v5548_v16 = vadd.f32 1e-05, %v786_v52  ;;  %v5552_v47 = vpop.eup %3306  ;;  %vm1072_vm6 = vweird.f32 %v5384_v58  ;;  %v8273_v58 = vld [vmem:[#allocation55_spill] sm:$0xff] }
 0x209   :  { %v1276_v31 = vmul.f32 %v8258_v13, %v1065_v53  ;;  %v1538_v3 = vadd.f32 %v5223_v10, %v1496_v9  ;;  %v5555_v21 = vadd.f32 1e-05, %v768_v35  ;;  %v769_v15 = vmax.f32 %v731_v48, 0.0  ;;  %v481_v9 = vpop.xlane.xlu0 %480 }
 0x20a   :  { %v1340_v44 = vadd.f32 %v5253_v46, %v1298_v45  ;;  %v1516_v5 = vmul.f32 %v5196_v20, %v1474_v54  ;;  %v732_v19 = vsub.f32 %v656_v62, %v8259_v32  ;;  %v673_v52 = vmul.f32 0.00390625, %v635_v56 }
 0x20b   :  { %v1318_v53 = vmul.f32 %v5228_v34, %v1276_v31  ;;  %v1576_v36 = vmax.f32 %v1538_v3, 0.0  ;;  %v771_v13 = vmax.f32 %v733_v14, 0.0  ;;  %v621_v49 = vadd.f32 %v483_v11, %v8260_v50  ;;  %v8261_v14 = vld [vmem:[#allocation110_spill] sm:$0xff]  ;;  %v513_v3 = vpop.xlane.xlu1 %512 }
 0x20c   :  { %v1378_v28 = vmax.f32 %v1340_v44, 0.0  ;;  %v1558_v45 = vadd.f32 %v5223_v10, %v1516_v5  ;;  %v5563_v35 = vmul.f32 0.5, %v1088_v51  ;;  %v898_v48 = vmul.f32 %v5519_v41, %v897_v6 }
 0x20d   :  { %v1360_v42 = vadd.f32 %v5253_v46, %v1318_v53  ;;  %v907_v54 = vmul.f32 %v5552_v47, %v5496_v0  ;;  %3308 = vrsqrt.f32 %v5548_v16  ;;  %1666 = vmatmul.f32.gmra.mxu0 %v1576_v36  ;;  %v620_v31 = vadd.f32 %v481_v9, %v8261_v14  ;;  %v8264_v53 = vld [vmem:[#allocation91_spill] sm:$0xff]  ;;  %v8265_v9 = vld [vmem:[#allocation70_spill] sm:$0xff] }
 0x20e   :  { %1797 = vmatmul.f32.gmra.mxu1 %v1378_v28  ;;  %v1596_v56 = vmax.f32 %v1558_v45, 0.0  ;;  %v8262_v44 = vsub.f32 1.5, %v5484_v27  ;;  %3310 = vrsqrt.f32 %v5555_v21  ;;  %v5575_v6 = vadd.f32 1e-05, %v769_v15 }
 0x20f   :  { %v1398_v62 = vmax.f32 %v1360_v42, 0.0  ;;  %v770_v11 = vmax.f32 %v732_v19, 0.0  ;;  %v5577_v5 = vadd.f32 1e-05, %v771_v13  ;;  %v749_v32 = vsub.f32 %v673_v52, %v8264_v53 }
 0x210   :  { %v871_v50 = vmul.f32 %v5406_v39, %v8262_v44  ;;  %1726 = vmatmul.f32.gmra.mxu2 %v1596_v56  ;;  %v659_v42 = vmul.f32 0.00390625, %v621_v49  ;;  %vm873_vm7 = vweird.f32 %v5406_v39  ;;  %v5582_v36 = vmul.f32 0.5, %v898_v48  ;;  %v8268_v56 = vld [vmem:[#allocation76_spill] sm:$0xff] }
 0x211   :  { %8263 = vst [vmem:[#allocation7_spill] sm:$0xff] %v5577_v5  ;;  %1857 = vmatmul.f32.gmra.mxu3 %v1398_v62  ;;  %v908_v28 = vmul.f32 %v5552_v47, %v907_v54  ;;  %v636_v45 = vadd.f32 %v513_v3, %v8265_v9  ;;  %vm874_vm8 = vmor %vm872_vm5, %vm873_vm7  ;;  %v658_v15 = vmul.f32 0.00390625, %v620_v31  ;;  %v8266_v52 = vsub.f32 1.5, %v5493_v1  ;;  %v8267_v54 = vld [vmem:[#allocation16_spill] sm:$0xff]  ;;  %v8272_v3 = vld [vmem:[#allocation49_spill] sm:$0xff]  ;;  %v485_v51 = vpop.xlane.xlu0 %484 }
 0x212   :  { %v875_v19 = vsel %vm874_vm8, %v5406_v39, %v871_v50  ;;  %vm1073_vm9 = vweird.f32 %v5432_v30  ;;  %3312 = vrsqrt.f32 %v5575_v6  ;;  %v5596_v48 = vadd.f32 1e-05, %v770_v11  ;;  %v8270_v39 = vld [vmem:[#allocation9_spill] sm:$0xff]  ;;  %v487_v11 = vpop.xlane.xlu2 %486 }
 0x213   :  { %v1071_v49 = vmul.f32 %v5432_v30, %v8266_v52  ;;  %v5593_v13 = vpop.eup %3308  ;;  %v8269_v62 = vsub.f32 %v8267_v54, %v8268_v56  ;;  %vm1074_vm10 = vmor %vm1072_vm6, %vm1073_vm9  ;;  %v8271_v1 = vsub.f32 %v8270_v39, %v8268_v56  ;;  %3314 = vrsqrt.f32 %v5577_v5  ;;  %v8274_v52 = vld [vmem:[#allocation114_spill] sm:$0xff] }
 0x214   :  { %v787_v31 = vmax.f32 %v749_v32, 0.0  ;;  %v735_v44 = vsub.f32 %v659_v42, %v8272_v3  ;;  %v5609_v53 = vpop.eup %3310  ;;  %vm882_vm11 = vweird.f32 %v5305_v4  ;;  %v8275_v54 = vsub.f32 %v8273_v58, %v8274_v52  ;;  %v8276_v56 = vld [vmem:[#allocation66_spill] sm:$0xff] }
 0x215   :  { %v1455_v22 = vmul.f32 %v8269_v62, %v875_v19  ;;  %v1257_v14 = vmul.f32 %v8271_v1, %v875_v19  ;;  %v1075_v50 = vsel %vm1074_vm10, %v5432_v30, %v1071_v49  ;;  %v8277_v32 = vsub.f32 %v8276_v56, %v8274_v52  ;;  %v8278_v49 = vld [vmem:[#allocation60_spill] sm:$0xff] }
 0x216   :  { %v1475_v62 = vmul.f32 %v8275_v54, %v1075_v50  ;;  %v5620_v42 = vmul.f32 0.5, %v908_v28  ;;  %v1097_v30 = vmul.f32 %v5593_v13, %v5548_v16  ;;  %v734_v1 = vsub.f32 %v658_v15, %v8278_v49  ;;  %v8279_v54 = vld [vmem:[#allocation112_spill] sm:$0xff]  ;;  %v515_v15 = vpop.xlane.xlu1 %514 }
 0x217   :  { %v1497_v9 = vmul.f32 %v5196_v20, %v1455_v22  ;;  %v1299_v19 = vmul.f32 %v5228_v34, %v1257_v14  ;;  %v1277_v39 = vmul.f32 %v8277_v32, %v1075_v50  ;;  %v674_v3 = vmul.f32 0.00390625, %v636_v45 }
 0x218   :  { %v1517_v27 = vmul.f32 %v5196_v20, %v1475_v62  ;;  %v623_v14 = vadd.f32 %v487_v11, %v8279_v54  ;;  %vm1082_vm12 = vweird.f32 %v5361_v26  ;;  %v917_v28 = vmul.f32 %v5609_v53, %v5555_v21 }
 0x219   :  { %v1539_v22 = vadd.f32 %v5223_v10, %v1497_v9  ;;  %v1341_v58 = vadd.f32 %v5253_v46, %v1299_v19  ;;  %3316 = vrsqrt.f32 %v5596_v48  ;;  %v5633_v50 = vadd.f32 1e-05, %v787_v31  ;;  %v5636_v9 = vpop.eup %3312 }
 0x21a   :  { %v1319_v45 = vmul.f32 %v5228_v34, %v1277_v39  ;;  %v773_v52 = vmax.f32 %v735_v44, 0.0  ;;  %v1559_v19 = vadd.f32 %v5223_v10, %v1517_v27  ;;  %v5639_v56 = vpop.eup %3314  ;;  %v772_v32 = vmax.f32 %v734_v1, 0.0 }
 0x21b   :  { %v1577_v62 = vmax.f32 %v1539_v22, 0.0  ;;  %v1379_v11 = vmax.f32 %v1341_v58, 0.0  ;;  %8280 = vst [vmem:[#allocation103_spill] sm:$0xff] %v5639_v56  ;;  %v750_v49 = vsub.f32 %v674_v3, %v5311_v38  ;;  %v622_v31 = vadd.f32 %v485_v51, %v8281_v59 }
 0x21c   :  { %v1361_v54 = vadd.f32 %v5253_v46, %v1319_v45  ;;  %v1597_v23 = vmax.f32 %v1559_v19, 0.0  ;;  %v661_v39 = vmul.f32 0.00390625, %v623_v14  ;;  %v637_v37 = vadd.f32 %v515_v15, %v8282_v24  ;;  %v8285_v45 = vld [vmem:[#allocation85_spill] sm:$0xff]  ;;  %v8286_v19 = vld [vmem:[#allocation20_spill] sm:$0xff] }
 0x21d   :  { %1669 = vmatmul.f32.gmra.mxu0 %v1577_v62  ;;  %1800 = vmatmul.f32.gmra.mxu1 %v1379_v11  ;;  %v8283_v44 = vsub.f32 1.5, %v5445_v61  ;;  %v1098_v38 = vmul.f32 %v5593_v13, %v1097_v30  ;;  %v927_v59 = vmul.f32 %v5636_v9, %v5575_v6  ;;  %v947_v51 = vmul.f32 %v5639_v56, %v5577_v5  ;;  %v8287_v11 = vld [vmem:[#allocation41_spill] sm:$0xff] }
 0x21e   :  { %v1399_v3 = vmax.f32 %v1361_v54, 0.0  ;;  %v5655_v58 = vadd.f32 1e-05, %v773_v52  ;;  %1729 = vmatmul.f32.gmra.mxu2 %v1597_v23  ;;  %vm883_vm13 = vweird.f32 %v5380_v29  ;;  %v918_v61 = vmul.f32 %v5609_v53, %v917_v28 }
 0x21f   :  { %v881_v27 = vmul.f32 %v5380_v29, %v8283_v44  ;;  %v5658_v24 = vpop.eup %3316  ;;  %3318 = vrsqrt.f32 %v5633_v50  ;;  %v5662_v14 = vadd.f32 1e-05, %v772_v32  ;;  %v788_v30 = vmax.f32 %v750_v49, 0.0  ;;  %vm884_vm14 = vmor %vm882_vm11, %vm883_vm13  ;;  %v8290_v49 = vld [vmem:[#allocation5_spill] sm:$0xff] }
 0x220   :  { %8284 = vst [vmem:[#allocation102_spill] sm:$0xff] %v5655_v58  ;;  %1860 = vmatmul.f32.gmra.mxu3 %v1399_v3  ;;  %v737_v15 = vsub.f32 %v661_v39, %v8285_v45  ;;  %v660_v52 = vmul.f32 0.00390625, %v622_v31  ;;  %v675_v62 = vmul.f32 0.00390625, %v637_v37  ;;  %v8288_v54 = vsub.f32 %v8286_v19, %v8287_v11  ;;  %v491_v45 = vpop.xlane.xlu2 %490 }
 0x221   :  { %v885_v23 = vsel %vm884_vm14, %v5380_v29, %v881_v27  ;;  %v8289_v28 = vsub.f32 1.5, %v5491_v2  ;;  %vm1083_vm15 = vweird.f32 %v5417_v43  ;;  %v8291_v4 = vsub.f32 %v8290_v49, %v8287_v11  ;;  %v8293_v11 = vld [vmem:[#allocation54_spill] sm:$0xff] }
 0x222   :  { %v1456_v44 = vmul.f32 %v8288_v54, %v885_v23  ;;  %v928_v39 = vmul.f32 %v5636_v9, %v927_v59  ;;  %v948_v37 = vmul.f32 %v5639_v56, %v947_v51  ;;  %v937_v29 = vmul.f32 %v5658_v24, %v5596_v48  ;;  %vm1084_vm0 = vmor %vm1082_vm12, %vm1083_vm15  ;;  %v517_v59 = vpop.xlane.xlu0 %516  ;;  %v8294_v54 = vld [vmem:[#allocation61_spill] sm:$0xff]  ;;  %v8296_v49 = vld [vmem:[#allocation74_spill] sm:$0xff] }
 0x223   :  { %v1081_v32 = vmul.f32 %v5417_v43, %v8289_v28  ;;  %v1258_v3 = vmul.f32 %v8291_v4, %v885_v23  ;;  %3320 = vrsqrt.f32 %v5655_v58  ;;  %vm892_vm1 = vweird.f32 %v5408_v18  ;;  %v8292_v23 = vld [vmem:[#allocation50_spill] sm:$0xff]  ;;  %v8300_v56 = vld [vmem:[#allocation65_spill] sm:$0xff] }
 0x224   :  { %3322 = vrsqrt.f32 %v5662_v14  ;;  %v1498_v2 = vmul.f32 %v5196_v20, %v1456_v44  ;;  %v5690_v51 = vadd.f32 1e-05, %v788_v30  ;;  %v736_v19 = vsub.f32 %v660_v52, %v8292_v23  ;;  %v8303_v18 = vld [vmem:[#allocation21_spill] sm:$0xff] }
 0x225   :  { %v1085_v31 = vsel %vm1084_vm0, %v5417_v43, %v1081_v32  ;;  %v1300_v27 = vmul.f32 %v5228_v34, %v1258_v3  ;;  %v8295_v26 = vsub.f32 %v8293_v11, %v8294_v54  ;;  %v8297_v4 = vsub.f32 %v8296_v49, %v8294_v54  ;;  %v5699_v1 = vpop.eup %3318 }
 0x226   :  { %v775_v43 = vmax.f32 %v737_v15, 0.0  ;;  %v751_v32 = vsub.f32 %v675_v62, %v5318_v17  ;;  %v1540_v3 = vadd.f32 %v5223_v10, %v1498_v2  ;;  %v5704_v22 = vmul.f32 0.5, %v1098_v38 }
 0x227   :  { %v1476_v28 = vmul.f32 %v8295_v26, %v1085_v31  ;;  %v1278_v44 = vmul.f32 %v8297_v4, %v1085_v31  ;;  %v1342_v30 = vadd.f32 %v5253_v46, %v1300_v27  ;;  %v5706_v52 = vmul.f32 0.5, %v918_v61 }
 0x228   :  { %vm1092_vm2 = vweird.f32 %v5453_v55  ;;  %v5711_v31 = vmul.f32 0.5, %v928_v39  ;;  %v938_v15 = vmul.f32 %v5658_v24, %v937_v29  ;;  %v1578_v54 = vmax.f32 %v1540_v3, 0.0 }
 0x229   :  { %v1518_v23 = vmul.f32 %v5196_v20, %v1476_v28  ;;  %v1320_v11 = vmul.f32 %v5228_v34, %v1278_v44  ;;  %v1380_v17 = vmax.f32 %v1342_v30, 0.0  ;;  %v5714_v62 = vpop.eup %3320  ;;  %v1107_v38 = vmul.f32 %v5699_v1, %v5633_v50  ;;  %v8298_v44 = vld [vmem:[#allocation35_spill] sm:$0xff] }
 0x22a   :  { %v774_v2 = vmax.f32 %v736_v19, 0.0  ;;  %v5720_v26 = vpop.eup %3322  ;;  %v5722_v28 = vmul.f32 0.5, %v948_v37  ;;  %3324 = vrsqrt.f32 %v5690_v51  ;;  %v5725_v39 = vadd.f32 1e-05, %v775_v43  ;;  %1672 = vmatmul.f32.gmra.mxu0 %v1578_v54  ;;  %v8307_v37 = vld [vmem:[#allocation59_spill] sm:$0xff] }
 0x22b   :  { %v1560_v61 = vadd.f32 %v5223_v10, %v1518_v23  ;;  %v1362_v27 = vadd.f32 %v5253_v46, %v1320_v11  ;;  %v789_v29 = vmax.f32 %v751_v32, 0.0  ;;  %1803 = vmatmul.f32.gmra.mxu1 %v1380_v17  ;;  %v638_v3 = vadd.f32 %v517_v59, %v8298_v44  ;;  %v8302_v44 = vld [vmem:[#allocation19_spill] sm:$0xff] }
 0x22c   :  { %v8299_v19 = vsub.f32 1.5, %v5528_v57  ;;  %v625_v43 = vadd.f32 %v491_v45, %v8300_v56  ;;  %v5735_v5 = vmul.f32 0.5, %v938_v15  ;;  %v5738_v32 = vmul.f32 %v5699_v1, %v1107_v38  ;;  %v489_v57 = vpop.xlane.xlu1 %488  ;;  %v521_v15 = vpop.xlane.xlu2 %520 }
 0x22d   :  { %v1598_v49 = vmax.f32 %v1560_v61, 0.0  ;;  %v1400_v4 = vmax.f32 %v1362_v27, 0.0  ;;  %v5740_v54 = vadd.f32 1e-05, %v774_v2  ;;  %vm893_vm3 = vweird.f32 %v5466_v60  ;;  %v519_v38 = vpop.xlane.xlu0 %518 }
 0x22e   :  { %v891_v30 = vmul.f32 %v5466_v60, %v8299_v19  ;;  %v967_v17 = vmul.f32 %v5714_v62, %v5655_v58  ;;  %v5746_v61 = vadd.f32 1e-05, %v789_v29  ;;  %vm894_vm4 = vmor %vm892_vm1, %vm893_vm3  ;;  %v8301_v56 = vsub.f32 1.5, %v5563_v35  ;;  %v8305_v35 = vld [vmem:[#allocation8_spill] sm:$0xff] }
 0x22f   :  { %1732 = vmatmul.f32.gmra.mxu2 %v1598_v49  ;;  %1863 = vmatmul.f32.gmra.mxu3 %v1400_v4  ;;  %v957_v2 = vmul.f32 %v5720_v26, %v5662_v14  ;;  %3326 = vrsqrt.f32 %v5725_v39  ;;  %v676_v27 = vmul.f32 0.00390625, %v638_v3  ;;  %v663_v29 = vmul.f32 0.00390625, %v625_v43 }
 0x230   :  { %v1091_v45 = vmul.f32 %v5500_v12, %v8301_v56  ;;  %v895_v49 = vsel %vm894_vm4, %v5466_v60, %v891_v30  ;;  %v5757_v4 = vpop.eup %3324  ;;  %v8304_v19 = vsub.f32 %v8302_v44, %v8303_v18  ;;  %vm1093_vm5 = vweird.f32 %v5500_v12  ;;  %v8308_v60 = vld [vmem:[#allocation47_spill] sm:$0xff]  ;;  %v8309_v30 = vld [vmem:[#allocation22_spill] sm:$0xff] }
 0x231   :  { %v8306_v56 = vsub.f32 %v8305_v35, %v8303_v18  ;;  %3328 = vrsqrt.f32 %v5740_v54  ;;  %v624_v23 = vadd.f32 %v489_v57, %v8307_v37  ;;  %vm1094_vm6 = vmor %vm1092_vm2, %vm1093_vm5  ;;  %v640_v3 = vadd.f32 %v521_v15, %v8308_v60  ;;  %v8310_v37 = vld [vmem:[#allocation115_spill] sm:$0xff]  ;;  %v8311_v57 = vld [vmem:[#allocation128_spill] sm:$0xff] }
 0x232   :  { %v1457_v59 = vmul.f32 %v8304_v19, %v895_v49  ;;  %v639_v43 = vadd.f32 %v519_v38, %v8309_v30  ;;  %3330 = vrsqrt.f32 %v5746_v61  ;;  %v1095_v19 = vsel %vm1094_vm6, %v5500_v12, %v1091_v45  ;;  %v8315_v30 = vld [vmem:[#allocation133_spill] sm:$0xff] }
 0x233   :  { %v1259_v11 = vmul.f32 %v8306_v56, %v895_v49  ;;  %vm902_vm7 = vweird.f32 %v5479_v25  ;;  %v752_v49 = vsub.f32 %v676_v27, %v5351_v8  ;;  %v8312_v55 = vsub.f32 %v8310_v37, %v8311_v57  ;;  %v8313_v56 = vld [vmem:[#allocation73_spill] sm:$0xff] }
 0x234   :  { %v1499_v44 = vmul.f32 %v5196_v20, %v1457_v59  ;;  %v8314_v15 = vsub.f32 %v8313_v56, %v8311_v57  ;;  %v678_v60 = vmul.f32 0.00390625, %v640_v3  ;;  %v1117_v59 = vmul.f32 %v5757_v4, %v5690_v51  ;;  %v8324_v25 = vld [vmem:[#allocation13_spill] sm:$0xff] }
 0x235   :  { %v1301_v18 = vmul.f32 %v5228_v34, %v1259_v11  ;;  %v1477_v35 = vmul.f32 %v8312_v55, %v1095_v19  ;;  %v739_v12 = vsub.f32 %v663_v29, %v8315_v30  ;;  %v5789_v58 = vpop.eup %3326  ;;  %vm1102_vm8 = vweird.f32 %v5548_v16 }
 0x236   :  { %v1279_v38 = vmul.f32 %v8314_v15, %v1095_v19  ;;  %v1541_v11 = vadd.f32 %v5223_v10, %v1499_v44  ;;  %8316 = vst [vmem:[#allocation71_spill] sm:$0xff] %v5789_v58  ;;  %v968_v8 = vmul.f32 %v5714_v62, %v967_v17  ;;  %v677_v3 = vmul.f32 0.00390625, %v639_v43  ;;  %v5801_v17 = vpop.xlane.xlu1 %492 }
 0x237   :  { %v1343_v45 = vadd.f32 %v5253_v46, %v1301_v18  ;;  %v1519_v27 = vmul.f32 %v5196_v20, %v1477_v35  ;;  %v958_v37 = vmul.f32 %v5720_v26, %v957_v2  ;;  %v662_v57 = vmul.f32 0.00390625, %v624_v23  ;;  %v5796_v56 = vpop.eup %3328 }
 0x238   :  { %v1321_v19 = vmul.f32 %v5228_v34, %v1279_v38  ;;  %v1579_v55 = vmax.f32 %v1541_v11, 0.0  ;;  %v790_v44 = vmax.f32 %v752_v49, 0.0  ;;  %v754_v30 = vsub.f32 %v678_v60, %v5355_v40  ;;  %v5803_v20 = vpop.eup %3330 }
 0x239   :  { %v1381_v29 = vmax.f32 %v1343_v45, 0.0  ;;  %v1561_v18 = vadd.f32 %v5223_v10, %v1519_v27  ;;  %v1118_v2 = vmul.f32 %v5757_v4, %v1117_v59  ;;  %v987_v23 = vmul.f32 %v5789_v58, %v5725_v39  ;;  %v8318_v27 = vld [vmem:[#allocation134_spill] sm:$0xff] }
 0x23a   :  { %v1363_v15 = vadd.f32 %v5253_v46, %v1321_v19  ;;  %v777_v35 = vmax.f32 %v739_v12, 0.0  ;;  %1675 = vmatmul.f32.gmra.mxu0 %v1579_v55  ;;  %v753_v38 = vsub.f32 %v677_v3, %v5359_v63  ;;  %v8317_v40 = vsub.f32 1.5, %v5582_v36 }
 0x23b   :  { %1806 = vmatmul.f32.gmra.mxu1 %v1381_v29  ;;  %v1599_v49 = vmax.f32 %v1561_v18, 0.0  ;;  %v5814_v11 = vmul.f32 0.5, %v5738_v32  ;;  %v5816_v45 = vmul.f32 0.5, %v968_v8  ;;  %v977_v59 = vmul.f32 %v5796_v56, %v5740_v54 }
 0x23c   :  { %v1401_v10 = vmax.f32 %v1363_v15, 0.0  ;;  %v901_v60 = vmul.f32 %v5519_v41, %v8317_v40  ;;  %v738_v12 = vsub.f32 %v662_v57, %v8318_v27  ;;  %v5821_v19 = vmul.f32 0.5, %v958_v37  ;;  %v523_v37 = vpop.xlane.xlu0 %522  ;;  %v8326_v40 = vld [vmem:[#allocation39_spill] sm:$0xff]  ;;  %v8327_v27 = vld [vmem:[#allocation89_spill] sm:$0xff] }
 0x23d   :  { %v5823_v55 = vadd.f32 1e-05, %v790_v44  ;;  %1735 = vmatmul.f32.gmra.mxu2 %v1599_v49  ;;  %v792_v63 = vmax.f32 %v754_v30, 0.0  ;;  %vm903_vm9 = vweird.f32 %v5519_v41  ;;  %v5826_v36 = vmul.f32 0.5, %v1118_v2  ;;  %v8321_v2 = vld [vmem:[#allocation18_spill] sm:$0xff] }
 0x23e   :  { %1866 = vmatmul.f32.gmra.mxu3 %v1401_v10  ;;  %v988_v32 = vmul.f32 %v5789_v58, %v987_v23  ;;  %v1127_v8 = vmul.f32 %v5803_v20, %v5746_v61  ;;  %v5831_v3 = vadd.f32 1e-05, %v777_v35  ;;  %vm904_vm10 = vmor %vm902_vm7, %vm903_vm9  ;;  %v791_v57 = vmax.f32 %v753_v38, 0.0  ;;  %v8322_v23 = vld [vmem:[#allocation27_spill] sm:$0xff] }
 0x23f   :  { %v905_v29 = vsel %vm904_vm10, %v5519_v41, %v901_v60  ;;  %v8320_v44 = vsub.f32 1.5, %v5704_v22  ;;  %vm1103_vm11 = vweird.f32 %v5593_v13  ;;  %v978_v15 = vmul.f32 %v5796_v56, %v977_v59  ;;  %v5858_v59 = vld [vmem:[%s7730_s4] ss:$0 sm:$0xff] }
 0x240   :  { %8319 = vst [vmem:[#allocation106_spill] sm:$0xff] %v5831_v3  ;;  %v776_v30 = vmax.f32 %v738_v12, 0.0  ;;  %v8323_v35 = vsub.f32 %v8321_v2, %v8322_v23  ;;  %vm1104_vm12 = vmor %vm1102_vm8, %vm1103_vm11  ;;  %v8325_v10 = vsub.f32 %v8324_v25, %v8322_v23  ;;  %3332 = vrsqrt.f32 %v5823_v55  ;;  %v8328_v12 = vld [vmem:[#allocation97_spill] sm:$0xff]  ;;  %v8330_v2 = vld [vmem:[#allocation72_spill] sm:$0xff]  ;;  %v525_v25 = vpop.xlane.xlu1 %524 }
 0x241   :  { %v1101_v18 = vmul.f32 %v5593_v13, %v8320_v44  ;;  %v5850_v22 = vadd.f32 1e-05, %v792_v63  ;;  %v641_v60 = vadd.f32 %v523_v37, %v8326_v40  ;;  %vm912_vm13 = vweird.f32 %v5496_v0 }
 0x242   :  { %v1458_v49 = vmul.f32 %v8323_v35, %v905_v29  ;;  %v1260_v41 = vmul.f32 %v8325_v10, %v905_v29  ;;  %v8329_v29 = vsub.f32 %v8327_v27, %v8328_v12  ;;  %v5868_v37 = vmul.f32 0.5, %v988_v32 }
 0x243   :  { %v1105_v38 = vsel %vm1104_vm12, %v5593_v13, %v1101_v18  ;;  %v8331_v13 = vsub.f32 %v8330_v2, %v8328_v12  ;;  %v1128_v23 = vmul.f32 %v5803_v20, %v1127_v8  ;;  %3334 = vrsqrt.f32 %v5831_v3  ;;  %v8332_v12 = vld [vmem:[#allocation10_spill] sm:$0xff]  ;;  %v5906_v2 = vld [vmem:[%s7731_s5] ss:$0 sm:$0xff] }
 0x244   :  { %v1500_v16 = vmul.f32 %v5858_v59, %v1458_v49  ;;  %v1478_v44 = vmul.f32 %v8329_v29, %v1105_v38  ;;  %v1302_v63 = vmul.f32 %v5228_v34, %v1260_v41  ;;  %v5872_v35 = vadd.f32 1e-05, %v791_v57  ;;  %v5877_v49 = vld [vmem:[%s7732_s6] ss:$0 sm:$0xff] }
 0x245   :  { %v1280_v18 = vmul.f32 %v8331_v13, %v1105_v38  ;;  %v679_v32 = vmul.f32 0.00390625, %v641_v60  ;;  %vm1112_vm14 = vweird.f32 %v5633_v50  ;;  %v5883_v8 = vmul.f32 0.5, %v978_v15  ;;  %v5891_v57 = vld [vmem:[%s7729_s3] ss:$0 sm:$0xff]  ;;  %v8343_v50 = vld [vmem:[#allocation88_spill] sm:$0xff] }
 0x246   :  { %v1542_v34 = vadd.f32 %v5877_v49, %v1500_v16  ;;  %v1520_v10 = vmul.f32 %v5858_v59, %v1478_v44  ;;  %v1344_v41 = vadd.f32 %v5253_v46, %v1302_v63  ;;  %v5885_v38 = vadd.f32 1e-05, %v776_v30  ;;  %v527_v16 = vpop.xlane.xlu2 %526  ;;  %v5896_v15 = vpop.eup %3332  ;;  %v8333_v44 = vld [vmem:[#allocation113_spill] sm:$0xff] }
 0x247   :  { %3336 = vrsqrt.f32 %v5850_v22  ;;  %v1322_v40 = vmul.f32 %v5891_v57, %v1280_v18  ;;  %v642_v29 = vadd.f32 %v525_v25, %v8332_v12  ;;  %v5898_v30 = vmul.f32 0.5, %v1128_v23  ;;  %v8334_v25 = vld [vmem:[#allocation52_spill] sm:$0xff] }
 0x248   :  { %v1580_v27 = vmax.f32 %v1542_v34, 0.0  ;;  %v1562_v46 = vadd.f32 %v5877_v49, %v1520_v10  ;;  %v1382_v60 = vmax.f32 %v1344_v41, 0.0  ;;  %3338 = vrsqrt.f32 %v5872_v35 }
 0x249   :  { %v626_v63 = vadd.f32 %v5801_v17, %v8333_v44  ;;  %v1364_v13 = vadd.f32 %v5906_v2, %v1322_v40  ;;  %v643_v34 = vadd.f32 %v527_v16, %v8334_v25  ;;  %v755_v23 = vsub.f32 %v679_v32, %v5367_v7  ;;  %v5914_v12 = vpop.eup %3334  ;;  %v8337_v44 = vld [vmem:[#allocation34_spill] sm:$0xff]  ;;  %v8344_v16 = vld [vmem:[#allocation67_spill] sm:$0xff] }
 0x24a   :  { %1678 = vmatmul.f32.gmra.mxu0 %v1580_v27  ;;  %v1600_v18 = vmax.f32 %v1562_v46, 0.0  ;;  %1809 = vmatmul.f32.gmra.mxu1 %v1382_v60  ;;  %v8335_v10 = vsub.f32 1.5, %v5620_v42  ;;  %v1110_v17 = vsub.f32 1.5, %v5814_v11  ;;  %v1137_v27 = vmul.f32 %v5896_v15, %v5823_v55 }
 0x24b   :  { %v1402_v40 = vmax.f32 %v1364_v13, 0.0  ;;  %3340 = vrsqrt.f32 %v5885_v38  ;;  %v680_v7 = vmul.f32 0.00390625, %v642_v29  ;;  %vm913_vm15 = vweird.f32 %v5552_v47 }
 0x24c   :  { %v911_v41 = vmul.f32 %v5552_v47, %v8335_v10  ;;  %1738 = vmatmul.f32.gmra.mxu2 %v1600_v18  ;;  %vm922_vm0 = vweird.f32 %v5555_v21  ;;  %v664_v46 = vmul.f32 0.00390625, %v626_v63  ;;  %vm914_vm1 = vmor %vm912_vm13, %vm913_vm15  ;;  %v681_v29 = vmul.f32 0.00390625, %v643_v34  ;;  %v8336_v10 = vld [vmem:[#allocation26_spill] sm:$0xff]  ;;  %v8339_v63 = vld [vmem:[#allocation12_spill] sm:$0xff] }
 0x24d   :  { %v5923_v42 = vpop.eup %3336  ;;  %1869 = vmatmul.f32.gmra.mxu3 %v1402_v40  ;;  %v793_v13 = vmax.f32 %v755_v23, 0.0  ;;  %v8338_v43 = vsub.f32 %v8336_v10, %v8337_v44  ;;  %v1111_v32 = vmul.f32 %v5699_v1, %v1110_v17  ;;  %vm1113_vm2 = vweird.f32 %v5699_v1 }
 0x24e   :  { %v915_v18 = vsel %vm914_vm1, %v5552_v47, %v911_v41  ;;  %v5933_v25 = vpop.eup %3338  ;;  %v8340_v0 = vsub.f32 %v8339_v63, %v8337_v44  ;;  %v1007_v34 = vmul.f32 %v5914_v12, %v5831_v3  ;;  %v1138_v23 = vmul.f32 %v5896_v15, %v1137_v27  ;;  %vm1114_vm3 = vmor %vm1112_vm14, %vm1113_vm2 }
 0x24f   :  { %v1459_v11 = vmul.f32 %v8338_v43, %v915_v18  ;;  %v1157_v47 = vmul.f32 %v5923_v42, %v5850_v22  ;;  %v756_v41 = vsub.f32 %v680_v7, %v5415_v33  ;;  %v8341_v43 = vld [vmem:[#allocation136_spill] sm:$0xff]  ;;  %v1115_v44 = vsel %vm1114_vm3, %v5699_v1, %v1111_v32  ;;  %v8346_v32 = vld [vmem:[#allocation79_spill] sm:$0xff] }
 0x250   :  { %v1261_v40 = vmul.f32 %v8340_v0, %v915_v18  ;;  %v740_v17 = vsub.f32 %v664_v46, %v8341_v43  ;;  %vm1122_vm4 = vweird.f32 %v5690_v51  ;;  %v1147_v27 = vmul.f32 %v5933_v25, %v5872_v35  ;;  %v8342_v0 = vld [vmem:[#allocation104_spill] sm:$0xff]  ;;  %v8357_v51 = vld [vmem:[#allocation93_spill] sm:$0xff] }
 0x251   :  { %v1501_v10 = vmul.f32 %v5858_v59, %v1459_v11  ;;  %v5955_v63 = vpop.eup %3340  ;;  %v757_v33 = vsub.f32 %v681_v29, %v8342_v0  ;;  %v5961_v7 = vadd.f32 1e-05, %v793_v13  ;;  %v8345_v46 = vsub.f32 %v8343_v50, %v8344_v16 }
 0x252   :  { %v1303_v18 = vmul.f32 %v5891_v57, %v1261_v40  ;;  %v8347_v40 = vsub.f32 %v8346_v32, %v8344_v16  ;;  %v8348_v3 = vsub.f32 1.5, %v5706_v52  ;;  %v1158_v29 = vmul.f32 %v5923_v42, %v1157_v47  ;;  %v529_v47 = vpop.xlane.xlu0 %528  ;;  %v8349_v32 = vld [vmem:[#allocation45_spill] sm:$0xff] }
 0x253   :  { %v1479_v43 = vmul.f32 %v8345_v46, %v1115_v44  ;;  %v1543_v11 = vadd.f32 %v5877_v49, %v1501_v10  ;;  %v794_v13 = vmax.f32 %v756_v41, 0.0  ;;  %vm923_vm5 = vweird.f32 %v5609_v53  ;;  %v531_v41 = vpop.xlane.xlu1 %530 }
 0x254   :  { %v1345_v1 = vadd.f32 %v5906_v2, %v1303_v18  ;;  %v1281_v60 = vmul.f32 %v8347_v40, %v1115_v44  ;;  %v921_v58 = vmul.f32 %v5609_v53, %v8348_v3  ;;  %v997_v10 = vmul.f32 %v5955_v63, %v5885_v38  ;;  %vm924_vm7 = vmor %vm922_vm0, %vm923_vm5 }
 0x255   :  { %v1521_v0 = vmul.f32 %v5858_v59, %v1479_v43  ;;  %v1581_v50 = vmax.f32 %v1543_v11, 0.0  ;;  %vm932_vm6 = vweird.f32 %v5575_v6  ;;  %v5981_v16 = vmul.f32 0.5, %v1138_v23  ;;  %v8365_v6 = vld [vmem:[#allocation75_spill] sm:$0xff] }
 0x256   :  { %v1383_v18 = vmax.f32 %v1345_v1, 0.0  ;;  %v1323_v46 = vmul.f32 %v5891_v57, %v1281_v60  ;;  %v778_v52 = vmax.f32 %v740_v17, 0.0  ;;  %3342 = vrsqrt.f32 %v5961_v7 }
 0x257   :  { %v1563_v3 = vadd.f32 %v5877_v49, %v1521_v0  ;;  %v1148_v44 = vmul.f32 %v5933_v25, %v1147_v27  ;;  %v795_v43 = vmax.f32 %v757_v33, 0.0  ;;  %1681 = vmatmul.f32.gmra.mxu0 %v1581_v50  ;;  %v925_v23 = vsel %vm924_vm7, %v5609_v53, %v921_v58  ;;  %v8350_v27 = vld [vmem:[#allocation68_spill] sm:$0xff]  ;;  %v8351_v0 = vld [vmem:[#allocation25_spill] sm:$0xff] }
 0x258   :  { %1812 = vmatmul.f32.gmra.mxu1 %v1383_v18  ;;  %v1365_v60 = vadd.f32 %v5906_v2, %v1323_v46  ;;  %vm1132_vm8 = vweird.f32 %v5746_v61  ;;  %v5991_v17 = vmul.f32 0.5, %v1158_v29  ;;  %v5993_v11 = vadd.f32 1e-05, %v794_v13  ;;  %v8352_v50 = vld [vmem:[#allocation33_spill] sm:$0xff] }
 0x259   :  { %v1601_v1 = vmax.f32 %v1563_v3, 0.0  ;;  %vm1123_vm9 = vweird.f32 %v5757_v4  ;;  %v644_v40 = vadd.f32 %v529_v47, %v8349_v32  ;;  %v645_v33 = vadd.f32 %v531_v41, %v8350_v27  ;;  %v8371_v61 = vld [vmem:[#allocation69_spill] sm:$0xff] }
 0x25a   :  { %v1403_v21 = vmax.f32 %v1365_v60, 0.0  ;;  %v8353_v18 = vsub.f32 %v8351_v0, %v8352_v50  ;;  %v6002_v53 = vmul.f32 %v5914_v12, %v1007_v34  ;;  %v1140_v58 = vsub.f32 1.5, %v5981_v16  ;;  %vm1124_vm11 = vmor %vm1122_vm4, %vm1123_vm9 }
 0x25b   :  { %v6006_v29 = vmul.f32 %v5955_v63, %v997_v10  ;;  %1741 = vmatmul.f32.gmra.mxu2 %v1601_v1  ;;  %v8354_v13 = vsub.f32 1.5, %v5826_v36  ;;  %vm942_vm10 = vweird.f32 %v5596_v48  ;;  %v6012_v47 = vmul.f32 0.5, %v1148_v44  ;;  %v8355_v10 = vld [vmem:[#allocation11_spill] sm:$0xff]  ;;  %v8378_v48 = vld [vmem:[#allocation32_spill] sm:$0xff] }
 0x25c   :  { %v1460_v46 = vmul.f32 %v8353_v18, %v925_v23  ;;  %v6014_v41 = vadd.f32 1e-05, %v778_v52  ;;  %1872 = vmatmul.f32.gmra.mxu3 %v1403_v21  ;;  %v8356_v60 = vsub.f32 %v8355_v10, %v8352_v50  ;;  %v6024_v1 = vpop.eup %3342  ;;  %v6027_v44 = vadd.f32 1e-05, %v795_v43  ;;  %v8358_v18 = vld [vmem:[#allocation82_spill] sm:$0xff] }
 0x25d   :  { %v1121_v3 = vmul.f32 %v5757_v4, %v8354_v13  ;;  %3344 = vrsqrt.f32 %v5993_v11  ;;  %v682_v21 = vmul.f32 0.00390625, %v644_v40  ;;  %v683_v27 = vmul.f32 0.00390625, %v645_v33  ;;  %v8360_v50 = vld [vmem:[#allocation78_spill] sm:$0xff] }
 0x25e   :  { %v1502_v34 = vmul.f32 %v5858_v59, %v1460_v46  ;;  %v1262_v36 = vmul.f32 %v8356_v60, %v925_v23  ;;  %v8359_v46 = vsub.f32 %v8357_v51, %v8358_v18  ;;  %v8361_v10 = vsub.f32 %v8360_v50, %v8358_v18  ;;  %v8364_v51 = vld [vmem:[#allocation24_spill] sm:$0xff] }
 0x25f   :  { %v1125_v52 = vsel %vm1124_vm11, %v5757_v4, %v1121_v3  ;;  %v8362_v43 = vsub.f32 1.5, %v5711_v31  ;;  %vm933_vm12 = vweird.f32 %v5636_v9  ;;  %v1167_v4 = vmul.f32 %v6024_v1, %v5961_v7 }
 0x260   :  { %v1544_v0 = vadd.f32 %v5877_v49, %v1502_v34  ;;  %v1480_v13 = vmul.f32 %v8359_v46, %v1125_v52  ;;  %v1304_v23 = vmul.f32 %v5891_v57, %v1262_v36  ;;  %v1282_v60 = vmul.f32 %v8361_v10, %v1125_v52  ;;  %vm934_vm13 = vmor %vm932_vm6, %vm933_vm12 }
 0x261   :  { %v931_v32 = vmul.f32 %v5636_v9, %v8362_v43  ;;  %v8363_v3 = vsub.f32 1.5, %v5898_v30  ;;  %vm1133_vm14 = vweird.f32 %v5803_v20  ;;  %vm1142_vm15 = vweird.f32 %v5823_v55  ;;  %v8367_v30 = vld [vmem:[#allocation14_spill] sm:$0xff] }
 0x262   :  { %v1582_v40 = vmax.f32 %v1544_v0, 0.0  ;;  %v1522_v33 = vmul.f32 %v5858_v59, %v1480_v13  ;;  %v1346_v36 = vadd.f32 %v5906_v2, %v1304_v23  ;;  %v1324_v31 = vmul.f32 %v5891_v57, %v1282_v60  ;;  %vm1134_vm0 = vmor %vm1132_vm8, %vm1133_vm14 }
 0x263   :  { %v1131_v34 = vmul.f32 %v5803_v20, %v8363_v3  ;;  %v935_v52 = vsel %vm934_vm13, %v5636_v9, %v931_v32  ;;  %v8366_v18 = vsub.f32 %v8364_v51, %v8365_v6  ;;  %v8368_v13 = vsub.f32 %v8367_v30, %v8365_v6  ;;  %v6068_v50 = vpop.eup %3344  ;;  %v8372_v51 = vld [vmem:[#allocation130_spill] sm:$0xff] }
 0x264   :  { %1684 = vmatmul.f32.gmra.mxu0 %v1582_v40  ;;  %v1564_v0 = vadd.f32 %v5877_v49, %v1522_v33  ;;  %v8369_v9 = vsub.f32 1.5, %v5735_v5  ;;  %v1384_v10 = vmax.f32 %v1346_v36, 0.0  ;;  %v1366_v60 = vadd.f32 %v5906_v2, %v1324_v31  ;;  %v8370_v40 = vld [vmem:[#allocation7_spill] sm:$0xff]  ;;  %v8373_v5 = vld [vmem:[#allocation101_spill] sm:$0xff] }
 0x265   :  { %v1461_v46 = vmul.f32 %v8366_v18, %v935_v52  ;;  %v1263_v23 = vmul.f32 %v8368_v13, %v935_v52  ;;  %v1135_v43 = vsel %vm1134_vm0, %v5803_v20, %v1131_v34  ;;  %vm943_vm1 = vweird.f32 %v5658_v24  ;;  %v8375_v36 = vld [vmem:[#allocation43_spill] sm:$0xff]  ;;  %v8376_v34 = vld [vmem:[#allocation129_spill] sm:$0xff] }
 0x266   :  { %v941_v32 = vmul.f32 %v5658_v24, %v8369_v9  ;;  %vm952_vm2 = vweird.f32 %v8370_v40  ;;  %v758_v33 = vsub.f32 %v682_v21, %v8371_v61  ;;  %v1602_v3 = vmax.f32 %v1564_v0, 0.0  ;;  %1815 = vmatmul.f32.gmra.mxu1 %v1384_v10  ;;  %vm944_vm4 = vmor %vm942_vm10, %vm943_vm1  ;;  %v8391_v40 = vld [vmem:[#allocation102_spill] sm:$0xff] }
 0x267   :  { %v1503_v52 = vmul.f32 %v5858_v59, %v1461_v46  ;;  %v8374_v6 = vsub.f32 %v8372_v51, %v8373_v5  ;;  %vm1152_vm3 = vweird.f32 %v5872_v35  ;;  %v759_v30 = vsub.f32 %v683_v27, %v8375_v36  ;;  %v8381_v36 = vld [vmem:[#allocation58_spill] sm:$0xff] }
 0x268   :  { %v1404_v31 = vmax.f32 %v1366_v60, 0.0  ;;  %v1305_v20 = vmul.f32 %v5891_v57, %v1263_v23  ;;  %v8377_v13 = vsub.f32 %v8376_v34, %v8373_v5  ;;  %v1168_v21 = vmul.f32 %v6024_v1, %v1167_v4  ;;  %1744 = vmatmul.f32.gmra.mxu2 %v1602_v3  ;;  %v8384_v34 = vld [vmem:[#allocation103_spill] sm:$0xff] }
 0x269   :  { %v1481_v18 = vmul.f32 %v8374_v6, %v1135_v43  ;;  %v1545_v0 = vadd.f32 %v5877_v49, %v1503_v52  ;;  %v945_v27 = vsel %vm944_vm4, %v5658_v24, %v941_v32  ;;  %vm962_vm5 = vweird.f32 %v5662_v14 }
 0x26a   :  { %v1283_v9 = vmul.f32 %v8377_v13, %v1135_v43  ;;  %v1150_v23 = vsub.f32 1.5, %v6012_v47  ;;  %1875 = vmatmul.f32.gmra.mxu3 %v1404_v31  ;;  %v1347_v10 = vadd.f32 %v5906_v2, %v1305_v20  ;;  %v8379_v43 = vld [vmem:[#allocation117_spill] sm:$0xff]  ;;  %3346 = vrsqrt.f32 %v6027_v44 }
 0x26b   :  { %v1523_v46 = vmul.f32 %v5858_v59, %v1481_v18  ;;  %v8380_v61 = vsub.f32 %v8378_v48, %v8379_v43  ;;  %v1583_v3 = vmax.f32 %v1545_v0, 0.0  ;;  %v1141_v24 = vmul.f32 %v5896_v15, %v1140_v58  ;;  %v8388_v48 = vld [vmem:[#allocation77_spill] sm:$0xff] }
 0x26c   :  { %v1325_v60 = vmul.f32 %v5891_v57, %v1283_v9  ;;  %v796_v32 = vmax.f32 %v758_v33, 0.0  ;;  %v797_v47 = vmax.f32 %v759_v30, 0.0  ;;  %v6105_v6 = vmul.f32 0.5, %v1168_v21 }
 0x26d   :  { %v1462_v4 = vmul.f32 %v8380_v61, %v945_v27  ;;  %v1565_v52 = vadd.f32 %v5877_v49, %v1523_v46  ;;  %v1177_v18 = vmul.f32 %v6068_v50, %v5993_v11  ;;  %1687 = vmatmul.f32.gmra.mxu0 %v1583_v3  ;;  %vm1143_vm6 = vweird.f32 %v5896_v15 }
 0x26e   :  { %v1367_v51 = vadd.f32 %v5906_v2, %v1325_v60  ;;  %v8382_v31 = vsub.f32 %v8381_v36, %v8379_v43  ;;  %v1385_v58 = vmax.f32 %v1347_v10, 0.0  ;;  %vm1144_vm7 = vmor %vm1142_vm15, %vm1143_vm6  ;;  %v8383_v30 = vsub.f32 1.5, %v5722_v28  ;;  %v8386_v10 = vld [vmem:[#allocation90_spill] sm:$0xff] }
 0x26f   :  { %v1504_v5 = vmul.f32 %v5858_v59, %v1462_v4  ;;  %v1603_v20 = vmax.f32 %v1565_v52, 0.0  ;;  %v1145_v9 = vsel %vm1144_vm7, %v5896_v15, %v1141_v24  ;;  %vm953_vm8 = vweird.f32 %v8384_v34 }
 0x270   :  { %v1264_v16 = vmul.f32 %v8382_v31, %v945_v27  ;;  %v951_v13 = vmul.f32 %v8384_v34, %v8383_v30  ;;  %v1151_v0 = vmul.f32 %v5933_v25, %v1150_v23  ;;  %vm1162_vm9 = vweird.f32 %v5850_v22  ;;  %1818 = vmatmul.f32.gmra.mxu1 %v1385_v58  ;;  %v8385_v27 = vld [vmem:[#allocation92_spill] sm:$0xff]  ;;  %vm954_vm10 = vmor %vm952_vm2, %vm953_vm8  ;;  %v6133_v15 = vpop.eup %3346 }
 0x271   :  { %v1546_v33 = vadd.f32 %v5877_v49, %v1504_v5  ;;  %v1405_v46 = vmax.f32 %v1367_v51, 0.0  ;;  %v8387_v55 = vsub.f32 %v8385_v27, %v8386_v10  ;;  %v8389_v28 = vsub.f32 %v8388_v48, %v8386_v10  ;;  %1747 = vmatmul.f32.gmra.mxu2 %v1603_v20  ;;  %v8392_v51 = vld [vmem:[#allocation31_spill] sm:$0xff]  ;;  %v8393_v5 = vld [vmem:[#allocation57_spill] sm:$0xff]  ;;  %v8395_v20 = vld [vmem:[#allocation96_spill] sm:$0xff] }
 0x272   :  { %v1306_v21 = vmul.f32 %v5891_v57, %v1264_v16  ;;  %vm1153_vm11 = vweird.f32 %v5933_v25  ;;  %v955_v61 = vsel %vm954_vm10, %v8384_v34, %v951_v13  ;;  %v8390_v4 = vsub.f32 1.5, %v5821_v19  ;;  %v8396_v19 = vld [vmem:[#allocation94_spill] sm:$0xff] }
 0x273   :  { %v1482_v60 = vmul.f32 %v8387_v55, %v1145_v9  ;;  %v1284_v43 = vmul.f32 %v8389_v28, %v1145_v9  ;;  %vm1154_vm12 = vmor %vm1152_vm3, %vm1153_vm11  ;;  %vm963_vm13 = vweird.f32 %v5720_v26  ;;  %vm972_vm14 = vweird.f32 %v8391_v40  ;;  %1878 = vmatmul.f32.gmra.mxu3 %v1405_v46  ;;  %v8398_v34 = vld [vmem:[#allocation46_spill] sm:$0xff] }
 0x274   :  { %v1348_v23 = vadd.f32 %v5906_v2, %v1306_v21  ;;  %v961_v3 = vmul.f32 %v5720_v26, %v8390_v4  ;;  %v8394_v36 = vsub.f32 %v8392_v51, %v8393_v5  ;;  %v1155_v35 = vsel %vm1154_vm12, %v5933_v25, %v1151_v0  ;;  %v8400_v21 = vld [vmem:[#allocation81_spill] sm:$0xff]  ;;  %vm964_vm15 = vmor %vm962_vm5, %vm963_vm13 }
 0x275   :  { %v1524_v52 = vmul.f32 %v5858_v59, %v1482_v60  ;;  %v1326_v24 = vmul.f32 %v5891_v57, %v1284_v43  ;;  %v1584_v16 = vmax.f32 %v1546_v33, 0.0  ;;  %v8397_v58 = vsub.f32 %v8395_v20, %v8396_v19 }
 0x276   :  { %v1463_v31 = vmul.f32 %v8394_v36, %v955_v61  ;;  %v8399_v13 = vsub.f32 %v8398_v34, %v8393_v5  ;;  %v8401_v46 = vsub.f32 %v8400_v21, %v8396_v19  ;;  %v965_v0 = vsel %vm964_vm15, %v5720_v26, %v961_v3 }
 0x277   :  { %v1483_v30 = vmul.f32 %v8397_v58, %v1155_v35  ;;  %v1566_v10 = vadd.f32 %v5877_v49, %v1524_v52  ;;  %v1368_v25 = vadd.f32 %v5906_v2, %v1326_v24  ;;  %v1187_v55 = vmul.f32 %v6133_v15, %v6027_v44  ;;  %1690 = vmatmul.f32.gmra.mxu0 %v1584_v16 }
 0x278   :  { %v1265_v9 = vmul.f32 %v8399_v13, %v955_v61  ;;  %v1285_v27 = vmul.f32 %v8401_v46, %v1155_v35  ;;  %v1505_v33 = vmul.f32 %v5858_v59, %v1463_v31  ;;  %v1178_v60 = vmul.f32 %v6068_v50, %v1177_v18  ;;  %v8403_v18 = vld [vmem:[#allocation30_spill] sm:$0xff]  ;;  %v8407_v35 = vld [vmem:[#allocation15_spill] sm:$0xff]  ;;  %v8409_v13 = vld [vmem:[#allocation80_spill] sm:$0xff] }
 0x279   :  { %v6168_v48 = vadd.f32 1e-05, %v796_v32  ;;  %v1170_v14 = vsub.f32 1.5, %v6105_v6  ;;  %v1386_v43 = vmax.f32 %v1348_v23, 0.0  ;;  %v1525_v61 = vmul.f32 %v5858_v59, %v1483_v30  ;;  %v8404_v32 = vld [vmem:[#allocation40_spill] sm:$0xff] }
 0x27a   :  { %v1307_v28 = vmul.f32 %v5891_v57, %v1265_v9  ;;  %v8402_v4 = vsub.f32 1.5, %v5991_v17  ;;  %v6176_v26 = vadd.f32 1e-05, %v797_v47  ;;  %v1604_v3 = vmax.f32 %v1566_v10, 0.0  ;;  %v8410_v9 = vld [vmem:[#allocation132_spill] sm:$0xff] }
 0x27b   :  { %v1547_v24 = vadd.f32 %v5877_v49, %v1505_v33  ;;  %v8405_v51 = vsub.f32 %v8403_v18, %v8404_v32  ;;  %vm982_vm0 = vweird.f32 %v5740_v54  ;;  %1821 = vmatmul.f32.gmra.mxu1 %v1386_v43  ;;  %v1406_v6 = vmax.f32 %v1368_v25, 0.0  ;;  %v8412_v46 = vld [vmem:[#allocation64_spill] sm:$0xff] }
 0x27c   :  { %v1161_v52 = vmul.f32 %v5923_v42, %v8402_v4  ;;  %v1327_v23 = vmul.f32 %v5891_v57, %v1285_v27  ;;  %vm1163_vm1 = vweird.f32 %v5923_v42  ;;  %v8406_v17 = vsub.f32 1.5, %v5816_v45  ;;  %1750 = vmatmul.f32.gmra.mxu2 %v1604_v3  ;;  %v8415_v4 = vld [vmem:[#allocation38_spill] sm:$0xff] }
 0x27d   :  { %v1464_v5 = vmul.f32 %v8405_v51, %v965_v0  ;;  %v1179_v36 = vmul.f32 0.5, %v1178_v60  ;;  %3348 = vrsqrt.f32 %v6168_v48  ;;  %v1349_v31 = vadd.f32 %v5906_v2, %v1307_v28  ;;  %vm1164_vm2 = vmor %vm1162_vm9, %vm1163_vm1  ;;  %1881 = vmatmul.f32.gmra.mxu3 %v1406_v6  ;;  %v8419_v6 = vld [vmem:[#allocation131_spill] sm:$0xff] }
 0x27e   :  { %v971_v47 = vmul.f32 %v5714_v62, %v8406_v17  ;;  %v8408_v16 = vsub.f32 %v8407_v35, %v8404_v32  ;;  %v1567_v19 = vadd.f32 %v5877_v49, %v1525_v61  ;;  %v1165_v45 = vsel %vm1164_vm2, %v5923_v42, %v1161_v52  ;;  %v8416_v52 = vld [vmem:[#allocation119_spill] sm:$0xff] }
 0x27f   :  { %vm973_vm3 = vweird.f32 %v5714_v62  ;;  %v1171_v58 = vmul.f32 %v6024_v1, %v1170_v14  ;;  %v1585_v30 = vmax.f32 %v1547_v24, 0.0  ;;  %v1506_v34 = vmul.f32 %v5858_v59, %v1464_v5  ;;  %v8418_v5 = vld [vmem:[#allocation99_spill] sm:$0xff] }
 0x280   :  { %v1266_v20 = vmul.f32 %v8408_v16, %v965_v0  ;;  %v8411_v22 = vsub.f32 %v8409_v13, %v8410_v9  ;;  %vm974_vm4 = vmor %vm972_vm14, %vm973_vm3  ;;  %vm1173_vm5 = vweird.f32 %v6024_v1  ;;  %vm1172_vm6 = vweird.f32 %v5961_v7 }
 0x281   :  { %v1369_v42 = vadd.f32 %v5906_v2, %v1327_v23  ;;  %v8413_v27 = vsub.f32 %v8412_v46, %v8410_v9  ;;  %v975_v25 = vsel %vm974_vm4, %v5714_v62, %v971_v47  ;;  %v1188_v33 = vmul.f32 %v6133_v15, %v1187_v55  ;;  %1693 = vmatmul.f32.gmra.mxu0 %v1585_v30  ;;  %vm1174_vm7 = vmor %vm1172_vm6, %vm1173_vm5  ;;  %v8421_v47 = vld [vmem:[#allocation125_spill] sm:$0xff]  ;;  %v8423_v9 = vld [vmem:[#allocation84_spill] sm:$0xff] }
 0x282   :  { %v1484_v21 = vmul.f32 %v8411_v22, %v1165_v45  ;;  %3350 = vrsqrt.f32 %v6176_v26  ;;  %v1387_v0 = vmax.f32 %v1349_v31, 0.0  ;;  %v1308_v40 = vmul.f32 %v5891_v57, %v1266_v20  ;;  %v1718_v20 = vpop.f32.mrf.mxu2 }
 0x283   :  { %v1286_v10 = vmul.f32 %v8413_v27, %v1165_v45  ;;  %v1175_v7 = vsel %vm1174_vm7, %v6024_v1, %v1171_v58  ;;  %v8414_v28 = vsub.f32 1.5, %v5883_v8  ;;  %vm983_vm8 = vweird.f32 %v5796_v56  ;;  %v6221_v62 = vpop.eup %3348 }
 0x284   :  { %v1526_v60 = vmul.f32 %v5858_v59, %v1484_v21  ;;  %v1180_v55 = vsub.f32 1.5, %v1179_v36  ;;  %v1605_v43 = vmax.f32 %v1567_v19, 0.0  ;;  %v1548_v61 = vadd.f32 %v5877_v49, %v1506_v34  ;;  %1824 = vmatmul.f32.gmra.mxu1 %v1387_v0  ;;  %vm984_vm9 = vmor %vm982_vm0, %vm983_vm8  ;;  %v1849_v19 = vpop.f32.mrf.mxu3  ;;  %v1661_v21 = vpop.f32.mrf.mxu0 }
 0x285   :  { %v981_v14 = vmul.f32 %v5796_v56, %v8414_v28  ;;  %v8417_v3 = vsub.f32 %v8415_v4, %v8416_v52  ;;  %v6228_v18 = vmul.f32 0.5, %v6002_v53  ;;  %v6231_v1 = vmul.f32 0.5, %v6006_v29 }
 0x286   :  { %v1407_v8 = vmax.f32 %v1369_v42, 0.0  ;;  %v1328_v32 = vmul.f32 %v5891_v57, %v1286_v10  ;;  %3352 = vrsqrt.f32 %v6014_v41  ;;  %v1189_v51 = vmul.f32 0.5, %v1188_v33  ;;  %1753 = vmatmul.f32.gmra.mxu2 %v1605_v43  ;;  %v1792_v42 = vpop.f32.mrf.mxu1  ;;  %v8426_v33 = vld [vmem:[#allocation118_spill] sm:$0xff] }
 0x287   :  { %v1465_v24 = vmul.f32 %v8417_v3, %v975_v25  ;;  %v8420_v23 = vsub.f32 %v8418_v5, %v8419_v6  ;;  %v8422_v36 = vsub.f32 %v8421_v47, %v8416_v52  ;;  %vm992_vm10 = vweird.f32 %v5725_v39  ;;  %v8432_v47 = vld [vmem:[#allocation83_spill] sm:$0xff] }
 0x288   :  { %v1197_v29 = vmul.f32 %v6221_v62, %v6168_v48  ;;  %1884 = vmatmul.f32.gmra.mxu3 %v1407_v8  ;;  %v1568_v31 = vadd.f32 %v5877_v49, %v1526_v60  ;;  %v1350_v35 = vadd.f32 %v5906_v2, %v1308_v40  ;;  %v985_v16 = vsel %vm984_vm9, %v5796_v56, %v981_v14  ;;  %v6251_v45 = vpop.eup %3350  ;;  %v8429_v8 = vld [vmem:[#allocation71_spill] sm:$0xff] }
 0x289   :  { %v1485_v17 = vmul.f32 %v8420_v23, %v1175_v7  ;;  %v1267_v53 = vmul.f32 %v8422_v36, %v975_v25  ;;  %v1586_v58 = vmax.f32 %v1548_v61, 0.0  ;;  %v1507_v54 = vmul.f32 %v5858_v59, %v1465_v24  ;;  %v8425_v25 = vld [vmem:[#allocation37_spill] sm:$0xff]  ;;  %v8433_v36 = vld [vmem:[#allocation135_spill] sm:$0xff] }
 0x28a   :  { %v1181_v30 = vmul.f32 %v6068_v50, %v1180_v55  ;;  %vm1183_vm11 = vweird.f32 %v6068_v50  ;;  %v1000_v34 = vsub.f32 1.5, %v6231_v1  ;;  %vm1182_vm12 = vweird.f32 %v5993_v11 }
 0x28b   :  { %v1370_v13 = vadd.f32 %v5906_v2, %v1328_v32  ;;  %v8424_v56 = vsub.f32 %v8423_v9, %v8419_v6  ;;  %v1190_v46 = vsub.f32 1.5, %v1189_v51  ;;  %1696 = vmatmul.f32.gmra.mxu0 %v1586_v58  ;;  %v1527_v27 = vmul.f32 %v5858_v59, %v1485_v17  ;;  %vm1184_vm13 = vmor %vm1182_vm12, %vm1183_vm11  ;;  %v8430_v6 = vld [vmem:[#allocation124_spill] sm:$0xff]  ;;  %v1721_v58 = vpop.f32.mrf.mxu2 }
 0x28c   :  { %v1309_v10 = vmul.f32 %v5891_v57, %v1267_v53  ;;  %v8427_v0 = vsub.f32 %v8425_v25, %v8426_v33  ;;  %v1198_v11 = vmul.f32 %v6221_v62, %v1197_v29  ;;  %v1207_v60 = vmul.f32 %v6251_v45, %v6176_v26 }
 0x28d   :  { %v1287_v22 = vmul.f32 %v8424_v56, %v1175_v7  ;;  %v1606_v28 = vmax.f32 %v1568_v31, 0.0  ;;  %v1388_v14 = vmax.f32 %v1350_v35, 0.0  ;;  %v6272_v7 = vpop.eup %3352  ;;  %v1549_v55 = vadd.f32 %v5877_v49, %v1507_v54  ;;  %v8435_v31 = vld [vmem:[#allocation139_spill] sm:$0xff] }
 0x28e   :  { %v1466_v40 = vmul.f32 %v8427_v0, %v985_v16  ;;  %v1185_v43 = vsel %vm1184_vm13, %v6068_v50, %v1181_v30  ;;  %v6276_v61 = vadd.f32 %v1849_v19, %v1718_v20  ;;  %v1793_v4 = vadd.f32 %v1792_v42, %v1661_v21  ;;  %v1664_v0 = vpop.f32.mrf.mxu0 }
 0x28f   :  { %1827 = vmatmul.f32.gmra.mxu1 %v1388_v14  ;;  %v1408_v52 = vmax.f32 %v1370_v13, 0.0  ;;  %v1329_v3 = vmul.f32 %v5891_v57, %v1287_v22  ;;  %v8428_v24 = vsub.f32 1.5, %v5868_v37  ;;  %vm993_vm14 = vweird.f32 %v8429_v8  ;;  %1756 = vmatmul.f32.gmra.mxu2 %v1606_v28  ;;  %v6293_v37 = vld [vmem:[%s7735_s9] ss:$0 sm:$0xff] }
 0x290   :  { %vm1002_vm15 = vweird.f32 %v5885_v38  ;;  %v1569_v51 = vadd.f32 %v5877_v49, %v1527_v27  ;;  %v1351_v50 = vadd.f32 %v5906_v2, %v1309_v10  ;;  %v1508_v5 = vmul.f32 %v5858_v59, %v1466_v40  ;;  %vm994_vm2 = vmor %vm992_vm10, %vm993_vm14  ;;  %v1795_v40 = vpop.f32.mrf.mxu1 }
 0x291   :  { %v991_v32 = vmul.f32 %v8429_v8, %v8428_v24  ;;  %v8431_v23 = vsub.f32 %v8430_v6, %v8426_v33  ;;  %1887 = vmatmul.f32.gmra.mxu3 %v1408_v52  ;;  %v8434_v53 = vsub.f32 %v8432_v47, %v8433_v36  ;;  %v8436_v35 = vsub.f32 %v8435_v31, %v8433_v36  ;;  %v8440_v24 = vld [vmem:[#allocation63_spill] sm:$0xff]  ;;  %v8446_v36 = vld [vmem:[#allocation138_spill] sm:$0xff] }
 0x292   :  { %v1191_v19 = vmul.f32 %v6133_v15, %v1190_v46  ;;  %vm1193_vm0 = vweird.f32 %v6133_v15  ;;  %v1017_v54 = vmul.f32 %v6272_v7, %v6014_v41  ;;  %vm1192_vm1 = vweird.f32 %v6027_v44 }
 0x293   :  { %v1268_v17 = vmul.f32 %v8431_v23, %v985_v16  ;;  %v1486_v29 = vmul.f32 %v8434_v53, %v1185_v43  ;;  %v1288_v20 = vmul.f32 %v8436_v35, %v1185_v43  ;;  %v1852_v16 = vpop.f32.mrf.mxu3  ;;  %v1587_v30 = vmax.f32 %v1549_v55, 0.0  ;;  %vm1194_vm3 = vmor %vm1192_vm1, %vm1193_vm0  ;;  %v8445_v23 = vld [vmem:[#allocation106_spill] sm:$0xff] }
 0x294   :  { %v1910_v13 = vadd.f32 %v6293_v37, %v1793_v4  ;;  %v1199_v9 = vmul.f32 0.5, %v1198_v11  ;;  %v1208_v56 = vmul.f32 %v6251_v45, %v1207_v60  ;;  %v1371_v22 = vadd.f32 %v5906_v2, %v1329_v3  ;;  %v8437_v11 = vld [vmem:[#allocation36_spill] sm:$0xff]  ;;  %v8438_v60 = vld [vmem:[#allocation51_spill] sm:$0xff] }
 0x295   :  { %v995_v21 = vsel %vm994_vm2, %v8429_v8, %v991_v32  ;;  %1699 = vmatmul.f32.gmra.mxu0 %v1587_v30  ;;  %v1607_v42 = vmax.f32 %v1569_v51, 0.0  ;;  %v1389_v46 = vmax.f32 %v1351_v50, 0.0  ;;  %v1550_v44 = vadd.f32 %v5877_v49, %v1508_v5  ;;  %v8441_v8 = vld [vmem:[#allocation100_spill] sm:$0xff]  ;;  %v8443_v50 = vld [vmem:[#allocation122_spill] sm:$0xff] }
 0x296   :  { %v3195_v27 = vmul.f32 -1.442695, %v1910_v13  ;;  %v1528_v39 = vmul.f32 %v5858_v59, %v1486_v29  ;;  %v1310_v10 = vmul.f32 %v5891_v57, %v1268_v17  ;;  %v1330_v25 = vmul.f32 %v5891_v57, %v1288_v20 }
 0x297   :  { %v1195_v33 = vsel %vm1194_vm3, %v6133_v15, %v1191_v19  ;;  %v8439_v28 = vsub.f32 %v8437_v11, %v8438_v60  ;;  %v1001_v55 = vmul.f32 %v5955_v63, %v1000_v34  ;;  %vm1003_vm4 = vweird.f32 %v5955_v63  ;;  %1830 = vmatmul.f32.gmra.mxu1 %v1389_v46  ;;  %1759 = vmatmul.f32.gmra.mxu2 %v1607_v42  ;;  %v8449_v42 = vld [vmem:[#allocation121_spill] sm:$0xff] }
 0x298   :  { %3354 = vpow2.f32 %v3195_v27  ;;  %v1018_v43 = vmul.f32 %v6272_v7, %v1017_v54  ;;  %v1200_v4 = vsub.f32 1.5, %v1199_v9  ;;  %v1409_v52 = vmax.f32 %v1371_v22, 0.0  ;;  %vm1004_vm6 = vmor %vm1002_vm15, %vm1003_vm4  ;;  %v1724_v54 = vpop.f32.mrf.mxu2  ;;  %v1798_v11 = vpop.f32.mrf.mxu1 }
 0x299   :  { %v1467_v14 = vmul.f32 %v8439_v28, %v995_v21  ;;  %v6329_v3 = vadd.f32 %v1852_v16, %v1721_v58  ;;  %v1209_v15 = vmul.f32 0.5, %v1208_v56  ;;  %v8442_v32 = vsub.f32 %v8440_v24, %v8441_v8 }
 0x29a   :  { %v8444_v1 = vsub.f32 %v8443_v50, %v8438_v60  ;;  %v1796_v34 = vadd.f32 %v1795_v40, %v1664_v0  ;;  %v1010_v6 = vsub.f32 1.5, %v6228_v18  ;;  %vm1012_vm5 = vweird.f32 %v8445_v23  ;;  %1890 = vmatmul.f32.gmra.mxu3 %v1409_v52  ;;  %v1667_v40 = vpop.f32.mrf.mxu0  ;;  %v3551_v23 = vld [vmem:[%s7727_s1 + $0x128] sm:$0xff] }
 0x29b   :  { %v1487_v51 = vmul.f32 %v8442_v32, %v1195_v33  ;;  %v1588_v17 = vmax.f32 %v1550_v44, 0.0  ;;  %v1352_v47 = vadd.f32 %v5906_v2, %v1310_v10  ;;  %v8447_v53 = vsub.f32 %v8446_v36, %v8441_v8  ;;  %v1855_v30 = vpop.f32.mrf.mxu3  ;;  %v8453_v8 = vld [vmem:[#allocation116_spill] sm:$0xff]  ;;  %v8454_v32 = vld [vmem:[#allocation95_spill] sm:$0xff] }
 0x29c   :  { %v1269_v5 = vmul.f32 %v8444_v1, %v995_v21  ;;  %v1570_v31 = vadd.f32 %v5877_v49, %v1528_v39  ;;  %v1372_v35 = vadd.f32 %v5906_v2, %v1330_v25  ;;  %v1509_v18 = vmul.f32 %v5858_v59, %v1467_v14  ;;  %v8448_v21 = vld [vmem:[#allocation44_spill] sm:$0xff]  ;;  %v8451_v14 = vld [vmem:[#allocation127_spill] sm:$0xff] }
 0x29d   :  { %v1289_v29 = vmul.f32 %v8447_v53, %v1195_v33  ;;  %v1005_v20 = vsel %vm1004_vm6, %v5955_v63, %v1001_v55  ;;  %v6351_v19 = vmul.f32 0.5, %v1018_v43  ;;  %v1201_v58 = vmul.f32 %v6221_v62, %v1200_v4  ;;  %1702 = vmatmul.f32.gmra.mxu0 %v1588_v17  ;;  %v3550_v36 = vld [vmem:[%s7727_s1 + $0x88] sm:$0xff] }
 0x29e   :  { %vm1203_vm7 = vweird.f32 %v6221_v62  ;;  %v1911_v16 = vadd.f32 %v6293_v37, %v1796_v34  ;;  %v3355_v38 = vpop.eup %3354  ;;  %vm1202_vm8 = vweird.f32 %v6168_v48  ;;  %v1210_v13 = vsub.f32 1.5, %v1209_v15  ;;  %v8456_v34 = vld [vmem:[#allocation137_spill] sm:$0xff]  ;;  %v8458_v53 = vld [vmem:[#allocation56_spill] sm:$0xff] }
 0x29f   :  { %v1529_v9 = vmul.f32 %v5858_v59, %v1487_v51  ;;  %v1311_v56 = vmul.f32 %v5891_v57, %v1269_v5  ;;  %v1390_v63 = vmax.f32 %v1352_v47, 0.0  ;;  %v6359_v22 = vadd.f32 1.0, %v3355_v38  ;;  %vm1204_vm9 = vmor %vm1202_vm8, %vm1203_vm7 }
 0x2a0   :  { %v8450_v46 = vsub.f32 %v8448_v21, %v8449_v42  ;;  %v3196_v27 = vmul.f32 -1.442695, %v1911_v16  ;;  %v1608_v39 = vmax.f32 %v1570_v31, 0.0  ;;  %v1410_v10 = vmax.f32 %v1372_v35, 0.0  ;;  %v8459_v31 = vld [vmem:[#allocation98_spill] sm:$0xff] }
 0x2a1   :  { %v1551_v25 = vadd.f32 %v5877_v49, %v1509_v18  ;;  %v1331_v48 = vmul.f32 %v5891_v57, %v1289_v29  ;;  %1833 = vmatmul.f32.gmra.mxu1 %v1390_v63  ;;  %3356 = vrcp.f32 %v6359_v22  ;;  %v1205_v33 = vsel %vm1204_vm9, %v6221_v62, %v1201_v58 }
 0x2a2   :  { %v1468_v44 = vmul.f32 %v8450_v46, %v1005_v20  ;;  %v1011_v0 = vmul.f32 %v5914_v12, %v1010_v6  ;;  %vm1013_vm10 = vweird.f32 %v5914_v12  ;;  %1762 = vmatmul.f32.gmra.mxu2 %v1608_v39  ;;  %v1571_v60 = vadd.f32 %v5877_v49, %v1529_v9  ;;  %1893 = vmatmul.f32.gmra.mxu3 %v1410_v10 }
 0x2a3   :  { %v1353_v28 = vadd.f32 %v5906_v2, %v1311_v56  ;;  %v8452_v55 = vsub.f32 %v8451_v14, %v8449_v42  ;;  %3358 = vpow2.f32 %v3196_v27  ;;  %v1211_v62 = vmul.f32 %v6251_v45, %v1210_v13  ;;  %vm1014_vm12 = vmor %vm1012_vm5, %vm1013_vm10  ;;  %v1801_v14 = vpop.f32.mrf.mxu1 }
 0x2a4   :  { %v1510_v4 = vmul.f32 %v5858_v59, %v1468_v44  ;;  %vm1213_vm11 = vweird.f32 %v6251_v45  ;;  %v6380_v52 = vadd.f32 %v1855_v30, %v1724_v54  ;;  %v1589_v15 = vmax.f32 %v1551_v25, 0.0  ;;  %v1727_v54 = vpop.f32.mrf.mxu2  ;;  %v1858_v30 = vpop.f32.mrf.mxu3 }
 0x2a5   :  { %v1270_v43 = vmul.f32 %v8452_v55, %v1005_v20  ;;  %v1373_v24 = vadd.f32 %v5906_v2, %v1331_v48  ;;  %v8455_v51 = vsub.f32 %v8453_v8, %v8454_v32  ;;  %v1799_v1 = vadd.f32 %v1798_v11, %v1667_v40  ;;  %v3552_v48 = vld [vmem:[%s7726_s0 + $0x128] sm:$0xff] }
 0x2a6   :  { %v1020_v5 = vsub.f32 1.5, %v6351_v19  ;;  %vm1212_vm13 = vweird.f32 %v6176_v26  ;;  %v8457_v6 = vsub.f32 %v8456_v34, %v8454_v32  ;;  %v1015_v47 = vsel %vm1014_vm12, %v5914_v12, %v1011_v0  ;;  %1705 = vmatmul.f32.gmra.mxu0 %v1589_v15 }
 0x2a7   :  { %v1488_v50 = vmul.f32 %v8455_v51, %v1205_v33  ;;  %v1431_v29 = vsub.f32 %v3550_v36, %v8458_v53  ;;  %v1451_v35 = vsub.f32 %v3551_v23, %v8459_v31  ;;  %v1609_v26 = vmax.f32 %v1571_v60, 0.0  ;;  %vm1214_vm14 = vmor %vm1212_vm13, %vm1213_vm11  ;;  %v6407_v12 = vpop.eup %3356 }
 0x2a8   :  { %v1290_v17 = vmul.f32 %v8457_v6, %v1205_v33  ;;  %v1912_v18 = vadd.f32 %v6293_v37, %v1799_v1  ;;  %v1391_v20 = vmax.f32 %v1353_v28, 0.0  ;;  %v1552_v19 = vadd.f32 %v5877_v49, %v1510_v4  ;;  %v1670_v28 = vpop.f32.mrf.mxu0  ;;  %v3553_v1 = vld [vmem:[%s7726_s0 + $0x90] sm:$0xff]  ;;  %v8463_v6 = vld [vmem:[#allocation42_spill] sm:$0xff] }
 0x2a9   :  { %v1312_v58 = vmul.f32 %v5891_v57, %v1270_v43  ;;  %v1215_v16 = vsel %vm1214_vm14, %v6251_v45, %v1211_v62  ;;  %v3359_v38 = vpop.eup %3358  ;;  %v1411_v13 = vmax.f32 %v1373_v24, 0.0  ;;  %v1530_v9 = vmul.f32 %v5858_v59, %v1488_v50  ;;  %v8460_v45 = vld [vmem:[#allocation126_spill] sm:$0xff] }
 0x2aa   :  { %v1469_v56 = vmul.f32 %v1431_v29, %v1015_v47  ;;  %v3197_v63 = vmul.f32 -1.442695, %v1912_v18  ;;  %1836 = vmatmul.f32.gmra.mxu1 %v1391_v20  ;;  %v1332_v21 = vmul.f32 %v5891_v57, %v1290_v17  ;;  %v6414_v42 = vadd.f32 1.0, %v3359_v38  ;;  %1765 = vmatmul.f32.gmra.mxu2 %v1609_v26 }
 0x2ab   :  { %v1021_v46 = vmul.f32 %v6272_v7, %v1020_v5  ;;  %vm1023_vm15 = vweird.f32 %v6272_v7  ;;  %v1489_v44 = vmul.f32 %v1451_v35, %v1215_v16  ;;  %v8461_v27 = vsub.f32 %v8460_v45, %v8458_v53  ;;  %1896 = vmatmul.f32.gmra.mxu3 %v1411_v13 }
 0x2ac   :  { %v6421_v10 = vadd.f32 %v1858_v30, %v1727_v54  ;;  %v2101_v25 = vmul.f32 %v6407_v12, %v6359_v22  ;;  %v1253_v33 = vsub.f32 %v3552_v48, %v8459_v31  ;;  %vm1022_vm0 = vweird.f32 %v6014_v41  ;;  %v1861_v54 = vpop.f32.mrf.mxu3 }
 0x2ad   :  { %v1271_v39 = vmul.f32 %v8461_v27, %v1015_v47  ;;  %v1590_v0 = vmax.f32 %v1552_v19, 0.0  ;;  %v1354_v40 = vadd.f32 %v5906_v2, %v1312_v58  ;;  %v1572_v11 = vadd.f32 %v5877_v49, %v1530_v9  ;;  %vm1024_vm1 = vmor %vm1022_vm0, %vm1023_vm15 }
 0x2ae   :  { %v1511_v60 = vmul.f32 %v5858_v59, %v1469_v56  ;;  %3360 = vpow2.f32 %v3197_v63  ;;  %v2102_v55 = vsub.f32 1.0, %v2101_v25  ;;  %v1374_v43 = vadd.f32 %v5906_v2, %v1332_v21  ;;  %v3555_v21 = vld [vmem:[%s7729_s3] ss:$0 sm:$0xff]  ;;  %v1804_v25 = vpop.f32.mrf.mxu1 }
 0x2af   :  { %3362 = vrcp.f32 %v6414_v42  ;;  %v1291_v41 = vmul.f32 %v1253_v33, %v1215_v16  ;;  %v1025_v4 = vsel %vm1024_vm1, %v6272_v7, %v1021_v46  ;;  %1708 = vmatmul.f32.gmra.mxu0 %v1590_v0  ;;  %v1531_v62 = vmul.f32 %v5858_v59, %v1489_v44  ;;  %v8462_v7 = vld [vmem:[#allocation120_spill] sm:$0xff] }
 0x2b0   :  { %v1313_v15 = vmul.f32 %v5891_v57, %v1271_v39  ;;  %v2103_v24 = vmul.f32 %v6407_v12, %v2102_v55  ;;  %v2111_v8 = vand.u32 2147483648, %v6359_v22  ;;  %v1392_v32 = vmax.f32 %v1354_v40, 0.0  ;;  %v1673_v39 = vpop.f32.mrf.mxu0 }
 0x2b1   :  { %v1802_v51 = vadd.f32 %v1801_v14, %v1670_v28  ;;  %vm2106_vm2 = vweird.f32 %v6407_v12  ;;  %v2109_v50 = vand.u32 2147483647, %v6359_v22  ;;  %v1234_v5 = vsub.f32 %v3553_v1, %v8462_v7 }
 0x2b2   :  { %v1610_v34 = vmax.f32 %v1572_v11, 0.0  ;;  %v1553_v59 = vadd.f32 %v5877_v49, %v1511_v60  ;;  %v8464_v17 = vsub.f32 %v8463_v6, %v8462_v7  ;;  %1839 = vmatmul.f32.gmra.mxu1 %v1392_v32  ;;  %v1412_v36 = vmax.f32 %v1374_v43, 0.0  ;;  %v3557_v60 = vld [vmem:[%s7731_s5] ss:$0 sm:$0xff] }
 0x2b3   :  { %v1333_v53 = vmul.f32 %v5891_v57, %v1291_v41  ;;  %v2104_v29 = vadd.f32 %v6407_v12, %v2103_v24  ;;  %vm2105_vm3 = vweird.f32 %v6359_v22  ;;  %v1573_v31 = vadd.f32 %v5877_v49, %v1531_v62  ;;  %v1730_v57 = vpop.f32.mrf.mxu2  ;;  %v3554_v49 = vld [vmem:[%s7730_s4] ss:$0 sm:$0xff] }
 0x2b4   :  { %v1470_v47 = vmul.f32 %v8464_v17, %v1025_v4  ;;  %v3361_v23 = vpop.eup %3360  ;;  %1768 = vmatmul.f32.gmra.mxu2 %v1610_v34  ;;  %v1355_v35 = vadd.f32 %v5906_v2, %v1313_v15  ;;  %vm2107_vm4 = vmor %vm2105_vm3, %vm2106_vm2  ;;  %v2112_v26 = vor.u32 1.1754944e-38, %v2111_v8  ;;  %1899 = vmatmul.f32.gmra.mxu3 %v1412_v36  ;;  %v1272_v20 = vmul.f32 %v1234_v5, %v1025_v4  ;;  %v1864_v1 = vpop.f32.mrf.mxu3 }
 0x2b5   :  { %v3363_v18 = vpop.eup %3362  ;;  %v1913_v19 = vadd.f32 %v6293_v37, %v1802_v51  ;;  %v2108_v58 = vsel %vm2107_vm4, %v6407_v12, %v2104_v29  ;;  %vm2110_vm5 = vcmp.eq.f32.partialorder %v2109_v50, 8.507059e+37  ;;  %v1591_v22 = vmax.f32 %v1553_v59, 0.0 }
 0x2b6   :  { %v1512_v16 = vmul.f32 %v3554_v49, %v1470_v47  ;;  %v2113_v30 = vsel %vm2110_vm5, %v2112_v26, %v2108_v58  ;;  %vm2670_vm6 = vcmask 523264   ;;  %v1375_v38 = vadd.f32 %v5906_v2, %v1333_v53  ;;  %v3556_v2 = vld [vmem:[%s7732_s6] ss:$0 sm:$0xff] }
 0x2b7   :  { %v6465_v13 = vadd.f32 %v1861_v54, %v1730_v57  ;;  %v2671_v9 = vsel %vm2670_vm6, %v2113_v30, 0.0  ;;  %1711 = vmatmul.f32.gmra.mxu0 %v1591_v22  ;;  %v6468_v56 = vadd.f32 1.0, %v3361_v23  ;;  %v2116_v12 = vmul.f32 %v3363_v18, %v6414_v42 }
 0x2b8   :  { %2672 = vadd.xlane.f32.xlu2 %v2671_v9  ;;  %v1393_v63 = vmax.f32 %v1355_v35, 0.0  ;;  %v1314_v46 = vmul.f32 %v3555_v21, %v1272_v20  ;;  %v3198_v44 = vmul.f32 -1.442695, %v1913_v19  ;;  %v1611_v45 = vmax.f32 %v1573_v31, 0.0  ;;  %v1676_v59 = vpop.f32.mrf.mxu0  ;;  %v1807_v6 = vpop.f32.mrf.mxu1 }
 0x2b9   :  { %v1554_v27 = vadd.f32 %v3556_v2, %v1512_v16  ;;  %v2117_v48 = vsub.f32 1.0, %v2116_v12  ;;  %v1413_v33 = vmax.f32 %v1375_v38, 0.0  ;;  %v2126_v0 = vand.u32 2147483648, %v6414_v42 }
 0x2ba   :  { %1842 = vmatmul.f32.gmra.mxu1 %v1393_v63  ;;  %3364 = vrcp.f32 %v6468_v56  ;;  %vm2121_vm7 = vweird.f32 %v3363_v18  ;;  %v2124_v11 = vand.u32 2147483647, %v6414_v42  ;;  %v1356_v28 = vadd.f32 %v3557_v60, %v1314_v46 }
 0x2bb   :  { %v2118_v40 = vmul.f32 %v3363_v18, %v2117_v48  ;;  %3366 = vpow2.f32 %v3198_v44  ;;  %v1805_v14 = vadd.f32 %v1804_v25, %v1673_v39  ;;  %v1592_v55 = vmax.f32 %v1554_v27, 0.0  ;;  %v1733_v50 = vpop.f32.mrf.mxu2 }
 0x2bc   :  { %1771 = vmatmul.f32.gmra.mxu2 %v1611_v45  ;;  %1902 = vmatmul.f32.gmra.mxu3 %v1413_v33  ;;  %vm2120_vm8 = vweird.f32 %v6414_v42  ;;  %v2127_v41 = vor.u32 1.1754944e-38, %v2126_v0  ;;  %vm2125_vm10 = vcmp.eq.f32.partialorder %v2124_v11, 8.507059e+37  ;;  %v1394_v62 = vmax.f32 %v1356_v28, 0.0 }
 0x2bd   :  { %v2119_v43 = vadd.f32 %v3363_v18, %v2118_v40  ;;  %vm2122_vm9 = vmor %vm2120_vm8, %vm2121_vm7  ;;  %v1914_v15 = vadd.f32 %v6293_v37, %v1805_v14  ;;  %v6486_v7 = vadd.f32 %v1864_v1, %v1733_v50  ;;  %v1808_v47 = vadd.f32 %v1807_v6, %v1676_v59 }
 0x2be   :  { %v2141_v36 = vand.u32 2147483648, %v6468_v56  ;;  %v2139_v29 = vand.u32 2147483647, %v6468_v56  ;;  %vm2135_vm12 = vweird.f32 %v6468_v56  ;;  %v1929_v27 = vadd.f32 %v6293_v37, %v6276_v61 }
 0x2bf   :  { %1714 = vmatmul.f32.gmra.mxu0 %v1592_v55  ;;  %v2123_v4 = vsel %vm2122_vm9, %v3363_v18, %v2119_v43  ;;  %v3199_v42 = vmul.f32 -1.442695, %v1914_v15  ;;  %v1915_v23 = vadd.f32 %v6293_v37, %v1808_v47  ;;  %v1931_v6 = vadd.f32 %v6293_v37, %v6380_v52 }
 0x2c0   :  { %v2128_v24 = vsel %vm2125_vm10, %v2127_v41, %v2123_v4  ;;  %v3365_v8 = vpop.eup %3364  ;;  %v2142_v35 = vor.u32 1.1754944e-38, %v2141_v36  ;;  %vm2140_vm14 = vcmp.eq.f32.partialorder %v2139_v29, 8.507059e+37  ;;  %v3214_v60 = vmul.f32 -1.442695, %v1929_v27 }
 0x2c1   :  { %v2674_v32 = vsel %vm2670_vm6, %v2128_v24, 0.0  ;;  %v3367_v51 = vpop.eup %3366  ;;  %v2131_v34 = vmul.f32 %v3365_v8, %v6468_v56  ;;  %3368 = vpow2.f32 %v3199_v42  ;;  %vm2136_vm11 = vweird.f32 %v3365_v8  ;;  %v1867_v49 = vpop.f32.mrf.mxu3 }
 0x2c2   :  { %1845 = vmatmul.f32.gmra.mxu1 %v1394_v62  ;;  %2675 = vadd.xlane.f32.xlu0 %v2674_v32  ;;  %v2065_v5 = vadd.f32 1.0, %v3367_v51  ;;  %vm2137_vm13 = vmor %vm2135_vm12, %vm2136_vm11  ;;  %v3200_v57 = vmul.f32 -1.442695, %v1915_v23  ;;  %v1930_v51 = vadd.f32 %v6293_v37, %v6329_v3 }
 0x2c3   :  { %v2132_v17 = vsub.f32 1.0, %v2131_v34  ;;  %v1736_v22 = vpop.f32.mrf.mxu2 }
 0x2c4   :  { %3370 = vrcp.f32 %v2065_v5  ;;  %v6494_v54 = vadd.f32 %v1867_v49, %v1736_v22  ;;  %v2156_v12 = vand.u32 2147483648, %v2065_v5  ;;  %v2154_v46 = vand.u32 2147483647, %v2065_v5 }
 0x2c5   :  { %v2133_v53 = vmul.f32 %v3365_v8, %v2132_v17  ;;  %3372 = vpow2.f32 %v3200_v57  ;;  %vm2150_vm0 = vweird.f32 %v2065_v5  ;;  %v3215_v36 = vmul.f32 -1.442695, %v1930_v51 }
 0x2c6   :  { %v2157_v39 = vor.u32 1.1754944e-38, %v2156_v12  ;;  %vm2155_vm2 = vcmp.eq.f32.partialorder %v2154_v46, 8.507059e+37 }
 0x2c7   :  { %v2134_v31 = vadd.f32 %v3365_v8, %v2133_v53  ;;  %v3369_v18 = vpop.eup %3368  ;;  %v1679_v9 = vpop.f32.mrf.mxu0 }
 0x2c8   :  { %v2066_v16 = vadd.f32 1.0, %v3369_v18  ;;  %v1810_v56 = vpop.f32.mrf.mxu1 }
 0x2c9   :  { %v2138_v26 = vsel %vm2137_vm13, %v3365_v8, %v2134_v31  ;;  %v1811_v63 = vadd.f32 %v1810_v56, %v1679_v9  ;;  %v3216_v31 = vmul.f32 -1.442695, %v1931_v6 }
 0x2ca   :  { %v2143_v20 = vsel %vm2140_vm14, %v2142_v35, %v2138_v26  ;;  %v3371_v19 = vpop.eup %3370  ;;  %3374 = vrcp.f32 %v2066_v16  ;;  %v2171_v15 = vand.u32 2147483648, %v2066_v16  ;;  %v2169_v32 = vand.u32 2147483647, %v2066_v16 }
 0x2cb   :  { %v2677_v58 = vsel %vm2670_vm6, %v2143_v20, 0.0  ;;  %v2146_v30 = vmul.f32 %v3371_v19, %v2065_v5  ;;  %vm2151_vm15 = vweird.f32 %v3371_v19  ;;  %v1916_v44 = vadd.f32 %v6293_v37, %v1811_v63  ;;  %v3373_v2 = vpop.eup %3372 }
 0x2cc   :  { %2678 = vadd.xlane.f32.xlu1 %v2677_v58  ;;  %vm2152_vm1 = vmor %vm2150_vm0, %vm2151_vm15  ;;  %v6499_v40 = vadd.f32 1.0, %v3373_v2  ;;  %vm2165_vm4 = vweird.f32 %v2066_v16  ;;  %v2172_v34 = vor.u32 1.1754944e-38, %v2171_v15  ;;  %vm2170_vm7 = vcmp.eq.f32.partialorder %v2169_v32, 8.507059e+37 }
 0x2cd   :  { %v2147_v38 = vsub.f32 1.0, %v2146_v30  ;;  %v3201_v25 = vmul.f32 -1.442695, %v1916_v44  ;;  %v1932_v20 = vadd.f32 %v6293_v37, %v6421_v10  ;;  %v1934_v10 = vadd.f32 %v6293_v37, %v6486_v7 }
 0x2ce   :  { %v2186_v18 = vand.u32 2147483648, %v6499_v40  ;;  %v2184_v58 = vand.u32 2147483647, %v6499_v40  ;;  %vm2180_vm9 = vweird.f32 %v6499_v40 }
 0x2cf   :  { %v2148_v21 = vmul.f32 %v3371_v19, %v2147_v38  ;;  %3376 = vpow2.f32 %v3201_v25  ;;  %v1739_v28 = vpop.f32.mrf.mxu2  ;;  %v3217_v63 = vmul.f32 -1.442695, %v1932_v20 }
 0x2d0   :  { %v3375_v33 = vpop.eup %3374  ;;  %v1870_v14 = vpop.f32.mrf.mxu3  ;;  %3378 = vrcp.f32 %v6499_v40  ;;  %v2187_v12 = vor.u32 1.1754944e-38, %v2186_v18  ;;  %vm2185_vm11 = vcmp.eq.f32.partialorder %v2184_v58, 8.507059e+37 }
 0x2d1   :  { %v2149_v45 = vadd.f32 %v3371_v19, %v2148_v21  ;;  %v6502_v55 = vadd.f32 %v1870_v14, %v1739_v28  ;;  %v2161_v43 = vmul.f32 %v3375_v33, %v2066_v16  ;;  %3380 = vpow2.f32 %v3214_v60 }
 0x2d2   :  { %vm2166_vm3 = vweird.f32 %v3375_v33  ;;  %v1933_v16 = vadd.f32 %v6293_v37, %v6465_v13  ;;  %v1935_v13 = vadd.f32 %v6293_v37, %v6494_v54 }
 0x2d3   :  { %v2153_v48 = vsel %vm2152_vm1, %v3371_v19, %v2149_v45  ;;  %v2162_v61 = vsub.f32 1.0, %v2161_v43  ;;  %vm2167_vm5 = vmor %vm2165_vm4, %vm2166_vm3 }
 0x2d4   :  { %v2158_v0 = vsel %vm2155_vm2, %v2157_v39, %v2153_v48  ;;  %v1682_v4 = vpop.f32.mrf.mxu0  ;;  %v3218_v7 = vmul.f32 -1.442695, %v1933_v16  ;;  %v3219_v48 = vmul.f32 -1.442695, %v1934_v10  ;;  %v3220_v28 = vmul.f32 -1.442695, %v1935_v13 }
 0x2d5   :  { %v2680_v11 = vsel %vm2670_vm6, %v2158_v0, 0.0  ;;  %v3377_v41 = vpop.eup %3376  ;;  %v1813_v62 = vpop.f32.mrf.mxu1  ;;  %v2163_v8 = vmul.f32 %v3375_v33, %v2162_v61 }
 0x2d6   :  { %2681 = vadd.xlane.f32.xlu2 %v2680_v11  ;;  %v1814_v24 = vadd.f32 %v1813_v62, %v1682_v4  ;;  %v6507_v50 = vadd.f32 1.0, %v3377_v41  ;;  %v3379_v5 = vpop.eup %3378 }
 0x2d7   :  { %v2164_v42 = vadd.f32 %v3375_v33, %v2163_v8  ;;  %v3381_v59 = vpop.eup %3380  ;;  %v2176_v29 = vmul.f32 %v3379_v5, %v6499_v40  ;;  %vm2181_vm8 = vweird.f32 %v3379_v5 }
 0x2d8   :  { %v1917_v1 = vadd.f32 %v6293_v37, %v1814_v24  ;;  %3382 = vrcp.f32 %v6507_v50  ;;  %v6515_v23 = vadd.f32 1.0, %v3381_v59  ;;  %vm2182_vm10 = vmor %vm2180_vm9, %vm2181_vm8  ;;  %v2201_v40 = vand.u32 2147483648, %v6507_v50 }
 0x2d9   :  { %v2168_v47 = vsel %vm2167_vm5, %v3375_v33, %v2164_v42  ;;  %v2177_v35 = vsub.f32 1.0, %v2176_v29  ;;  %v2199_v60 = vand.u32 2147483647, %v6507_v50  ;;  %vm2195_vm13 = vweird.f32 %v6507_v50 }
 0x2da   :  { %v3202_v17 = vmul.f32 -1.442695, %v1917_v1  ;;  %v2173_v3 = vsel %vm2170_vm7, %v2172_v34, %v2168_v47  ;;  %v2202_v24 = vor.u32 1.1754944e-38, %v2201_v40  ;;  %vm2390_vm4 = vweird.f32 %v6515_v23 }
 0x2db   :  { %v2683_v53 = vsel %vm2670_vm6, %v2173_v3, 0.0  ;;  %v2178_v57 = vmul.f32 %v3379_v5, %v2177_v35  ;;  %vm2200_vm15 = vcmp.eq.f32.partialorder %v2199_v60, 8.507059e+37 }
 0x2dc   :  { %3384 = vpow2.f32 %v3202_v17  ;;  %2684 = vadd.xlane.f32.xlu0 %v2683_v53 }
 0x2dd   :  { %3386 = vpow2.f32 %v3215_v36  ;;  %v2179_v38 = vadd.f32 %v3379_v5, %v2178_v57 }
 0x2de   :  { %v6517_v26 = vpop.f32.mrf.mxu2  ;;  %v3383_v22 = vpop.eup %3382  ;;  %3388 = vrcp.f32 %v6515_v23 }
 0x2df   :  { %v6522_v19 = vpop.f32.mrf.mxu3  ;;  %3390 = vpow2.f32 %v3216_v31  ;;  %v2183_v21 = vsel %vm2182_vm10, %v3379_v5, %v2179_v38  ;;  %v2191_v46 = vmul.f32 %v3383_v22, %v6507_v50  ;;  %vm2196_vm12 = vweird.f32 %v3383_v22 }
 0x2e0   :  { %v2188_v2 = vsel %vm2185_vm11, %v2187_v12, %v2183_v21  ;;  %vm2197_vm14 = vmor %vm2195_vm13, %vm2196_vm12  ;;  %v2394_v21 = vand.u32 2147483647, %v6515_v23 }
 0x2e1   :  { %v1685_v52 = vpop.f32.mrf.mxu0  ;;  %v2686_v27 = vsel %vm2670_vm6, %v2188_v2, 0.0  ;;  %v2192_v39 = vsub.f32 1.0, %v2191_v46 }
 0x2e2   :  { %v3385_v49 = vpop.eup %3384  ;;  %2687 = vadd.xlane.f32.xlu1 %v2686_v27  ;;  %vm6597_vm7 = vcmp.eq.f32.partialorder %v2394_v21, 8.507059e+37 }
 0x2e3   :  { %v1816_v30 = vpop.f32.mrf.mxu1  ;;  %v6531_v9 = vadd.f32 1.0, %v3385_v49  ;;  %v3387_v44 = vpop.eup %3386  ;;  %v2193_v54 = vmul.f32 %v3383_v22, %v2192_v39 }
 0x2e4   :  { %v1817_v56 = vadd.f32 %v1816_v30, %v1685_v52  ;;  %v6539_v25 = vpop.eup %3388  ;;  %v6548_v62 = vadd.f32 1.0, %v3387_v44  ;;  %v1936_v44 = vadd.f32 %v6293_v37, %v6502_v55 }
 0x2e5   :  { %3392 = vrcp.f32 %v6531_v9  ;;  %v3391_v11 = vpop.eup %3390  ;;  %v2194_v41 = vadd.f32 %v3383_v22, %v2193_v54  ;;  %v2386_v59 = vmul.f32 %v6539_v25, %v6515_v23  ;;  %v2216_v36 = vand.u32 2147483648, %v6531_v9 }
 0x2e6   :  { %v1918_v45 = vadd.f32 %v6293_v37, %v1817_v56  ;;  %3394 = vpow2.f32 %v3217_v63  ;;  %v6551_v51 = vadd.f32 1.0, %v3391_v11  ;;  %v2214_v31 = vand.u32 2147483647, %v6531_v9 }
 0x2e7   :  { %v2198_v8 = vsel %vm2197_vm14, %v3383_v22, %v2194_v41  ;;  %vm2210_vm1 = vweird.f32 %v6531_v9  ;;  %v2387_v22 = vsub.f32 1.0, %v2386_v59  ;;  %v2217_v38 = vor.u32 1.1754944e-38, %v2216_v36 }
 0x2e8   :  { %v3203_v33 = vmul.f32 -1.442695, %v1918_v45  ;;  %v2203_v42 = vsel %vm2200_vm15, %v2202_v24, %v2198_v8  ;;  %vm2215_vm3 = vcmp.eq.f32.partialorder %v2214_v31, 8.507059e+37  ;;  %vm2391_vm5 = vweird.f32 %v6539_v25 }
 0x2e9   :  { %v2689_v50 = vsel %vm2670_vm6, %v2203_v42, 0.0  ;;  %v2388_v45 = vmul.f32 %v6539_v25, %v2387_v22  ;;  %v2411_v11 = vand.u32 2147483648, %v6548_v62  ;;  %v3221_v54 = vmul.f32 -1.442695, %v1936_v44  ;;  %vm6626_vm9 = vmor %vm2390_vm4, %vm2391_vm5 }
 0x2ea   :  { %v1688_v0 = vpop.f32.mrf.mxu0  ;;  %3396 = vpow2.f32 %v3203_v33  ;;  %2690 = vadd.xlane.f32.xlu2 %v2689_v50  ;;  %v2409_v36 = vand.u32 2147483647, %v6548_v62  ;;  %vm2405_vm11 = vweird.f32 %v6548_v62  ;;  %vm2420_vm14 = vweird.f32 %v6551_v51 }
 0x2eb   :  { %v6543_v14 = vpop.f32.mrf.mxu2  ;;  %3398 = vpow2.f32 %v3218_v7  ;;  %v3393_v4 = vpop.eup %3392  ;;  %v2389_v41 = vadd.f32 %v6539_v25, %v2388_v45  ;;  %v6643_v22 = vor.u32 1.1754944e-38, %v2411_v11 }
 0x2ec   :  { %3400 = vpow2.f32 %v3219_v48  ;;  %v2206_v32 = vmul.f32 %v3393_v4, %v6531_v9  ;;  %v3395_v5 = vpop.eup %3394  ;;  %vm2211_vm0 = vweird.f32 %v3393_v4  ;;  %v2396_v48 = vand.u32 2147483648, %v6515_v23 }
 0x2ed   :  { %v6545_v43 = vpop.f32.mrf.mxu3  ;;  %v1819_v61 = vpop.f32.mrf.mxu1  ;;  %3402 = vpow2.f32 %v3220_v28  ;;  %v6563_v52 = vadd.f32 1.0, %v3395_v5  ;;  %vm2212_vm2 = vmor %vm2210_vm1, %vm2211_vm0 }
 0x2ee   :  { %v1820_v15 = vadd.f32 %v1819_v61, %v1688_v0  ;;  %v2207_v34 = vsub.f32 1.0, %v2206_v32  ;;  %3404 = vrcp.f32 %v6548_v62  ;;  %v1877_v40 = vadd.f32 %v6545_v43, %v6543_v14 }
 0x2ef   :  { %3406 = vrcp.f32 %v6551_v51  ;;  %vm2435_vm5 = vweird.f32 %v6563_v52 }
 0x2f0   :  { %v1919_v1 = vadd.f32 %v6293_v37, %v1820_v15  ;;  %v3397_v6 = vpop.eup %3396  ;;  %v2208_v29 = vmul.f32 %v3393_v4, %v2207_v34  ;;  %v1874_v15 = vadd.f32 %v6522_v19, %v6517_v26 }
 0x2f1   :  { %v3399_v3 = vpop.eup %3398  ;;  %v6559_v53 = vadd.f32 1.0, %v3397_v6 }
 0x2f2   :  { %v3204_v17 = vmul.f32 -1.442695, %v1919_v1  ;;  %v3401_v35 = vpop.eup %3400  ;;  %v2209_v58 = vadd.f32 %v3393_v4, %v2208_v29  ;;  %v6571_v16 = vadd.f32 1.0, %v3399_v3  ;;  %v1937_v3 = vadd.f32 %v6293_v37, %v1874_v15 }
 0x2f3   :  { %3408 = vrcp.f32 %v6559_v53  ;;  %v3403_v49 = vpop.eup %3402  ;;  %v6574_v10 = vadd.f32 1.0, %v3401_v35  ;;  %v2231_v1 = vand.u32 2147483648, %v6559_v53  ;;  %v2229_v26 = vand.u32 2147483647, %v6559_v53 }
 0x2f4   :  { %v1691_v47 = vpop.f32.mrf.mxu0  ;;  %v6565_v18 = vpop.f32.mrf.mxu2  ;;  %3410 = vpow2.f32 %v3204_v17  ;;  %v2213_v56 = vsel %vm2212_vm2, %v3393_v4, %v2209_v58  ;;  %v6581_v46 = vadd.f32 1.0, %v3403_v49  ;;  %v2393_v17 = vsel %vm6626_vm9, %v6539_v25, %v2389_v41 }
 0x2f5   :  { %v6576_v12 = vpop.eup %3404  ;;  %3412 = vrcp.f32 %v6563_v52  ;;  %v2218_v9 = vsel %vm2215_vm3, %v2217_v38, %v2213_v56  ;;  %vm2225_vm10 = vweird.f32 %v6559_v53  ;;  %v2426_v25 = vand.u32 2147483648, %v6551_v51 }
 0x2f6   :  { %v6568_v20 = vpop.f32.mrf.mxu3  ;;  %v2692_v13 = vsel %vm2670_vm6, %v2218_v9, 0.0  ;;  %v6587_v2 = vpop.eup %3406  ;;  %3414 = vrcp.f32 %v6571_v16  ;;  %v2401_v55 = vmul.f32 %v6576_v12, %v6548_v62  ;;  %vm2230_vm13 = vcmp.eq.f32.partialorder %v2229_v26, 8.507059e+37 }
 0x2f7   :  { %2693 = vadd.xlane.f32.xlu0 %v2692_v13  ;;  %3416 = vrcp.f32 %v6574_v10  ;;  %v2416_v42 = vmul.f32 %v6587_v2, %v6551_v51  ;;  %v2424_v38 = vand.u32 2147483647, %v6551_v51  ;;  %v3222_v45 = vmul.f32 -1.442695, %v1937_v3 }
 0x2f8   :  { %v1822_v57 = vpop.f32.mrf.mxu1  ;;  %3418 = vrcp.f32 %v6581_v46  ;;  %v2402_v5 = vsub.f32 1.0, %v2401_v55  ;;  %vm2406_vm15 = vweird.f32 %v6576_v12  ;;  %vm2421_vm0 = vweird.f32 %v6587_v2 }
 0x2f9   :  { %v1823_v30 = vadd.f32 %v1822_v57, %v1691_v47  ;;  %v3409_v39 = vpop.eup %3408  ;;  %v2397_v47 = vor.u32 1.1754944e-38, %v2396_v48  ;;  %v2232_v57 = vor.u32 1.1754944e-38, %v2231_v1  ;;  %v2417_v58 = vsub.f32 1.0, %v2416_v42  ;;  %vm6695_vm4 = vmor %vm2405_vm11, %vm2406_vm15 }
 0x2fa   :  { %v3411_v33 = vpop.eup %3410  ;;  %v2221_v0 = vmul.f32 %v3409_v39, %v6559_v53  ;;  %vm2226_vm8 = vweird.f32 %v3409_v39  ;;  %v2403_v53 = vmul.f32 %v6576_v12, %v2402_v5  ;;  %vm6679_vm1 = vcmp.eq.f32.partialorder %v2424_v38, 8.507059e+37 }
 0x2fb   :  { %v1920_v63 = vadd.f32 %v6293_v37, %v1823_v30  ;;  %v6603_v60 = vadd.f32 1.0, %v3411_v33  ;;  %v6608_v4 = vpop.eup %3412  ;;  %vm2227_vm12 = vmor %vm2225_vm10, %vm2226_vm8  ;;  %v2398_v44 = vsel %vm6597_vm7, %v2397_v47, %v2393_v17  ;;  %v2418_v33 = vmul.f32 %v6587_v2, %v2417_v58  ;;  %v6703_v17 = vld [vmem:[%s7735_s9] ss:$0 sm:$0xff] }
 0x2fc   :  { %v2222_v32 = vsub.f32 1.0, %v2221_v0  ;;  %v6618_v50 = vpop.eup %3414  ;;  %v2431_v13 = vmul.f32 %v6608_v4, %v6563_v52  ;;  %v6663_v0 = vor.u32 1.1754944e-38, %v2426_v25  ;;  %v6674_v15 = vsel %vm2670_vm6, %v2398_v44, 0.0  ;;  %vm6719_vm8 = vmor %vm2420_vm14, %vm2421_vm0 }
 0x2fd   :  { %v3205_v7 = vmul.f32 -1.442695, %v1920_v63  ;;  %v6630_v6 = vpop.eup %3416  ;;  %v2246_v43 = vand.u32 2147483648, %v6603_v60  ;;  %vm6683_vm2 = vcmp.eq.f32.partialorder %v2409_v36, 8.507059e+37  ;;  %v1938_v47 = vadd.f32 %v6703_v17, %v1877_v40 }
 0x2fe   :  { %v1694_v27 = vpop.f32.mrf.mxu0  ;;  %v2223_v59 = vmul.f32 %v3409_v39, %v2222_v32  ;;  %v6639_v23 = vpop.eup %3418  ;;  %v2439_v62 = vand.u32 2147483647, %v6563_v52  ;;  %v2441_v3 = vand.u32 2147483648, %v6563_v52  ;;  %vm2240_vm7 = vweird.f32 %v6603_v60 }
 0x2ff   :  { %v6605_v28 = vpop.f32.mrf.mxu2  ;;  %3420 = vpow2.f32 %v3205_v7  ;;  %vm2436_vm11 = vweird.f32 %v6608_v4  ;;  %v3223_v44 = vmul.f32 -1.442695, %v1938_v47 }
 0x300   :  { %v6612_v24 = vpop.f32.mrf.mxu3  ;;  %3422 = vrcp.f32 %v6603_v60  ;;  %v2224_v35 = vadd.f32 %v3409_v39, %v2223_v59  ;;  %v2419_v59 = vadd.f32 %v6587_v2, %v2418_v33  ;;  %vm6756_vm14 = vmor %vm2435_vm5, %vm2436_vm11 }
 0x301   :  { %v1825_v61 = vpop.f32.mrf.mxu1  ;;  %3424 = vpow2.f32 %v3221_v54 }
 0x302   :  { %v1826_v8 = vadd.f32 %v1825_v61, %v1694_v27  ;;  %v2228_v30 = vsel %vm2227_vm12, %v3409_v39, %v2224_v35  ;;  %v2404_v61 = vadd.f32 %v6576_v12, %v2403_v53  ;;  %v2423_v51 = vsel %vm6719_vm8, %v6587_v2, %v2419_v59 }
 0x303   :  { %v2233_v21 = vsel %vm2230_vm13, %v2232_v57, %v2228_v30  ;;  %v2428_v40 = vsel %vm6679_vm1, %v6663_v0, %v2423_v51  ;;  %v2446_v0 = vmul.f32 %v6618_v50, %v6571_v16  ;;  %vm2440_vm1 = vcmp.eq.f32.partialorder %v2439_v62, 8.507059e+37 }
 0x304   :  { %v1921_v34 = vadd.f32 %v6293_v37, %v1826_v8  ;;  %v2695_v27 = vsel %vm2670_vm6, %v2233_v21, 0.0  ;;  %v2432_v8 = vsub.f32 1.0, %v2431_v13  ;;  %v2408_v36 = vsel %vm6695_vm4, %v6576_v12, %v2404_v61 }
 0x305   :  { %v3421_v49 = vpop.eup %3420  ;;  %2696 = vadd.xlane.f32.xlu1 %v2695_v27  ;;  %v2442_v61 = vor.u32 1.1754944e-38, %v2441_v3  ;;  %vm2450_vm4 = vweird.f32 %v6571_v16 }
 0x306   :  { %v3206_v29 = vmul.f32 -1.442695, %v1921_v34  ;;  %v6648_v56 = vpop.eup %3422  ;;  %v6650_v63 = vadd.f32 1.0, %v3421_v49  ;;  %v2244_v34 = vand.u32 2147483647, %v6603_v60  ;;  %v2433_v12 = vmul.f32 %v6608_v4, %v2432_v8 }
 0x307   :  { %v3425_v39 = vpop.eup %3424  ;;  %v2236_v55 = vmul.f32 %v6648_v56, %v6603_v60  ;;  %vm2241_vm3 = vweird.f32 %v6648_v56  ;;  %v2247_v49 = vor.u32 1.1754944e-38, %v2246_v43 }
 0x308   :  { %v1697_v31 = vpop.f32.mrf.mxu0  ;;  %3426 = vpow2.f32 %v3206_v29  ;;  %v6676_v32 = vadd.f32 1.0, %v3425_v39  ;;  %vm2242_vm9 = vmor %vm2240_vm7, %vm2241_vm3  ;;  %vm2245_vm10 = vcmp.eq.f32.partialorder %v2244_v34, 8.507059e+37  ;;  %v2259_v33 = vand.u32 2147483647, %v6650_v63 }
 0x309   :  { %3428 = vrcp.f32 %v6650_v63  ;;  %v6658_v48 = vpop.f32.mrf.mxu2  ;;  %v2237_v41 = vsub.f32 1.0, %v2236_v55  ;;  %vm2255_vm13 = vweird.f32 %v6650_v63  ;;  %v1880_v34 = vadd.f32 %v6568_v20, %v6565_v18 }
 0x30a   :  { %3430 = vpow2.f32 %v3222_v45  ;;  %vm2260_vm0 = vcmp.eq.f32.partialorder %v2259_v33, 8.507059e+37 }
 0x30b   :  { %v6667_v11 = vpop.f32.mrf.mxu3  ;;  %v2238_v5 = vmul.f32 %v6648_v56, %v2237_v41 }
 0x30c   :  { %v1828_v9 = vpop.f32.mrf.mxu1 }
 0x30d   :  { %v1829_v7 = vadd.f32 %v1828_v9, %v1697_v31  ;;  %v2239_v57 = vadd.f32 %v6648_v56, %v2238_v5 }
 0x30e   :  { %v3427_v19 = vpop.eup %3426 }
 0x30f   :  { %v1922_v54 = vadd.f32 %v6293_v37, %v1829_v7  ;;  %v3429_v29 = vpop.eup %3428  ;;  %v6711_v31 = vadd.f32 1.0, %v3427_v19  ;;  %v2243_v60 = vsel %vm2242_vm9, %v6648_v56, %v2239_v57  ;;  %v2261_v7 = vand.u32 2147483648, %v6650_v63 }
 0x310   :  { %v2251_v30 = vmul.f32 %v3429_v29, %v6650_v63  ;;  %v3431_v38 = vpop.eup %3430  ;;  %v2248_v9 = vsel %vm2245_vm10, %v2247_v49, %v2243_v60  ;;  %v2434_v56 = vadd.f32 %v6608_v4, %v2433_v12  ;;  %vm2256_vm12 = vweird.f32 %v3429_v29 }
 0x311   :  { %v3207_v1 = vmul.f32 -1.442695, %v1922_v54  ;;  %v2698_v45 = vsel %vm2670_vm6, %v2248_v9, 0.0  ;;  %v2413_v54 = vsel %vm6683_vm2, %v6643_v22, %v2408_v36  ;;  %v6749_v8 = vadd.f32 1.0, %v3431_v38  ;;  %vm2257_vm15 = vmor %vm2255_vm13, %vm2256_vm12 }
 0x312   :  { %v1700_v14 = vpop.f32.mrf.mxu0  ;;  %v2252_v21 = vsub.f32 1.0, %v2251_v30  ;;  %v6734_v13 = vpop.f32.mrf.mxu2  ;;  %2699 = vadd.xlane.f32.xlu2 %v2698_v45  ;;  %v2262_v63 = vor.u32 1.1754944e-38, %v2261_v7  ;;  %v2438_v52 = vsel %vm6756_vm14, %v6608_v4, %v2434_v56  ;;  %v2447_v36 = vsub.f32 1.0, %v2446_v0 }
 0x313   :  { %3432 = vpow2.f32 %v3207_v1  ;;  %v6783_v18 = vsel %vm2670_vm6, %v2413_v54, 0.0  ;;  %v2443_v20 = vsel %vm2440_vm1, %v2442_v61, %v2438_v52  ;;  %v2276_v58 = vand.u32 2147483648, %v6711_v31 }
 0x314   :  { %v1831_v35 = vpop.f32.mrf.mxu1  ;;  %3434 = vrcp.f32 %v6711_v31  ;;  %v6739_v27 = vpop.f32.mrf.mxu3  ;;  %v2253_v55 = vmul.f32 %v3429_v29, %v2252_v21  ;;  %vm2451_vm2 = vweird.f32 %v6618_v50  ;;  %v1939_v12 = vadd.f32 %v6703_v17, %v1880_v34 }
 0x315   :  { %v1832_v25 = vadd.f32 %v1831_v35, %v1700_v14  ;;  %3436 = vrcp.f32 %v6676_v32  ;;  %v2274_v49 = vand.u32 2147483647, %v6711_v31  ;;  %v6798_v38 = vsel %vm2670_vm6, %v2443_v20, 0.0  ;;  %vm6836_vm12 = vmor %vm2450_vm4, %vm2451_vm2 }
 0x316   :  { %v2254_v1 = vadd.f32 %v3429_v29, %v2253_v55  ;;  %3438 = vpow2.f32 %v3223_v44  ;;  %v2454_v9 = vand.u32 2147483647, %v6571_v16  ;;  %v2456_v21 = vand.u32 2147483648, %v6571_v16 }
 0x317   :  { %v1923_v53 = vadd.f32 %v6703_v17, %v1832_v25  ;;  %v1883_v45 = vadd.f32 %v6612_v24, %v6605_v28  ;;  %vm2270_vm5 = vweird.f32 %v6711_v31  ;;  %v2277_v55 = vor.u32 1.1754944e-38, %v2276_v58 }
 0x318   :  { %v2258_v5 = vsel %vm2257_vm15, %v3429_v29, %v2254_v1  ;;  %v6780_v29 = vsel %vm2670_vm6, %v2428_v40, 0.0  ;;  %v3224_v40 = vmul.f32 -1.442695, %v1939_v12  ;;  %vm2275_vm8 = vcmp.eq.f32.partialorder %v2274_v49, 8.507059e+37 }
 0x319   :  { %v3208_v39 = vmul.f32 -1.442695, %v1923_v53  ;;  %v3433_v41 = vpop.eup %3432  ;;  %v2263_v59 = vsel %vm2260_vm0, %v2262_v63, %v2258_v5  ;;  %v2448_v53 = vmul.f32 %v6618_v50, %v2447_v36  ;;  %v1940_v1 = vadd.f32 %v6703_v17, %v1883_v45 }
 0x31a   :  { %v1703_v2 = vpop.f32.mrf.mxu0  ;;  %v6762_v43 = vpop.eup %3434  ;;  %v6764_v22 = vadd.f32 1.0, %v3433_v41  ;;  %v2701_v47 = vsel %vm2670_vm6, %v2263_v59, 0.0  ;;  %vm6824_vm10 = vcmp.eq.f32.partialorder %v2454_v9, 8.507059e+37  ;;  %v2457_v34 = vor.u32 1.1754944e-38, %v2456_v21 }
 0x31b   :  { %3440 = vpow2.f32 %v3208_v39  ;;  %v2266_v26 = vmul.f32 %v6762_v43, %v6711_v31  ;;  %v6777_v4 = vpop.eup %3436  ;;  %2702 = vadd.xlane.f32.xlu0 %v2701_v47  ;;  %vm2271_vm3 = vweird.f32 %v6762_v43  ;;  %v6793_v60 = vpop.f32.mrf.mxu2  ;;  %v2476_v59 = vmul.f32 %v6639_v23, %v6581_v46 }
 0x31c   :  { %3442 = vrcp.f32 %v6764_v22  ;;  %v3439_v62 = vpop.eup %3438  ;;  %vm2272_vm7 = vmor %vm2270_vm5, %vm2271_vm3  ;;  %v2291_v0 = vand.u32 2147483648, %v6764_v22  ;;  %vm2285_vm11 = vweird.f32 %v6764_v22  ;;  %v2484_v36 = vand.u32 2147483647, %v6581_v46 }
 0x31d   :  { %v2267_v3 = vsub.f32 1.0, %v2266_v26  ;;  %3444 = vrcp.f32 %v6749_v8  ;;  %v6795_v51 = vpop.f32.mrf.mxu3  ;;  %v6816_v54 = vadd.f32 1.0, %v3439_v62  ;;  %v3225_v20 = vmul.f32 -1.442695, %v1940_v1 }
 0x31e   :  { %v1834_v37 = vpop.f32.mrf.mxu1  ;;  %v2292_v58 = vor.u32 1.1754944e-38, %v2291_v0  ;;  %v2486_v45 = vand.u32 2147483648, %v6581_v46  ;;  %vm2480_vm15 = vweird.f32 %v6581_v46  ;;  %vm2481_vm0 = vweird.f32 %v6639_v23 }
 0x31f   :  { %v1835_v42 = vadd.f32 %v1834_v37, %v1703_v2  ;;  %v2268_v25 = vmul.f32 %v6762_v43, %v2267_v3  ;;  %v2449_v37 = vadd.f32 %v6618_v50, %v2448_v53  ;;  %v2477_v53 = vsub.f32 1.0, %v2476_v59 }
 0x320   :  { %v2461_v0 = vmul.f32 %v6630_v6, %v6574_v10  ;;  %vm6892_vm5 = vcmp.eq.f32.partialorder %v2484_v36, 8.507059e+37 }
 0x321   :  { %v1924_v19 = vadd.f32 %v6703_v17, %v1835_v42  ;;  %v3441_v30 = vpop.eup %3440  ;;  %v2269_v39 = vadd.f32 %v6762_v43, %v2268_v25  ;;  %v2289_v42 = vand.u32 2147483647, %v6764_v22 }
 0x322   :  { %v3443_v44 = vpop.eup %3442  ;;  %v6805_v7 = vadd.f32 1.0, %v3441_v30 }
 0x323   :  { %v3209_v35 = vmul.f32 -1.442695, %v1924_v19  ;;  %v1706_v57 = vpop.f32.mrf.mxu0  ;;  %v2281_v33 = vmul.f32 %v3443_v44, %v6764_v22  ;;  %v2273_v28 = vsel %vm2272_vm7, %v6762_v43, %v2269_v39  ;;  %v6814_v24 = vpop.eup %3444  ;;  %vm2286_vm9 = vweird.f32 %v3443_v44 }
 0x324   :  { %v2278_v61 = vsel %vm2275_vm8, %v2277_v55, %v2273_v28  ;;  %vm2287_vm13 = vmor %vm2285_vm11, %vm2286_vm9  ;;  %v2453_v22 = vsel %vm6836_vm12, %v6618_v50, %v2449_v37  ;;  %vm2290_vm14 = vcmp.eq.f32.partialorder %v2289_v42, 8.507059e+37  ;;  %v3623_v28 = vmov 64.0  }
 0x325   :  { %3446 = vpow2.f32 %v3209_v35  ;;  %v2282_v41 = vsub.f32 1.0, %v2281_v33  ;;  %v2704_v14 = vsel %vm2670_vm6, %v2278_v61, 0.0  ;;  %v6849_v16 = vpop.f32.mrf.mxu2  ;;  %v6851_v62 = vpop.f32.mrf.mxu3  ;;  %v2458_v50 = vsel %vm6824_vm10, %v2457_v34, %v2453_v22  ;;  %vm6909_vm8 = vmor %vm2480_vm15, %vm2481_vm0 }
 0x326   :  { %3448 = vrcp.f32 %v6805_v7  ;;  %2705 = vadd.xlane.f32.xlu1 %v2704_v14  ;;  %v6875_v1 = vsel %vm2670_vm6, %v2458_v50, 0.0  ;;  %v6877_v14 = vor.u32 1.1754944e-38, %v2486_v45  ;;  %vm2300_vm2 = vweird.f32 %v6805_v7 }
 0x327   :  { %v1837_v56 = vpop.f32.mrf.mxu1  ;;  %v2283_v52 = vmul.f32 %v3443_v44, %v2282_v41  ;;  %3450 = vpow2.f32 %v3224_v40  ;;  %v2306_v40 = vand.u32 2147483648, %v6805_v7  ;;  %vm2466_vm15 = vweird.f32 %v6630_v6 }
 0x328   :  { %v1838_v2 = vadd.f32 %v1837_v56, %v1706_v57  ;;  %3452 = vrcp.f32 %v6816_v54 }
 0x329   :  { %v2284_v19 = vadd.f32 %v3443_v44, %v2283_v52  ;;  %v2307_v34 = vor.u32 1.1754944e-38, %v2306_v40  ;;  %v1889_v40 = vadd.f32 %v6739_v27, %v6734_v13 }
 0x32a   :  { %v1925_v31 = vadd.f32 %v6703_v17, %v1838_v2 }
 0x32b   :  { %v3447_v26 = vpop.eup %3446  ;;  %v2288_v25 = vsel %vm2287_vm13, %v3443_v44, %v2284_v19  ;;  %v1886_v44 = vadd.f32 %v6667_v11, %v6658_v48  ;;  %v2304_v48 = vand.u32 2147483647, %v6805_v7  ;;  %v2478_v11 = vmul.f32 %v6639_v23, %v2477_v53 }
 0x32c   :  { %v3210_v63 = vmul.f32 -1.442695, %v1925_v31  ;;  %v1709_v43 = vpop.f32.mrf.mxu0  ;;  %v6841_v3 = vpop.eup %3448  ;;  %v6843_v35 = vadd.f32 1.0, %v3447_v26  ;;  %v2293_v49 = vsel %vm2290_vm14, %v2292_v58, %v2288_v25  ;;  %vm3134_vm13 = vcmask 7168  }
 0x32d   :  { %v2296_v30 = vmul.f32 %v6841_v3, %v6805_v7  ;;  %v2707_v21 = vsel %vm2670_vm6, %v2293_v49, 0.0  ;;  %v3451_v56 = vpop.eup %3450  ;;  %vm2301_vm1 = vweird.f32 %v6841_v3  ;;  %vm2305_vm4 = vcmp.eq.f32.partialorder %v2304_v48, 8.507059e+37 }
 0x32e   :  { %3454 = vpow2.f32 %v3210_v63  ;;  %2708 = vadd.xlane.f32.xlu2 %v2707_v21  ;;  %v6864_v2 = vpop.eup %3452  ;;  %v6872_v41 = vadd.f32 1.0, %v3451_v56  ;;  %v1941_v63 = vadd.f32 %v6703_v17, %v1886_v44  ;;  %vm2302_vm3 = vmor %vm2300_vm2, %vm2301_vm1  ;;  %v2479_v47 = vadd.f32 %v6639_v23, %v2478_v11  ;;  %v6898_v58 = vpop.f32.mrf.mxu3 }
 0x32f   :  { %v1840_v57 = vpop.f32.mrf.mxu1  ;;  %3456 = vrcp.f32 %v6843_v35  ;;  %v2297_v39 = vsub.f32 1.0, %v2296_v30  ;;  %v2462_v49 = vsub.f32 1.0, %v2461_v0  ;;  %v2321_v53 = vand.u32 2147483648, %v6843_v35 }
 0x330   :  { %v1841_v12 = vadd.f32 %v1840_v57, %v1709_v43  ;;  %3458 = vpow2.f32 %v3225_v20  ;;  %v6896_v57 = vpop.f32.mrf.mxu2  ;;  %v3226_v56 = vmul.f32 -1.442695, %v1941_v63  ;;  %vm2315_vm9 = vweird.f32 %v6843_v35 }
 0x331   :  { %3460 = vrcp.f32 %v3623_v28  ;;  %v2298_v31 = vmul.f32 %v6841_v3, %v2297_v39  ;;  %v2463_v46 = vmul.f32 %v6630_v6, %v2462_v49  ;;  %vm2465_vm14 = vweird.f32 %v6574_v10 }
 0x332   :  { %v1926_v9 = vadd.f32 %v6703_v17, %v1841_v12  ;;  %v1942_v20 = vadd.f32 %v6703_v17, %v1889_v40 }
 0x333   :  { %v2299_v42 = vadd.f32 %v6841_v3, %v2298_v31 }
 0x334   :  { %v3211_v55 = vmul.f32 -1.442695, %v1926_v9  ;;  %v1712_v33 = vpop.f32.mrf.mxu0  ;;  %v3455_v61 = vpop.eup %3454 }
 0x335   :  { %v3457_v37 = vpop.eup %3456  ;;  %v6882_v43 = vadd.f32 1.0, %v3455_v61  ;;  %v2303_v19 = vsel %vm2302_vm3, %v6841_v3, %v2299_v42  ;;  %v2319_v3 = vand.u32 2147483647, %v6843_v35  ;;  %v2322_v61 = vor.u32 1.1754944e-38, %v2321_v53  ;;  %v2676_v42 = vpop.xlane.xlu0 %2675 }
 0x336   :  { %3462 = vpow2.f32 %v3211_v55  ;;  %v2311_v59 = vmul.f32 %v3457_v37, %v6843_v35  ;;  %v3459_v26 = vpop.eup %3458  ;;  %v2308_v12 = vsel %vm2305_vm4, %v2307_v34, %v2303_v19  ;;  %vm2316_vm7 = vweird.f32 %v3457_v37  ;;  %v2673_v35 = vpop.xlane.xlu2 %2672 }
 0x337   :  { %v1843_v52 = vpop.f32.mrf.mxu1  ;;  %3464 = vrcp.f32 %v6882_v43  ;;  %v3461_v7 = vpop.eup %3460  ;;  %v2710_v30 = vsel %vm2670_vm6, %v2308_v12, 0.0  ;;  %v6913_v45 = vadd.f32 1.0, %v3459_v26  ;;  %v2483_v55 = vsel %vm6909_vm8, %v6639_v23, %v2479_v47  ;;  %vm2317_vm10 = vmor %vm2315_vm9, %vm2316_vm7 }
 0x338   :  { %v1844_v5 = vadd.f32 %v1843_v52, %v1712_v33  ;;  %v2312_v25 = vsub.f32 1.0, %v2311_v59  ;;  %v2786_v36 = vmul.f32 64.0, %v3461_v7  ;;  %3466 = vrcp.f32 %v6872_v41  ;;  %2711 = vadd.xlane.f32.xlu0 %v2710_v30  ;;  %v1900_v12 = vpop.f32.mrf.mxu3 }
 0x339   :  { %vm2320_vm11 = vcmp.eq.f32.partialorder %v2319_v3, 8.507059e+37  ;;  %vm2790_vm12 = vweird.f32 %v3461_v7  ;;  %v2336_v30 = vand.u32 2147483648, %v6882_v43  ;;  %v2334_v3 = vand.u32 2147483647, %v6882_v43 }
 0x33a   :  { %v1927_v22 = vadd.f32 %v6703_v17, %v1844_v5  ;;  %v2313_v21 = vmul.f32 %v3457_v37, %v2312_v25  ;;  %v2787_v39 = vsub.f32 1.0, %v2786_v36  ;;  %v1892_v36 = vadd.f32 %v6795_v51, %v6793_v60 }
 0x33b   :  { %vm2330_vm1 = vweird.f32 %v6882_v43  ;;  %vm2335_vm3 = vcmp.eq.f32.partialorder %v2334_v3, 8.507059e+37 }
 0x33c   :  { %v3212_v9 = vmul.f32 -1.442695, %v1927_v22  ;;  %v1715_v44 = vpop.f32.mrf.mxu0  ;;  %v3463_v33 = vpop.eup %3462  ;;  %v2314_v28 = vadd.f32 %v3457_v37, %v2313_v21  ;;  %v2788_v0 = vmul.f32 %v3461_v7, %v2787_v39  ;;  %v2469_v21 = vand.u32 2147483647, %v6574_v10 }
 0x33d   :  { %v6922_v31 = vpop.eup %3464  ;;  %v6924_v48 = vadd.f32 1.0, %v3463_v33  ;;  %v1769_v22 = vpop.f32.mrf.mxu2  ;;  %v2337_v39 = vor.u32 1.1754944e-38, %v2336_v30  ;;  %v3227_v33 = vmul.f32 -1.442695, %v1942_v20 }
 0x33e   :  { %3468 = vpow2.f32 %v3212_v9  ;;  %v2318_v63 = vsel %vm2317_vm10, %v3457_v37, %v2314_v28  ;;  %v2789_v27 = vadd.f32 %v3461_v7, %v2788_v0  ;;  %v2326_v52 = vmul.f32 %v6922_v31, %v6882_v43  ;;  %v6930_v5 = vpop.eup %3466 }
 0x33f   :  { %v1846_v11 = vpop.f32.mrf.mxu1  ;;  %3470 = vrcp.f32 %v6924_v48  ;;  %v2323_v13 = vsel %vm2320_vm11, %v2322_v61, %v2318_v63  ;;  %v2488_v37 = vsel %vm6892_vm5, %v6877_v14, %v2483_v55  ;;  %v2679_v47 = vpop.xlane.xlu1 %2678  ;;  %vm2331_vm0 = vweird.f32 %v6922_v31  ;;  %vm7005_vm5 = vmor %vm2465_vm14, %vm2466_vm15 }
 0x340   :  { %v1847_v23 = vadd.f32 %v1846_v11, %v1715_v44  ;;  %3472 = vpow2.f32 %v3226_v56  ;;  %v2713_v59 = vsel %vm2670_vm6, %v2323_v13, 0.0  ;;  %v6937_v26 = vsel %vm2790_vm12, %v3461_v7, %v2789_v27  ;;  %vm2332_vm2 = vmor %vm2330_vm1, %vm2331_vm0 }
 0x341   :  { %2714 = vadd.xlane.f32.xlu1 %v2713_v59  ;;  %v2327_v19 = vsub.f32 1.0, %v2326_v52  ;;  %v6942_v49 = vmul.f32 %v6937_v26, %v2673_v35  ;;  %v6946_v14 = vmul.f32 %v6937_v26, %v2676_v42  ;;  %3474 = vrcp.f32 %v6913_v45 }
 0x342   :  { %v1928_v34 = vadd.f32 %v6703_v17, %v1847_v23  ;;  %v6961_v9 = vmul.f32 %v6937_v26, %v2679_v47  ;;  %v6974_v60 = vsel %vm2670_vm6, %v2488_v37, 0.0  ;;  %v6985_v43 = vadd.f32 %v6630_v6, %v2463_v46 }
 0x343   :  { %v2328_v7 = vmul.f32 %v6922_v31, %v2327_v19  ;;  %3135 = vst.msk [vmem:[%s7737_s11] sm:$0xff] %vm3134_vm13, %v6942_v49  ;;  %v1943_v28 = vadd.f32 %v6703_v17, %v1892_v36  ;;  %v1895_v11 = vadd.f32 %v6851_v62, %v6849_v16  ;;  %v1898_v23 = vadd.f32 %v6898_v58, %v6896_v57  ;;  %v1903_v19 = vpop.f32.mrf.mxu3 }
 0x344   :  { %v3213_v25 = vmul.f32 -1.442695, %v1928_v34  ;;  %v3469_v53 = vpop.eup %3468  ;;  %3136 = vst.msk [vmem:[%s7737_s11 + $0x8] sm:$0xff] %vm3134_vm13, %v6946_v14  ;;  %v2351_v46 = vand.u32 2147483648, %v6924_v48  ;;  %v2491_v13 = vmul.f32 %v6777_v4, %v6676_v32  ;;  %v2349_v16 = vand.u32 2147483647, %v6924_v48 }
 0x345   :  { %v3471_v50 = vpop.eup %3470  ;;  %v6964_v56 = vadd.f32 1.0, %v3469_v53  ;;  %v2329_v44 = vadd.f32 %v6922_v31, %v2328_v7  ;;  %3137 = vst.msk [vmem:[%s7737_s11 + $0x10] sm:$0xff] %vm3134_vm13, %v6961_v9  ;;  %v2468_v58 = vsel %vm7005_vm5, %v6630_v6, %v6985_v43  ;;  %v2471_v52 = vand.u32 2147483648, %v6574_v10  ;;  %v1772_v37 = vpop.f32.mrf.mxu2 }
 0x346   :  { %v3473_v51 = vpop.eup %3472  ;;  %3476 = vpow2.f32 %v3213_v25  ;;  %v2341_v55 = vmul.f32 %v3471_v50, %v6924_v48  ;;  %vm2346_vm4 = vweird.f32 %v3471_v50  ;;  %v3228_v34 = vmul.f32 -1.442695, %v1943_v28 }
 0x347   :  { %3478 = vrcp.f32 %v6964_v56  ;;  %v2333_v40 = vsel %vm2332_vm2, %v6922_v31, %v2329_v44  ;;  %v6998_v27 = vpop.eup %3474  ;;  %v1901_v31 = vadd.f32 %v1900_v12, %v1769_v22  ;;  %v7009_v57 = vadd.f32 1.0, %v3473_v51 }
 0x348   :  { %v2338_v61 = vsel %vm2335_vm3, %v2337_v39, %v2333_v40  ;;  %v2342_v0 = vsub.f32 1.0, %v2341_v55  ;;  %3480 = vpow2.f32 %v3227_v33  ;;  %v1944_v59 = vadd.f32 %v6703_v17, %v1895_v11 }
 0x349   :  { %v2716_v63 = vsel %vm2670_vm6, %v2338_v61, 0.0  ;;  %vm2345_vm7 = vweird.f32 %v6924_v48  ;;  %v1945_v12 = vadd.f32 %v6703_v17, %v1898_v23  ;;  %v2352_v30 = vor.u32 1.1754944e-38, %v2351_v46  ;;  %v2682_v53 = vpop.xlane.xlu2 %2681 }
 0x34a   :  { %2717 = vadd.xlane.f32.xlu2 %v2716_v63  ;;  %v2343_v35 = vmul.f32 %v3471_v50, %v2342_v0  ;;  %vm2347_vm8 = vmor %vm2345_vm7, %vm2346_vm4  ;;  %v2492_v20 = vsub.f32 1.0, %v2491_v13  ;;  %v1946_v10 = vadd.f32 %v6703_v17, %v1901_v31  ;;  %vm2350_vm9 = vcmp.eq.f32.partialorder %v2349_v16, 8.507059e+37 }
 0x34b   :  { %v1904_v36 = vadd.f32 %v1903_v19, %v1772_v37  ;;  %v7026_v44 = vmul.f32 %v6937_v26, %v2682_v53  ;;  %vm7028_vm10 = vcmp.eq.f32.partialorder %v2469_v21, 8.507059e+37  ;;  %v3229_v39 = vmul.f32 -1.442695, %v1944_v59 }
 0x34c   :  { %v3477_v42 = vpop.eup %3476  ;;  %v2344_v47 = vadd.f32 %v3471_v50, %v2343_v35  ;;  %v3230_v40 = vmul.f32 -1.442695, %v1945_v12  ;;  %v2366_v28 = vand.u32 2147483648, %v6964_v56  ;;  %v2493_v21 = vmul.f32 %v6777_v4, %v2492_v20 }
 0x34d   :  { %v3479_v22 = vpop.eup %3478  ;;  %v7019_v25 = vadd.f32 1.0, %v3477_v42  ;;  %3138 = vst.msk [vmem:[%s7737_s11 + $0x18] sm:$0xff] %vm3134_vm13, %v7026_v44  ;;  %v3231_v11 = vmul.f32 -1.442695, %v1946_v10  ;;  %v2364_v0 = vand.u32 2147483647, %v6964_v56  ;;  %v1947_v23 = vadd.f32 %v6703_v17, %v1904_v36 }
 0x34e   :  { %v2348_v7 = vsel %vm2347_vm8, %v3471_v50, %v2344_v47  ;;  %v2356_v3 = vmul.f32 %v3479_v22, %v6964_v56  ;;  %v3481_v33 = vpop.eup %3480  ;;  %vm2361_vm11 = vweird.f32 %v3479_v22  ;;  %v2472_v63 = vor.u32 1.1754944e-38, %v2471_v52 }
 0x34f   :  { %3482 = vrcp.f32 %v7019_v25  ;;  %v2353_v48 = vsel %vm2350_vm9, %v2352_v30, %v2348_v7  ;;  %vm2495_vm12 = vweird.f32 %v6676_v32  ;;  %vm2496_vm14 = vweird.f32 %v6777_v4  ;;  %v2685_v53 = vpop.xlane.xlu0 %2684 }
 0x350   :  { %3484 = vpow2.f32 %v3228_v34  ;;  %v2719_v55 = vsel %vm2670_vm6, %v2353_v48, 0.0  ;;  %v2357_v50 = vsub.f32 1.0, %v2356_v3  ;;  %vm2360_vm15 = vweird.f32 %v6964_v56  ;;  %vm7077_vm2 = vmor %vm2495_vm12, %vm2496_vm14 }
 0x351   :  { %3486 = vrcp.f32 %v7009_v57  ;;  %2720 = vadd.xlane.f32.xlu0 %v2719_v55  ;;  %v2501_v13 = vand.u32 2147483648, %v6676_v32  ;;  %v7048_v35 = vadd.f32 1.0, %v3481_v33  ;;  %vm2362_vm0 = vmor %vm2360_vm15, %vm2361_vm11  ;;  %v2494_v16 = vadd.f32 %v6777_v4, %v2493_v21 }
 0x352   :  { %2735 = vadd.xlane.f32.xlu2 %v6780_v29  ;;  %v2358_v61 = vmul.f32 %v3479_v22, %v2357_v50  ;;  %3488 = vpow2.f32 %v3229_v39  ;;  %v2367_v29 = vor.u32 1.1754944e-38, %v2366_v28  ;;  %vm2365_vm1 = vcmp.eq.f32.partialorder %v2364_v0, 8.507059e+37 }
 0x353   :  { %3490 = vpow2.f32 %v3230_v40  ;;  %v3232_v59 = vmul.f32 -1.442695, %v1947_v23  ;;  %v2521_v37 = vmul.f32 %v6864_v2, %v6816_v54  ;;  %v2506_v19 = vmul.f32 %v6814_v24, %v6749_v8 }
 0x354   :  { %v2359_v46 = vadd.f32 %v3479_v22, %v2358_v61  ;;  %3492 = vpow2.f32 %v3231_v11  ;;  %v2536_v30 = vmul.f32 %v6930_v5, %v6872_v41  ;;  %v2381_v10 = vand.u32 2147483648, %v7019_v25 }
 0x355   :  { %v3483_v31 = vpop.eup %3482  ;;  %3494 = vrcp.f32 %v7048_v35  ;;  %v2499_v43 = vand.u32 2147483647, %v6676_v32  ;;  %v2379_v7 = vand.u32 2147483647, %v7019_v25  ;;  %v2502_v36 = vor.u32 1.1754944e-38, %v2501_v13 }
 0x356   :  { %v3485_v17 = vpop.eup %3484  ;;  %v2363_v52 = vsel %vm2362_vm0, %v3479_v22, %v2359_v46  ;;  %v2371_v42 = vmul.f32 %v3483_v31, %v7019_v25  ;;  %v2473_v22 = vsel %vm7028_vm10, %v2472_v63, %v2468_v58  ;;  %vm2376_vm3 = vweird.f32 %v3483_v31 }
 0x357   :  { %v7052_v34 = vpop.eup %3486  ;;  %v2368_v56 = vsel %vm2365_vm1, %v2367_v29, %v2363_v52  ;;  %v7069_v20 = vadd.f32 1.0, %v3485_v17  ;;  %3496 = vpow2.f32 %v3232_v59  ;;  %v2522_v48 = vsub.f32 1.0, %v2521_v37 }
 0x358   :  { %v2722_v47 = vsel %vm2670_vm6, %v2368_v56, 0.0  ;;  %v2372_v12 = vsub.f32 1.0, %v2371_v42  ;;  %v3489_v62 = vpop.eup %3488  ;;  %v2507_v51 = vsub.f32 1.0, %v2506_v19  ;;  %vm2375_vm4 = vweird.f32 %v7019_v25 }
 0x359   :  { %2723 = vadd.xlane.f32.xlu1 %v2722_v47  ;;  %2729 = vadd.xlane.f32.xlu0 %v6674_v15  ;;  %v2498_v15 = vsel %vm7077_vm2, %v6777_v4, %v2494_v16  ;;  %v3491_v3 = vpop.eup %3490  ;;  %v7088_v32 = vmul.f32 %v6937_v26, %v2685_v53  ;;  %v2537_v50 = vsub.f32 1.0, %v2536_v30  ;;  %v7090_v33 = vadd.f32 1.0, %v3489_v62  ;;  %vm2377_vm5 = vmor %vm2375_vm4, %vm2376_vm3  ;;  %v2688_v47 = vpop.xlane.xlu1 %2687 }
 0x35a   :  { %v2373_v58 = vmul.f32 %v3483_v31, %v2372_v12  ;;  %v3493_v39 = vpop.eup %3492  ;;  %v2382_v40 = vor.u32 1.1754944e-38, %v2381_v10  ;;  %vm2500_vm7 = vcmp.eq.f32.partialorder %v2499_v43, 8.507059e+37  ;;  %v2566_v4 = vmul.f32 %v7052_v34, %v7009_v57 }
 0x35b   :  { %v7095_v28 = vadd.f32 1.0, %v3491_v3  ;;  %vm2380_vm8 = vcmp.eq.f32.partialorder %v2379_v7, 8.507059e+37  ;;  %3139 = vst.msk [vmem:[%s7737_s11 + $0x20] sm:$0xff] %vm3134_vm13, %v7088_v32  ;;  %v2503_v25 = vsel %vm2500_vm7, %v2502_v36, %v2498_v15  ;;  %v7102_v11 = vpop.eup %3494  ;;  %v7104_v61 = vadd.f32 1.0, %v3493_v39 }
 0x35c   :  { %v2374_v55 = vadd.f32 %v3483_v31, %v2373_v58  ;;  %v2523_v23 = vmul.f32 %v6864_v2, %v2522_v48  ;;  %v2529_v63 = vand.u32 2147483647, %v6816_v54  ;;  %3498 = vrcp.f32 %v7069_v20 }
 0x35d   :  { %v2508_v13 = vmul.f32 %v6814_v24, %v2507_v51  ;;  %v3497_v29 = vpop.eup %3496  ;;  %3500 = vrcp.f32 %v7090_v33  ;;  %v2743_v16 = vsel %vm2670_vm6, %v2473_v22, 0.0  ;;  %v2567_v17 = vsub.f32 1.0, %v2566_v4 }
 0x35e   :  { %v2378_v21 = vsel %vm2377_vm5, %v3483_v31, %v2374_v55  ;;  %v2538_v31 = vmul.f32 %v6930_v5, %v2537_v50  ;;  %v2551_v52 = vmul.f32 %v6998_v27, %v6913_v45  ;;  %3502 = vrcp.f32 %v7095_v28 }
 0x35f   :  { %v2383_v0 = vsel %vm2380_vm8, %v2382_v40, %v2378_v21  ;;  %v7120_v42 = vsel %vm2670_vm6, %v2503_v25, 0.0  ;;  %vm2525_vm9 = vweird.f32 %v6816_v54  ;;  %vm2526_vm10 = vweird.f32 %v6864_v2 }
 0x360   :  { %v2725_v46 = vsel %vm2670_vm6, %v2383_v0, 0.0  ;;  %3504 = vrcp.f32 %v7104_v61  ;;  %vm7126_vm11 = vcmp.eq.f32.partialorder %v2529_v63, 8.507059e+37  ;;  %v2531_v59 = vand.u32 2147483648, %v6816_v54  ;;  %vm7137_vm15 = vmor %vm2525_vm9, %vm2526_vm10  ;;  %v2691_v63 = vpop.xlane.xlu2 %2690 }
 0x361   :  { %2732 = vadd.xlane.f32.xlu1 %v6783_v18  ;;  %2738 = vadd.xlane.f32.xlu0 %v6798_v38  ;;  %v2524_v18 = vadd.f32 %v6864_v2, %v2523_v23  ;;  %vm2511_vm12 = vweird.f32 %v6814_v24  ;;  %v7132_v56 = vadd.f32 1.0, %v3497_v29  ;;  %v2509_v37 = vadd.f32 %v6814_v24, %v2508_v13 }
 0x362   :  { %2726 = vadd.xlane.f32.xlu2 %v2725_v46  ;;  %v2539_v19 = vadd.f32 %v6930_v5, %v2538_v31  ;;  %vm2541_vm14 = vweird.f32 %v6930_v5  ;;  %vm2510_vm0 = vweird.f32 %v6749_v8  ;;  %v2568_v22 = vmul.f32 %v7052_v34, %v2567_v17  ;;  %v7145_v10 = vpop.eup %3498 }
 0x363   :  { %v2552_v54 = vsub.f32 1.0, %v2551_v52  ;;  %v2581_v30 = vmul.f32 %v7102_v11, %v7048_v35  ;;  %v7148_v6 = vmul.f32 %v6937_v26, %v2688_v47  ;;  %vm7150_vm1 = vmor %vm2510_vm0, %vm2511_vm12  ;;  %v2516_v62 = vand.u32 2147483648, %v6749_v8  ;;  %v7157_v7 = vpop.eup %3500 }
 0x364   :  { %vm2540_vm2 = vweird.f32 %v6872_v41  ;;  %v2546_v58 = vand.u32 2147483648, %v6872_v41  ;;  %v2528_v15 = vsel %vm7137_vm15, %v6864_v2, %v2524_v18  ;;  %v2532_v3 = vor.u32 1.1754944e-38, %v2531_v59  ;;  %v7170_v51 = vpop.eup %3502 }
 0x365   :  { %v2514_v53 = vand.u32 2147483647, %v6749_v8  ;;  %vm7165_vm3 = vmor %vm2540_vm2, %vm2541_vm14  ;;  %v2544_v48 = vand.u32 2147483647, %v6872_v41  ;;  %3506 = vrcp.f32 %v7132_v56  ;;  %3140 = vst.msk [vmem:[%s7737_s11 + $0x28] sm:$0xff] %vm3134_vm13, %v7148_v6  ;;  %v2513_v8 = vsel %vm7150_vm1, %v6814_v24, %v2509_v37 }
 0x366   :  { %v2543_v2 = vsel %vm7165_vm3, %v6930_v5, %v2539_v19  ;;  %vm2571_vm4 = vweird.f32 %v7052_v34  ;;  %v7185_v41 = vpop.eup %3504  ;;  %v2569_v39 = vadd.f32 %v7052_v34, %v2568_v22  ;;  %v2553_v55 = vmul.f32 %v6998_v27, %v2552_v54 }
 0x367   :  { %v2582_v50 = vsub.f32 1.0, %v2581_v30  ;;  %v2596_v24 = vmul.f32 %v7145_v10, %v7069_v20  ;;  %v2517_v40 = vor.u32 1.1754944e-38, %v2516_v62  ;;  %v2547_v4 = vor.u32 1.1754944e-38, %v2546_v58 }
 0x368   :  { %v2576_v5 = vand.u32 2147483648, %v7009_v57  ;;  %v2611_v21 = vmul.f32 %v7157_v7, %v7090_v33  ;;  %vm2515_vm5 = vcmp.eq.f32.partialorder %v2514_v53, 8.507059e+37  ;;  %vm2545_vm7 = vcmp.eq.f32.partialorder %v2544_v48, 8.507059e+37 }
 0x369   :  { %2741 = vadd.xlane.f32.xlu1 %v6875_v1  ;;  %2747 = vadd.xlane.f32.xlu0 %v6974_v60  ;;  %vm2570_vm8 = vweird.f32 %v7009_v57  ;;  %v2574_v1 = vand.u32 2147483647, %v7009_v57  ;;  %v2533_v60 = vsel %vm7126_vm11, %v2532_v3, %v2528_v15  ;;  %v2518_v25 = vsel %vm2515_vm5, %v2517_v40, %v2513_v8 }
 0x36a   :  { %2744 = vadd.xlane.f32.xlu2 %v2743_v16  ;;  %v2548_v0 = vsel %vm2545_vm7, %v2547_v4, %v2543_v2  ;;  %vm7202_vm9 = vmor %vm2570_vm8, %vm2571_vm4  ;;  %vm2556_vm10 = vweird.f32 %v6998_v27  ;;  %v2554_v57 = vadd.f32 %v6998_v27, %v2553_v55  ;;  %v2583_v13 = vmul.f32 %v7102_v11, %v2582_v50  ;;  %v2694_v48 = vpop.xlane.xlu0 %2693 }
 0x36b   :  { %v2573_v46 = vsel %vm7202_vm9, %v7052_v34, %v2569_v39  ;;  %v2597_v31 = vsub.f32 1.0, %v2596_v24  ;;  %v7212_v29 = vpop.eup %3506  ;;  %v7215_v16 = vmul.f32 %v6937_v26, %v2691_v63  ;;  %v2577_v17 = vor.u32 1.1754944e-38, %v2576_v5 }
 0x36c   :  { %v2561_v52 = vand.u32 2147483648, %v6913_v45  ;;  %v2612_v18 = vsub.f32 1.0, %v2611_v21  ;;  %v2755_v38 = vsel %vm2670_vm6, %v2533_v60, 0.0  ;;  %vm2575_vm11 = vcmp.eq.f32.partialorder %v2574_v1, 8.507059e+37 }
 0x36d   :  { %vm2555_vm12 = vweird.f32 %v6913_v45  ;;  %v2559_v34 = vand.u32 2147483647, %v6913_v45  ;;  %v2752_v59 = vsel %vm2670_vm6, %v2518_v25, 0.0  ;;  %3141 = vst.msk [vmem:[%s7737_s11 + $0x30] sm:$0xff] %vm3134_vm13, %v7215_v16  ;;  %v2758_v37 = vsel %vm2670_vm6, %v2548_v0, 0.0 }
 0x36e   :  { %v2578_v19 = vsel %vm2575_vm11, %v2577_v17, %v2573_v46  ;;  %vm7230_vm14 = vmor %vm2555_vm12, %vm2556_vm10  ;;  %v2591_v12 = vand.u32 2147483648, %v7048_v35  ;;  %v2584_v22 = vadd.f32 %v7102_v11, %v2583_v13  ;;  %vm2586_vm15 = vweird.f32 %v7102_v11 }
 0x36f   :  { %v2558_v45 = vsel %vm7230_vm14, %v6998_v27, %v2554_v57  ;;  %v2598_v54 = vmul.f32 %v7145_v10, %v2597_v31  ;;  %v2562_v30 = vor.u32 1.1754944e-38, %v2561_v52  ;;  %v2613_v43 = vmul.f32 %v7157_v7, %v2612_v18 }
 0x370   :  { %v2626_v62 = vmul.f32 %v7170_v51, %v7095_v28  ;;  %vm2560_vm0 = vcmp.eq.f32.partialorder %v2559_v34, 8.507059e+37  ;;  %vm2585_vm1 = vweird.f32 %v7048_v35  ;;  %v2589_v27 = vand.u32 2147483647, %v7048_v35 }
 0x371   :  { %2750 = vadd.xlane.f32.xlu1 %v7120_v42  ;;  %2756 = vadd.xlane.f32.xlu0 %v2755_v38  ;;  %v2656_v42 = vmul.f32 %v7212_v29, %v7132_v56  ;;  %v2641_v58 = vmul.f32 %v7185_v41, %v7104_v61  ;;  %v2764_v15 = vsel %vm2670_vm6, %v2578_v19, 0.0  ;;  %v2563_v3 = vsel %vm2560_vm0, %v2562_v30, %v2558_v45  ;;  %vm7252_vm2 = vmor %vm2585_vm1, %vm2586_vm15 }
 0x372   :  { %2753 = vadd.xlane.f32.xlu2 %v2752_v59  ;;  %v2592_v36 = vor.u32 1.1754944e-38, %v2591_v12  ;;  %vm2600_vm3 = vweird.f32 %v7069_v20  ;;  %v2588_v8 = vsel %vm7252_vm2, %v7102_v11, %v2584_v22  ;;  %v2599_v35 = vadd.f32 %v7145_v10, %v2598_v54 }
 0x373   :  { %vm2601_vm4 = vweird.f32 %v7145_v10  ;;  %vm2616_vm5 = vweird.f32 %v7157_v7  ;;  %v7264_v2 = vmul.f32 %v6937_v26, %v2694_v48  ;;  %v2614_v39 = vadd.f32 %v7157_v7, %v2613_v43 }
 0x374   :  { %v2627_v55 = vsub.f32 1.0, %v2626_v62  ;;  %v2657_v50 = vsub.f32 1.0, %v2656_v42  ;;  %v2606_v24 = vand.u32 2147483648, %v7069_v20  ;;  %v2621_v40 = vand.u32 2147483648, %v7090_v33  ;;  %vm7276_vm8 = vmor %vm2600_vm3, %vm2601_vm4 }
 0x375   :  { %v2642_v4 = vsub.f32 1.0, %v2641_v58  ;;  %3142 = vst.msk [vmem:[%s7737_s11 + $0x38] sm:$0xff] %vm3134_vm13, %v7264_v2  ;;  %vm2590_vm7 = vcmp.eq.f32.partialorder %v2589_v27, 8.507059e+37  ;;  %v2604_v5 = vand.u32 2147483647, %v7069_v20  ;;  %vm2615_vm9 = vweird.f32 %v7090_v33 }
 0x376   :  { %v2619_v21 = vand.u32 2147483647, %v7090_v33  ;;  %v3624_v1 = vmov 0   ;;  %v2761_v60 = vsel %vm2670_vm6, %v2563_v3, 0.0  ;;  %v2593_v25 = vsel %vm2590_vm7, %v2592_v36, %v2588_v8  ;;  %vm2617_vm10 = vmor %vm2615_vm9, %vm2616_vm5  ;;  %v116_v8 = vld [vmem:[%s7728_s2 + $0x10] sm:$0xff] }
 0x377   :  { %3272 = vset.pattern.permute.xlu0 %v3624_v1  ;;  %3271 = vset.pattern.permute.xlu2 %v3624_v1  ;;  %v2603_v0 = vsel %vm7276_vm8, %v7145_v10, %v2599_v35  ;;  %v2618_v20 = vsel %vm2617_vm10, %v7157_v7, %v2614_v39  ;;  %v2628_v33 = vmul.f32 %v7170_v51, %v2627_v55  ;;  %v2607_v63 = vor.u32 1.1754944e-38, %v2606_v24  ;;  %v114_v39 = vld [vmem:[%s7728_s2] sm:$0xff]  ;;  %v115_v55 = vld [vmem:[%s7728_s2 + $0x8] sm:$0xff] }
 0x378   :  { %v2658_v23 = vmul.f32 %v7212_v29, %v2657_v50  ;;  %3270 = vset.pattern.permute.xlu1 %v3624_v1  ;;  %v2622_v46 = vor.u32 1.1754944e-38, %v2621_v40  ;;  %v2643_v57 = vmul.f32 %v7185_v41, %v2642_v4  ;;  %v2767_v13 = vsel %vm2670_vm6, %v2593_v25, 0.0  ;;  %v126_v25 = vld [vmem:[%s7728_s2 + $0x60] sm:$0xff] }
 0x379   :  { %2759 = vadd.xlane.f32.xlu1 %v2758_v37  ;;  %2765 = vadd.xlane.f32.xlu0 %v2764_v15  ;;  %vm2605_vm11 = vcmp.eq.f32.partialorder %v2604_v5, 8.507059e+37  ;;  %vm2620_vm12 = vcmp.eq.f32.partialorder %v2619_v21, 8.507059e+37  ;;  %vm2646_vm14 = vweird.f32 %v7185_v41  ;;  %vm2631_vm15 = vweird.f32 %v7170_v51  ;;  %v117_v21 = vld [vmem:[%s7728_s2 + $0x18] sm:$0xff]  ;;  %v127_v37 = vld [vmem:[%s7728_s2 + $0x68] sm:$0xff] }
 0x37a   :  { %2762 = vadd.xlane.f32.xlu2 %v2761_v60  ;;  %v2608_v10 = vsel %vm2605_vm11, %v2607_v63, %v2603_v0  ;;  %v2623_v31 = vsel %vm2620_vm12, %v2622_v46, %v2618_v20  ;;  %v2651_v7 = vand.u32 2147483648, %v7104_v61  ;;  %v2629_v17 = vadd.f32 %v7170_v51, %v2628_v33  ;;  %v119_v20 = vld [vmem:[%s7728_s2 + $0x28] sm:$0xff]  ;;  %v120_v33 = vld [vmem:[%s7728_s2 + $0x30] sm:$0xff] }
 0x37b   :  { %v2659_v52 = vadd.f32 %v7212_v29, %v2658_v23  ;;  %vm2661_vm0 = vweird.f32 %v7212_v29  ;;  %v2644_v18 = vadd.f32 %v7185_v41, %v2643_v57  ;;  %vm2630_vm1 = vweird.f32 %v7095_v28  ;;  %v121_v57 = vld [vmem:[%s7728_s2 + $0x38] sm:$0xff] }
 0x37c   :  { %v2636_v38 = vand.u32 2147483648, %v7095_v28  ;;  %v2666_v34 = vand.u32 2147483648, %v7132_v56  ;;  %v2773_v59 = vsel %vm2670_vm6, %v2623_v31, 0.0  ;;  %vm7305_vm2 = vmor %vm2630_vm1, %vm2631_vm15  ;;  %v2634_v19 = vand.u32 2147483647, %v7095_v28  ;;  %v2697_v28 = vpop.xlane.xlu1 %2696  ;;  %v124_v31 = vld [vmem:[%s7728_s2 + $0x50] sm:$0xff] }
 0x37d   :  { %vm2660_vm3 = vweird.f32 %v7132_v56  ;;  %v2664_v47 = vand.u32 2147483647, %v7132_v56  ;;  %v2770_v12 = vsel %vm2670_vm6, %v2608_v10, 0.0  ;;  %vm2645_vm4 = vweird.f32 %v7104_v61 }
 0x37e   :  { %v2649_v45 = vand.u32 2147483647, %v7104_v61  ;;  %vm7317_vm5 = vmor %vm2660_vm3, %vm2661_vm0  ;;  %v2633_v56 = vsel %vm7305_vm2, %v7170_v51, %v2629_v17  ;;  %v7330_v61 = vmul.f32 %v6937_v26, %v2697_v28  ;;  %v2637_v43 = vor.u32 1.1754944e-38, %v2636_v38 }
 0x37f   :  { %vm2647_vm7 = vmor %vm2645_vm4, %vm2646_vm14  ;;  %v2663_v54 = vsel %vm7317_vm5, %v7212_v29, %v2659_v52  ;;  %v2667_v62 = vor.u32 1.1754944e-38, %v2666_v34  ;;  %v2652_v42 = vor.u32 1.1754944e-38, %v2651_v7  ;;  %vm2635_vm8 = vcmp.eq.f32.partialorder %v2634_v19, 8.507059e+37  ;;  %v129_v7 = vld [vmem:[%s7728_s2 + $0x78] sm:$0xff] }
 0x380   :  { %v2648_v30 = vsel %vm2647_vm7, %v7185_v41, %v2644_v18  ;;  %vm2665_vm9 = vcmp.eq.f32.partialorder %v2664_v47, 8.507059e+37  ;;  %3143 = vst.msk [vmem:[%s7737_s11 + $0x40] sm:$0xff] %vm3134_vm13, %v7330_v61  ;;  %vm2650_vm10 = vcmp.eq.f32.partialorder %v2649_v45, 8.507059e+37  ;;  %v2638_v51 = vsel %vm2635_vm8, %v2637_v43, %v2633_v56  ;;  %v125_v52 = vld [vmem:[%s7728_s2 + $0x58] sm:$0xff] }
 0x381   :  { %2768 = vadd.xlane.f32.xlu1 %v2767_v13  ;;  %2774 = vadd.xlane.f32.xlu0 %v2773_v59  ;;  %v2668_v27 = vsel %vm2665_vm9, %v2667_v62, %v2663_v54  ;;  %v2653_v29 = vsel %vm2650_vm10, %v2652_v42, %v2648_v30  ;;  %v2776_v58 = vsel %vm2670_vm6, %v2638_v51, 0.0  ;;  %v2832_v35 = vmul.f32 %v6961_v9, %v116_v8  ;;  %v123_v9 = vld [vmem:[%s7728_s2 + $0x48] sm:$0xff]  ;;  %v122_v13 = vld [vmem:[%s7728_s2 + $0x40] sm:$0xff] }
 0x382   :  { %2771 = vadd.xlane.f32.xlu2 %v2770_v12  ;;  %v2782_v15 = vsel %vm2670_vm6, %v2668_v27, 0.0  ;;  %v2779_v41 = vsel %vm2670_vm6, %v2653_v29, 0.0  ;;  %v2830_v40 = vmul.f32 %v6942_v49, %v114_v39  ;;  %v2831_v4 = vmul.f32 %v6946_v14, %v115_v55  ;;  %v118_v49 = vld [vmem:[%s7728_s2 + $0x20] sm:$0xff]  ;;  %v128_v12 = vld [vmem:[%s7728_s2 + $0x70] sm:$0xff]  ;;  %v131_v54 = vld [vmem:[%s7728_s2 + $0x88] sm:$0xff] }
 0x383   :  { %v2833_v1 = vmul.f32 %v7026_v44, %v117_v21  ;;  %v2834_v60 = vmul.f32 %v7088_v32, %v118_v49  ;;  %v2835_v32 = vmul.f32 %v7148_v6, %v119_v20  ;;  %v2836_v63 = vmul.f32 %v7215_v16, %v120_v33  ;;  %v130_v30 = vld [vmem:[%s7728_s2 + $0x80] sm:$0xff]  ;;  %v139_v20 = vld [vmem:[%s7728_s2 + $0xc8] sm:$0xff] }
 0x384   :  { %v2837_v16 = vmul.f32 %v7264_v2, %v121_v57  ;;  %v2838_v10 = vmul.f32 %v7330_v61, %v122_v13  ;;  %v134_v29 = vld [vmem:[%s7728_s2 + $0xa0] sm:$0xff] }
 0x385   :  { %v2700_v3 = vpop.xlane.xlu2 %2699  ;;  %v138_v33 = vld [vmem:[%s7728_s2 + $0xc0] sm:$0xff] }
 0x386   :  { %v2801_v53 = vmul.f32 %v6937_v26, %v2700_v3  ;;  %v132_v3 = vld [vmem:[%s7728_s2 + $0x90] sm:$0xff] }
 0x388   :  { %3144 = vst.msk [vmem:[%s7737_s11 + $0x48] sm:$0xff] %vm3134_vm13, %v2801_v53  ;;  %v2839_v11 = vmul.f32 %v2801_v53, %v123_v9 }
 0x389   :  { %2777 = vadd.xlane.f32.xlu1 %v2776_v58  ;;  %2783 = vadd.xlane.f32.xlu0 %v2782_v15  ;;  %v133_v15 = vld [vmem:[%s7728_s2 + $0x98] sm:$0xff] }
 0x38a   :  { %2780 = vadd.xlane.f32.xlu2 %v2779_v41 }
 0x38e   :  { %v2703_v36 = vpop.xlane.xlu0 %2702 }
 0x38f   :  { %v2802_v48 = vmul.f32 %v6937_v26, %v2703_v36 }
 0x391   :  { %3145 = vst.msk [vmem:[%s7737_s11 + $0x50] sm:$0xff] %vm3134_vm13, %v2802_v48  ;;  %v2840_v2 = vmul.f32 %v2802_v48, %v124_v31  ;;  %v142_v31 = vld [vmem:[%s7728_s2 + $0xe0] sm:$0xff] }
 0x399   :  { %v2706_v50 = vpop.xlane.xlu1 %2705 }
 0x39a   :  { %v2803_v24 = vmul.f32 %v6937_v26, %v2706_v50  ;;  %v137_v50 = vld [vmem:[%s7728_s2 + $0xb8] sm:$0xff] }
 0x39c   :  { %3146 = vst.msk [vmem:[%s7737_s11 + $0x58] sm:$0xff] %vm3134_vm13, %v2803_v24  ;;  %v2841_v34 = vmul.f32 %v2803_v24, %v125_v52 }
 0x39d   :  { %2880 = vperm.xlu0 %3272, %v2832_v35  }
 0x3a1   :  { %v2709_v5 = vpop.xlane.xlu2 %2708 }
 0x3a2   :  { %2875 = vperm.xlu2 %3271, %v2831_v4   ;;  %2870 = vperm.xlu1 %3270, %v2830_v40   ;;  %v2804_v14 = vmul.f32 %v6937_v26, %v2709_v5  ;;  %v135_v40 = vld [vmem:[%s7728_s2 + $0xa8] sm:$0xff]  ;;  %v136_v4 = vld [vmem:[%s7728_s2 + $0xb0] sm:$0xff] }
 0x3a4   :  { %3147 = vst.msk [vmem:[%s7737_s11 + $0x60] sm:$0xff] %vm3134_vm13, %v2804_v14  ;;  %v2842_v0 = vmul.f32 %v2804_v14, %v126_v25  ;;  %v140_v25 = vld [vmem:[%s7728_s2 + $0xd0] sm:$0xff] }
 0x3a5   :  { %2915 = vperm.xlu0 %3272, %v2839_v11  }
 0x3aa   :  { %2885 = vperm.xlu2 %3271, %v2833_v1   ;;  %2890 = vperm.xlu1 %3270, %v2834_v60  }
 0x3ab   :  { %v2712_v23 = vpop.xlane.xlu0 %2711 }
 0x3ac   :  { %v2805_v44 = vmul.f32 %v6937_v26, %v2712_v23 }
 0x3ad   :  { %2930 = vperm.xlu0 %3272, %v2842_v0  }
 0x3ae   :  { %3148 = vst.msk [vmem:[%s7737_s11 + $0x68] sm:$0xff] %vm3134_vm13, %v2805_v44  ;;  %v2843_v22 = vmul.f32 %v2805_v44, %v127_v37 }
 0x3b2   :  { %2895 = vperm.xlu2 %3271, %v2835_v32   ;;  %2900 = vperm.xlu1 %3270, %v2836_v63  }
 0x3b4   :  { %v2715_v46 = vpop.xlane.xlu1 %2714 }
 0x3b5   :  { %v2806_v6 = vmul.f32 %v6937_v26, %v2715_v46 }
 0x3b7   :  { %3149 = vst.msk [vmem:[%s7737_s11 + $0x70] sm:$0xff] %vm3134_vm13, %v2806_v6  ;;  %v2844_v28 = vmul.f32 %v2806_v6, %v128_v12  ;;  %v145_v12 = vld [vmem:[%s7728_s2 + $0xf8] sm:$0xff] }
 0x3ba   :  { %2905 = vperm.xlu2 %3271, %v2837_v16   ;;  %2910 = vperm.xlu1 %3270, %v2838_v10   ;;  %v143_v16 = vld [vmem:[%s7728_s2 + $0xe8] sm:$0xff] }
 0x3bd   :  { %v2718_v17 = vpop.xlane.xlu2 %2717 }
 0x3be   :  { %v2807_v18 = vmul.f32 %v6937_v26, %v2718_v17 }
 0x3c0   :  { %v2845_v38 = vmul.f32 %v2807_v18, %v129_v7  ;;  %3150 = vst.msk [vmem:[%s7737_s11 + $0x78] sm:$0xff] %vm3134_vm13, %v2807_v18  ;;  %v141_v7 = vld [vmem:[%s7728_s2 + $0xd8] sm:$0xff] }
 0x3c2   :  { %2945 = vperm.xlu0 %3272, %v2845_v38   ;;  %2920 = vperm.xlu2 %3271, %v2840_v2  }
 0x3c3   :  { %2925 = vperm.xlu1 %3270, %v2841_v34  }
 0x3c4   :  { %v2721_v59 = vpop.xlane.xlu0 %2720 }
 0x3c5   :  { %v2736_v19 = vpop.xlane.xlu2 %2735  ;;  %v2808_v47 = vmul.f32 %v6937_v26, %v2721_v59 }
 0x3c6   :  { %v2813_v45 = vmul.f32 %v6937_v26, %v2736_v19  ;;  %v146_v19 = vld [vmem:[%s7728_s2 + $0x100] sm:$0xff] }
 0x3c7   :  { %3151 = vst.msk [vmem:[%s7737_s11 + $0x80] sm:$0xff] %vm3134_vm13, %v2808_v47  ;;  %v2846_v51 = vmul.f32 %v2808_v47, %v130_v30 }
 0x3c8   :  { %3156 = vst.msk [vmem:[%s7737_s11 + $0xa8] sm:$0xff] %vm3134_vm13, %v2813_v45  ;;  %v2851_v14 = vmul.f32 %v2813_v45, %v135_v40  ;;  %v144_v45 = vld [vmem:[%s7728_s2 + $0xf0] sm:$0xff] }
 0x3ca   :  { %2935 = vperm.xlu2 %3271, %v2843_v22  }
 0x3cb   :  { %2940 = vperm.xlu1 %3270, %v2844_v28  }
 0x3cc   :  { %v2730_v56 = vpop.xlane.xlu0 %2729  ;;  %v2724_v61 = vpop.xlane.xlu1 %2723 }
 0x3cd   :  { %v2811_v43 = vmul.f32 %v6937_v26, %v2730_v56  ;;  %v2809_v62 = vmul.f32 %v6937_v26, %v2724_v61 }
 0x3cf   :  { %3154 = vst.msk [vmem:[%s7737_s11 + $0x98] sm:$0xff] %vm3134_vm13, %v2811_v43  ;;  %v2847_v42 = vmul.f32 %v2809_v62, %v131_v54  ;;  %v2849_v35 = vmul.f32 %v2811_v43, %v133_v15 }
 0x3d0   :  { %3152 = vst.msk [vmem:[%s7737_s11 + $0x88] sm:$0xff] %vm3134_vm13, %v2809_v62 }
 0x3d2   :  { %2950 = vperm.xlu2 %3271, %v2846_v51  }
 0x3d3   :  { %2955 = vperm.xlu1 %3270, %v2847_v42   ;;  %v149_v42 = vld [vmem:[%s7728_s2 + $0x118] sm:$0xff] }
 0x3d4   :  { %v2739_v27 = vpop.xlane.xlu0 %2738  ;;  %v2733_v58 = vpop.xlane.xlu1 %2732 }
 0x3d5   :  { %v2814_v41 = vmul.f32 %v6937_v26, %v2739_v27  ;;  %v2727_v53 = vpop.xlane.xlu2 %2726  ;;  %v2812_v36 = vmul.f32 %v6937_v26, %v2733_v58  ;;  %v147_v27 = vld [vmem:[%s7728_s2 + $0x108] sm:$0xff] }
 0x3d6   :  { %v2810_v48 = vmul.f32 %v6937_v26, %v2727_v53 }
 0x3d7   :  { %3157 = vst.msk [vmem:[%s7737_s11 + $0xb0] sm:$0xff] %vm3134_vm13, %v2814_v41  ;;  %v2850_v8 = vmul.f32 %v2812_v36, %v134_v29  ;;  %v2852_v1 = vmul.f32 %v2814_v41, %v136_v4  ;;  %v148_v29 = vld [vmem:[%s7728_s2 + $0x110] sm:$0xff]  ;;  %v3560_v4 = vld [vmem:[%s7727_s1 + $0x18] sm:$0xff] }
 0x3d8   :  { %v2848_v39 = vmul.f32 %v2810_v48, %v132_v3  ;;  %3153 = vst.msk [vmem:[%s7737_s11 + $0x90] sm:$0xff] %vm3134_vm13, %v2810_v48 }
 0x3d9   :  { %3155 = vst.msk [vmem:[%s7737_s11 + $0xa0] sm:$0xff] %vm3134_vm13, %v2812_v36 }
 0x3da   :  { %2960 = vperm.xlu0 %3272, %v2848_v39   ;;  %2965 = vperm.xlu2 %3271, %v2849_v35   ;;  %v3559_v39 = vld [vmem:[%s7727_s1 + $0x8] sm:$0xff] }
 0x3db   :  { %2970 = vperm.xlu1 %3270, %v2850_v8   ;;  %v151_v8 = vld [vmem:[%s7728_s2 + $0x128] sm:$0xff] }
 0x3dc   :  { %v2748_v55 = vpop.xlane.xlu0 %2747  ;;  %v2742_v24 = vpop.xlane.xlu1 %2741 }
 0x3dd   :  { %v2817_v9 = vmul.f32 %v6937_v26, %v2748_v55  ;;  %v2745_v11 = vpop.xlane.xlu2 %2744  ;;  %v2815_v5 = vmul.f32 %v6937_v26, %v2742_v24 }
 0x3de   :  { %v2816_v21 = vmul.f32 %v6937_v26, %v2745_v11 }
 0x3df   :  { %3160 = vst.msk [vmem:[%s7737_s11 + $0xc8] sm:$0xff] %vm3134_vm13, %v2817_v9  ;;  %v2853_v49 = vmul.f32 %v2815_v5, %v137_v50  ;;  %v2855_v57 = vmul.f32 %v2817_v9, %v139_v20 }
 0x3e0   :  { %3159 = vst.msk [vmem:[%s7737_s11 + $0xc0] sm:$0xff] %vm3134_vm13, %v2816_v21  ;;  %v2854_v13 = vmul.f32 %v2816_v21, %v138_v33  ;;  %v3564_v33 = vld [vmem:[%s7727_s1 + $0x48] sm:$0xff] }
 0x3e1   :  { %3158 = vst.msk [vmem:[%s7737_s11 + $0xb8] sm:$0xff] %vm3134_vm13, %v2815_v5  ;;  %v3561_v5 = vld [vmem:[%s7727_s1 + $0x10] sm:$0xff] }
 0x3e2   :  { %2975 = vperm.xlu0 %3272, %v2851_v14   ;;  %2980 = vperm.xlu2 %3271, %v2852_v1   ;;  %v3562_v1 = vld [vmem:[%s7727_s1] sm:$0xff] }
 0x3e3   :  { %2985 = vperm.xlu1 %3270, %v2853_v49  }
 0x3e4   :  { %v2757_v60 = vpop.xlane.xlu0 %2756  ;;  %v2751_v0 = vpop.xlane.xlu1 %2750 }
 0x3e5   :  { %v2820_v23 = vmul.f32 %v6937_v26, %v2757_v60  ;;  %v2754_v44 = vpop.xlane.xlu2 %2753  ;;  %v2818_v32 = vmul.f32 %v6937_v26, %v2751_v0 }
 0x3e6   :  { %v2819_v63 = vmul.f32 %v6937_v26, %v2754_v44 }
 0x3e7   :  { %3163 = vst.msk [vmem:[%s7737_s11 + $0xe0] sm:$0xff] %vm3134_vm13, %v2820_v23  ;;  %v2856_v46 = vmul.f32 %v2818_v32, %v140_v25  ;;  %v2858_v34 = vmul.f32 %v2820_v23, %v142_v31  ;;  %v3563_v25 = vld [vmem:[%s7727_s1 + $0x28] sm:$0xff] }
 0x3e8   :  { %3162 = vst.msk [vmem:[%s7737_s11 + $0xd8] sm:$0xff] %vm3134_vm13, %v2819_v63  ;;  %v2857_v59 = vmul.f32 %v2819_v63, %v141_v7  ;;  %v3565_v63 = vld [vmem:[%s7727_s1 + $0x20] sm:$0xff] }
 0x3e9   :  { %3161 = vst.msk [vmem:[%s7737_s11 + $0xd0] sm:$0xff] %vm3134_vm13, %v2818_v32 }
 0x3ea   :  { %2990 = vperm.xlu0 %3272, %v2854_v13   ;;  %2995 = vperm.xlu2 %3271, %v2855_v57   ;;  %v3566_v57 = vld [vmem:[%s7727_s1 + $0x38] sm:$0xff] }
 0x3eb   :  { %3000 = vperm.xlu1 %3270, %v2856_v46  }
 0x3ec   :  { %v2766_v6 = vpop.xlane.xlu0 %2765  ;;  %v2760_v10 = vpop.xlane.xlu1 %2759 }
 0x3ed   :  { %v2823_v17 = vmul.f32 %v6937_v26, %v2766_v6  ;;  %v2763_v52 = vpop.xlane.xlu2 %2762  ;;  %v2821_v18 = vmul.f32 %v6937_v26, %v2760_v10 }
 0x3ee   :  { %v2822_v2 = vmul.f32 %v6937_v26, %v2763_v52 }
 0x3ef   :  { %3166 = vst.msk [vmem:[%s7737_s11 + $0xf8] sm:$0xff] %vm3134_vm13, %v2823_v17  ;;  %v2859_v38 = vmul.f32 %v2821_v18, %v143_v16  ;;  %v2861_v30 = vmul.f32 %v2823_v17, %v145_v12  ;;  %v3567_v16 = vld [vmem:[%s7727_s1 + $0x60] sm:$0xff]  ;;  %v3568_v17 = vld [vmem:[%s7727_s1 + $0x30] sm:$0xff] }
 0x3f0   :  { %3165 = vst.msk [vmem:[%s7737_s11 + $0xf0] sm:$0xff] %vm3134_vm13, %v2822_v2  ;;  %v2860_v43 = vmul.f32 %v2822_v2, %v144_v45  ;;  %v3572_v45 = vld [vmem:[%s7727_s1 + $0x78] sm:$0xff] }
 0x3f1   :  { %3164 = vst.msk [vmem:[%s7737_s11 + $0xe8] sm:$0xff] %vm3134_vm13, %v2821_v18  ;;  %v3569_v18 = vld [vmem:[%s7727_s1 + $0x50] sm:$0xff] }
 0x3f2   :  { %3005 = vperm.xlu0 %3272, %v2857_v59   ;;  %3010 = vperm.xlu2 %3271, %v2858_v34   ;;  %v3570_v59 = vld [vmem:[%s7727_s1 + $0x40] sm:$0xff] }
 0x3f3   :  { %3015 = vperm.xlu1 %3270, %v2859_v38  }
 0x3f4   :  { %v2775_v37 = vpop.xlane.xlu0 %2774  ;;  %v2769_v47 = vpop.xlane.xlu1 %2768 }
 0x3f5   :  { %v2772_v22 = vpop.xlane.xlu2 %2771  ;;  %v2826_v28 = vmul.f32 %v6937_v26, %v2775_v37  ;;  %v2824_v56 = vmul.f32 %v6937_v26, %v2769_v47 }
 0x3f6   :  { %v2825_v54 = vmul.f32 %v6937_v26, %v2772_v22 }
 0x3f7   :  { %3169 = vst.msk [vmem:[%s7737_s11 + $0x110] sm:$0xff] %vm3134_vm13, %v2826_v28  ;;  %v2862_v61 = vmul.f32 %v2824_v56, %v146_v19  ;;  %v2864_v48 = vmul.f32 %v2826_v28, %v148_v29  ;;  %v3571_v19 = vld [vmem:[%s7727_s1 + $0x68] sm:$0xff]  ;;  %v3576_v29 = vld [vmem:[%s7727_s1 + $0x70] sm:$0xff] }
 0x3f8   :  { %3168 = vst.msk [vmem:[%s7737_s11 + $0x108] sm:$0xff] %vm3134_vm13, %v2825_v54  ;;  %v2863_v36 = vmul.f32 %v2825_v54, %v147_v27  ;;  %v3573_v54 = vld [vmem:[%s7727_s1 + $0x80] sm:$0xff] }
 0x3f9   :  { %3167 = vst.msk [vmem:[%s7737_s11 + $0x100] sm:$0xff] %vm3134_vm13, %v2824_v56 }
 0x3fa   :  { %3020 = vperm.xlu0 %3272, %v2860_v43   ;;  %3025 = vperm.xlu2 %3271, %v2861_v30   ;;  %v3574_v30 = vld [vmem:[%s7727_s1 + $0x58] sm:$0xff] }
 0x3fb   :  { %3030 = vperm.xlu1 %3270, %v2862_v61  }
 0x3fc   :  { %v2784_v62 = vpop.xlane.xlu0 %2783  ;;  %v2778_v51 = vpop.xlane.xlu1 %2777 }
 0x3fd   :  { %v2781_v58 = vpop.xlane.xlu2 %2780  ;;  %v2829_v15 = vmul.f32 %v6937_v26, %v2784_v62  ;;  %v2827_v41 = vmul.f32 %v6937_v26, %v2778_v51  ;;  %v3575_v51 = vld [vmem:[%s7727_s1 + $0x98] sm:$0xff] }
 0x3fe   :  { %v2828_v3 = vmul.f32 %v6937_v26, %v2781_v58  ;;  %v150_v26 = vld [vmem:[%s7728_s2 + $0x120] sm:$0xff] }
 0x3ff   :  { %3172 = vst.msk [vmem:[%s7737_s11 + $0x128] sm:$0xff] %vm3134_vm13, %v2829_v15  ;;  %v2865_v53 = vmul.f32 %v2827_v41, %v149_v42  ;;  %v2867_v24 = vmul.f32 %v2829_v15, %v151_v8  ;;  %v3579_v8 = vld [vmem:[%s7727_s1 + $0x90] sm:$0xff] }
 0x400   :  { %3171 = vst.msk [vmem:[%s7737_s11 + $0x120] sm:$0xff] %vm3134_vm13, %v2828_v3  ;;  %v2866_v50 = vmul.f32 %v2828_v3, %v150_v26  ;;  %v3577_v3 = vld [vmem:[%s7727_s1 + $0xb0] sm:$0xff] }
 0x401   :  { %3170 = vst.msk [vmem:[%s7737_s11 + $0x118] sm:$0xff] %vm3134_vm13, %v2827_v41 }
 0x402   :  { %3035 = vperm.xlu0 %3272, %v2863_v36   ;;  %3040 = vperm.xlu2 %3271, %v2864_v48   ;;  %v3578_v36 = vld [vmem:[%s7727_s1 + $0x88] sm:$0xff] }
 0x403   :  { %3045 = vperm.xlu1 %3270, %v2865_v53  }
 0x405   :  { %v2876_v35 = vpop.permute.xlu2 %2875 }
 0x406   :  { %v3059_v55 = vmul.f32 %v3559_v39, %v2876_v35 }
 0x408   :  { %3097 = vst [vmem:[#allocation2 + $0x8] sm:$0xff] %v3059_v55 }
 0x40a   :  { %3050 = vperm.xlu0 %3272, %v2866_v50   ;;  %3055 = vperm.xlu2 %3271, %v2867_v24   ;;  %v3580_v50 = vld [vmem:[%s7727_s1 + $0xc8] sm:$0xff] }
 0x40d   :  { %v2886_v40 = vpop.permute.xlu2 %2885 }
 0x40e   :  { %v3061_v9 = vmul.f32 %v3560_v4, %v2886_v40  ;;  %v3581_v40 = vld [vmem:[%s7727_s1 + $0xa0] sm:$0xff] }
 0x40f   :  { %v2881_v11 = vpop.permute.xlu0 %2880 }
 0x410   :  { %3099 = vst [vmem:[#allocation2 + $0x18] sm:$0xff] %v3061_v9  ;;  %v3060_v21 = vmul.f32 %v3561_v5, %v2881_v11  ;;  %v3582_v11 = vld [vmem:[%s7727_s1 + $0xa8] sm:$0xff] }
 0x412   :  { %3098 = vst [vmem:[#allocation2 + $0x10] sm:$0xff] %v3060_v21 }
 0x414   :  { %v2871_v49 = vpop.permute.xlu1 %2870 }
 0x415   :  { %v2896_v14 = vpop.permute.xlu2 %2895  ;;  %v3058_v60 = vmul.f32 %v3562_v1, %v2871_v49 }
 0x416   :  { %v3063_v0 = vmul.f32 %v3563_v25, %v2896_v14  ;;  %v3583_v14 = vld [vmem:[%s7727_s1 + $0xe0] sm:$0xff] }
 0x417   :  { %3096 = vst [vmem:[#allocation2] sm:$0xff] %v3058_v60  ;;  %v2916_v20 = vpop.permute.xlu0 %2915  ;;  %v3584_v60 = vld [vmem:[%s7727_s1 + $0xb8] sm:$0xff] }
 0x418   :  { %3101 = vst [vmem:[#allocation2 + $0x28] sm:$0xff] %v3063_v0  ;;  %v3067_v23 = vmul.f32 %v3564_v33, %v2916_v20  ;;  %v3585_v20 = vld [vmem:[%s7727_s1 + $0xc0] sm:$0xff] }
 0x41a   :  { %3105 = vst [vmem:[#allocation2 + $0x48] sm:$0xff] %v3067_v23 }
 0x41c   :  { %v2891_v44 = vpop.permute.xlu1 %2890 }
 0x41d   :  { %v2906_v32 = vpop.permute.xlu2 %2905  ;;  %v3062_v46 = vmul.f32 %v3565_v63, %v2891_v44 }
 0x41e   :  { %v3065_v13 = vmul.f32 %v3566_v57, %v2906_v32  ;;  %v3586_v32 = vld [vmem:[%s7727_s1 + $0xf8] sm:$0xff] }
 0x41f   :  { %3100 = vst [vmem:[#allocation2 + $0x20] sm:$0xff] %v3062_v46  ;;  %v2931_v6 = vpop.permute.xlu0 %2930  ;;  %v3587_v46 = vld [vmem:[%s7727_s1 + $0xd0] sm:$0xff] }
 0x420   :  { %3103 = vst [vmem:[#allocation2 + $0x38] sm:$0xff] %v3065_v13  ;;  %v3070_v10 = vmul.f32 %v3567_v16, %v2931_v6  ;;  %v3588_v6 = vld [vmem:[%s7727_s1 + $0xd8] sm:$0xff] }
 0x422   :  { %3108 = vst [vmem:[#allocation2 + $0x60] sm:$0xff] %v3070_v10 }
 0x424   :  { %v2901_v31 = vpop.permute.xlu1 %2900 }
 0x425   :  { %v2921_v7 = vpop.permute.xlu2 %2920  ;;  %v3064_v52 = vmul.f32 %v3568_v17, %v2901_v31 }
 0x426   :  { %v3068_v2 = vmul.f32 %v3569_v18, %v2921_v7  ;;  %v3589_v7 = vld [vmem:[%s7727_s1 + $0x110] sm:$0xff] }
 0x427   :  { %3102 = vst [vmem:[#allocation2 + $0x30] sm:$0xff] %v3064_v52  ;;  %v3590_v52 = vld [vmem:[%s7727_s1 + $0xe8] sm:$0xff] }
 0x428   :  { %3106 = vst [vmem:[#allocation2 + $0x50] sm:$0xff] %v3068_v2 }
 0x42c   :  { %v2911_v38 = vpop.permute.xlu1 %2910 }
 0x42d   :  { %v2936_v34 = vpop.permute.xlu2 %2935  ;;  %v3066_v37 = vmul.f32 %v3570_v59, %v2911_v38  ;;  %v3591_v38 = vld [vmem:[%s7727_s1 + $0xf0] sm:$0xff] }
 0x42e   :  { %v3071_v47 = vmul.f32 %v3571_v19, %v2936_v34  ;;  %v3592_v19 = vld [vmem:[%s7727_s1 + $0x128] sm:$0xff] }
 0x42f   :  { %3104 = vst [vmem:[#allocation2 + $0x40] sm:$0xff] %v3066_v37 }
 0x430   :  { %3109 = vst [vmem:[#allocation2 + $0x68] sm:$0xff] %v3071_v47 }
 0x434   :  { %v2946_v12 = vpop.permute.xlu0 %2945 }
 0x435   :  { %v3073_v22 = vmul.f32 %v3572_v45, %v2946_v12  ;;  %v2951_v28 = vpop.permute.xlu2 %2950  ;;  %v2926_v56 = vpop.permute.xlu1 %2925  ;;  %v3593_v12 = vld [vmem:[%s7727_s1 + $0x100] sm:$0xff] }
 0x436   :  { %v3074_v61 = vmul.f32 %v3573_v54, %v2951_v28  ;;  %v3069_v43 = vmul.f32 %v3574_v30, %v2926_v56  ;;  %v3594_v28 = vld [vmem:[%s7727_s1 + $0x108] sm:$0xff] }
 0x437   :  { %3111 = vst [vmem:[#allocation2 + $0x78] sm:$0xff] %v3073_v22 }
 0x438   :  { %3112 = vst [vmem:[#allocation2 + $0x80] sm:$0xff] %v3074_v61  ;;  %v3595_v61 = vld [vmem:[%s7727_s1 + $0x118] sm:$0xff] }
 0x439   :  { %3107 = vst [vmem:[#allocation2 + $0x58] sm:$0xff] %v3069_v43 }
 0x43d   :  { %v2966_v62 = vpop.permute.xlu2 %2965  ;;  %v2941_v42 = vpop.permute.xlu1 %2940 }
 0x43e   :  { %v3077_v27 = vmul.f32 %v3575_v51, %v2966_v62  ;;  %v3072_v58 = vmul.f32 %v3576_v29, %v2941_v42  ;;  %v3596_v62 = vld [vmem:[%s7727_s1 + $0x120] sm:$0xff] }
 0x440   :  { %3115 = vst [vmem:[#allocation2 + $0x98] sm:$0xff] %v3077_v27 }
 0x441   :  { %3110 = vst [vmem:[#allocation2 + $0x70] sm:$0xff] %v3072_v58 }
 0x445   :  { %v2981_v15 = vpop.permute.xlu2 %2980  ;;  %v2956_v41 = vpop.permute.xlu1 %2955 }
 0x446   :  { %v3080_v53 = vmul.f32 %v3577_v3, %v2981_v15  ;;  %v3075_v48 = vmul.f32 %v3578_v36, %v2956_v41 }
 0x448   :  { %3118 = vst [vmem:[#allocation2 + $0xb0] sm:$0xff] %v3080_v53 }
 0x449   :  { %3113 = vst [vmem:[#allocation2 + $0x88] sm:$0xff] %v3075_v48 }
 0x44c   :  { %v2961_v26 = vpop.permute.xlu0 %2960 }
 0x44d   :  { %v3076_v35 = vmul.f32 %v3579_v8, %v2961_v26  ;;  %v2996_v39 = vpop.permute.xlu2 %2995  ;;  %v2971_v55 = vpop.permute.xlu1 %2970 }
 0x44e   :  { %v3083_v24 = vmul.f32 %v3580_v50, %v2996_v39  ;;  %v3078_v4 = vmul.f32 %v3581_v40, %v2971_v55 }
 0x44f   :  { %3114 = vst [vmem:[#allocation2 + $0x90] sm:$0xff] %v3076_v35 }
 0x450   :  { %3121 = vst [vmem:[#allocation2 + $0xc8] sm:$0xff] %v3083_v24 }
 0x451   :  { %3116 = vst [vmem:[#allocation2 + $0xa0] sm:$0xff] %v3078_v4 }
 0x454   :  { %v2976_v9 = vpop.permute.xlu0 %2975 }
 0x455   :  { %v3079_v5 = vmul.f32 %v3582_v11, %v2976_v9  ;;  %v3011_v21 = vpop.permute.xlu2 %3010  ;;  %v2986_v49 = vpop.permute.xlu1 %2985 }
 0x456   :  { %v3086_v1 = vmul.f32 %v3583_v14, %v3011_v21  ;;  %v3081_v25 = vmul.f32 %v3584_v60, %v2986_v49 }
 0x457   :  { %3117 = vst [vmem:[#allocation2 + $0xa8] sm:$0xff] %v3079_v5 }
 0x458   :  { %3124 = vst [vmem:[#allocation2 + $0xe0] sm:$0xff] %v3086_v1 }
 0x459   :  { %3119 = vst [vmem:[#allocation2 + $0xb8] sm:$0xff] %v3081_v25 }
 0x45c   :  { %v2991_v0 = vpop.permute.xlu0 %2990 }
 0x45d   :  { %v3082_v33 = vmul.f32 %v3585_v20, %v2991_v0  ;;  %v3026_v23 = vpop.permute.xlu2 %3025  ;;  %v3001_v44 = vpop.permute.xlu1 %3000 }
 0x45e   :  { %v3089_v63 = vmul.f32 %v3586_v32, %v3026_v23  ;;  %v3084_v57 = vmul.f32 %v3587_v46, %v3001_v44 }
 0x45f   :  { %3120 = vst [vmem:[#allocation2 + $0xc0] sm:$0xff] %v3082_v33 }
 0x460   :  { %3127 = vst [vmem:[#allocation2 + $0xf8] sm:$0xff] %v3089_v63 }
 0x461   :  { %3122 = vst [vmem:[#allocation2 + $0xd0] sm:$0xff] %v3084_v57 }
 0x464   :  { %v3006_v13 = vpop.permute.xlu0 %3005 }
 0x465   :  { %v3085_v16 = vmul.f32 %v3588_v6, %v3006_v13  ;;  %v3041_v10 = vpop.permute.xlu2 %3040  ;;  %v3016_v31 = vpop.permute.xlu1 %3015 }
 0x466   :  { %v3092_v17 = vmul.f32 %v3589_v7, %v3041_v10  ;;  %v3087_v18 = vmul.f32 %v3590_v52, %v3016_v31 }
 0x467   :  { %3123 = vst [vmem:[#allocation2 + $0xd8] sm:$0xff] %v3085_v16 }
 0x468   :  { %3130 = vst [vmem:[#allocation2 + $0x110] sm:$0xff] %v3092_v17 }
 0x469   :  { %3125 = vst [vmem:[#allocation2 + $0xe8] sm:$0xff] %v3087_v18 }
 0x46c   :  { %v3021_v2 = vpop.permute.xlu0 %3020 }
 0x46d   :  { %v3088_v34 = vmul.f32 %v3591_v38, %v3021_v2  ;;  %v3056_v59 = vpop.permute.xlu2 %3055  ;;  %v3031_v37 = vpop.permute.xlu1 %3030 }
 0x46e   :  { %v3095_v47 = vmul.f32 %v3592_v19, %v3056_v59  ;;  %v3090_v45 = vmul.f32 %v3593_v12, %v3031_v37 }
 0x46f   :  { %3126 = vst [vmem:[#allocation2 + $0xf0] sm:$0xff] %v3088_v34 }
 0x470   :  { %3133 = vst [vmem:[#allocation2 + $0x128] sm:$0xff] %v3095_v47 }
 0x471   :  { %3128 = vst [vmem:[#allocation2 + $0x100] sm:$0xff] %v3090_v45 }
 0x474   :  { %v3036_v22 = vpop.permute.xlu0 %3035 }
 0x475   :  { %v3091_v56 = vmul.f32 %v3594_v28, %v3036_v22  ;;  %v3046_v54 = vpop.permute.xlu1 %3045 }
 0x476   :  { %v3093_v30 = vmul.f32 %v3595_v61, %v3046_v54 }
 0x477   :  { %3129 = vst [vmem:[#allocation2 + $0x108] sm:$0xff] %v3091_v56 }
 0x478   :  { %3131 = vst [vmem:[#allocation2 + $0x118] sm:$0xff] %v3093_v30 }
 0x47c   :  { %v3051_v43 = vpop.permute.xlu0 %3050 }
 0x47d   :  { %v3094_v42 = vmul.f32 %v3596_v62, %v3051_v43 }
 0x47f   :  { %3132 = vst [vmem:[#allocation2 + $0x120] sm:$0xff] %v3094_v42 }
 0x480   :  { %3185 = dma.vmem_to_hbm [thread:$0]  %s3178_s30, 4864, %s3180_s14, [#allocation3], %s3626_s17, %s3626_s17, %s3627_s18  }
 0x481   :  { %3621 = dma.done.wait [#allocation3], 4864  }
 0x482   :  { %3622 = vsyncadd [#allocation3], 4294962432 }
 0x483   :  { %3194 = vsyncpa [#allocation3], 1 }

</bundles_post_ra>
